<compile_context>
chip_gen: v5e
topology: v5e:2x2
jax: 0.10.0
libtpu: 0.0.40
codegen_flags: <defaults>
</compile_context>

<pallas_src>
import functools

import jax
import jax.numpy as jnp
from jax.experimental import pallas as pl
from jax.experimental.pallas import tpu as pltpu

LANE = 128
# Batch-tile alignment: 16 keeps bf16 (16,128) sublane packing happy for the
# bf16 x / y blocks at tiny batch sizes.
ROW_ALIGN = 16


def _round_up(x: int, m: int) -> int:
    return (x + m - 1) // m * m


def _pad2(a, rows, cols):
    return jnp.pad(a, ((0, rows - a.shape[0]), (0, cols - a.shape[1])))


def vae_forward_kernel(
    x_ref,
    w1_ref, b1_ref,
    w2_ref, b2_ref,
    wm_ref, bm_ref,
    d1w_ref, d1b_ref,
    d2w_ref, d2b_ref,
    d3w_ref, d3b_ref,
    y_ref, z_ref,
):
    """Whole eval-mode forward for one batch tile; all weights VMEM-resident."""
    x = x_ref[...]  # already bf16

    # ---- encoder ----
    h1 = jnp.dot(x, w1_ref[...], preferred_element_type=jnp.float32) + b1_ref[...]
    h1 = jnp.maximum(h1, 0.0).astype(jnp.bfloat16)

    h2 = jnp.dot(h1, w2_ref[...], preferred_element_type=jnp.float32) + b2_ref[...]
    h2 = jnp.maximum(h2, 0.0).astype(jnp.bfloat16)

    mean = jnp.dot(h2, wm_ref[...], preferred_element_type=jnp.float32) + bm_ref[...]
    z = jnp.maximum(mean, 0.0)          # reference applies ReLU to enc_mean output
    z_ref[...] = z                      # eval mode: z = mean (std branch is dead)

    # ---- decoder ----
    zb = z.astype(jnp.bfloat16)
    d1 = jnp.dot(zb, d1w_ref[...], preferred_element_type=jnp.float32) + d1b_ref[...]
    d1 = jnp.maximum(d1, 0.0).astype(jnp.bfloat16)

    d2 = jnp.dot(d1, d2w_ref[...], preferred_element_type=jnp.float32) + d2b_ref[...]
    d2 = jnp.maximum(d2, 0.0).astype(jnp.bfloat16)
    # dropout(p=0.2) is identity in eval mode.

    logits = jnp.dot(d2, d3w_ref[...], preferred_element_type=jnp.float32) + d3b_ref[...]
    # sigmoid(x) = 1 / (1 + exp(-x)); approx reciprocal uses the EUP slot
    # instead of a full-precision divide sequence.
    y = pl.reciprocal(1.0 + jnp.exp(-logits), approx=True)
    y_ref[...] = y.astype(y_ref.dtype)


def prepare_params(params):
    """One-time weight prep (outside the hot path): lane-pad output dims of every
    layer to multiples of 128 and cast weights to bf16 (MXU-native).  Biases stay
    f32 because epilogues run in f32.  Zero padding preserves exact semantics:
    padded weight rows/cols and biases are 0, so padded activation columns stay 0
    through every ReLU."""
    in_f, h1 = params["w1"].shape
    h2 = params["w2"].shape[1]
    z = params["wm"].shape[1]

    H1 = _round_up(h1, LANE)    # 400 -> 512
    H2 = _round_up(h2, LANE)    # 200 -> 256
    ZP = _round_up(z, LANE)     # 16  -> 128
    OUT = _round_up(in_f, LANE)  # 784 -> 896 (y output kept lane-dense)

    bf16 = jnp.bfloat16
    return {
        # x keeps its native in_f (=784) feature columns, so w1 rows are NOT padded.
        "w1": _pad2(params["w1"], in_f, H1).astype(bf16),
        "b1": _pad2(params["b1"], 1, H1),
        "w2": _pad2(params["w2"], H1, H2).astype(bf16),
        "b2": _pad2(params["b2"], 1, H2),
        "wm": _pad2(params["wm"], H2, ZP).astype(bf16),
        "bm": _pad2(params["bm"], 1, ZP),
        "d1w": _pad2(params["d1w"], ZP, H2).astype(bf16),
        "d1b": _pad2(params["d1b"], 1, H2),
        "d2w": _pad2(params["d2w"], H2, H1).astype(bf16),
        "d2b": _pad2(params["d2b"], 1, H1),
        "d3w": _pad2(params["d3w"], H1, OUT).astype(bf16),
        "d3b": _pad2(params["d3b"], 1, OUT),
    }


def vae_forward(x, prepped, *, z_dim):
    """x: (B, 784) float32. prepped: output of prepare_params. Returns (y, z) f32."""
    B, in_features = x.shape
    out_p = prepped["d3w"].shape[1]   # lane-padded output width (896)
    z_p = prepped["wm"].shape[1]      # lane-padded z width (128)

    # --- batch tiling ------------------------------------------------------
    # Derive the tile from B so ragged batches don't pay up to a full tile of
    # wasted compute/DMA; force >=2 grid steps for B > 256 so v7x's second
    # TensorCore gets work on the "parallel" axis.  TB caps at 512 (v6e
    # mem-bound tiling sweet spot).
    TB_MAX = 512
    n_tiles = pl.cdiv(B, TB_MAX)
    if n_tiles == 1 and B > 256:
        n_tiles = 2
    TB = _round_up(pl.cdiv(B, n_tiles), ROW_ALIGN)
    Bp = TB * n_tiles

    # Only the batch axis of x is padded; pad + bf16 cast fuse into one XLA op.
    # Feature axis stays 784 (block last dim == full array dim is legal and the
    # bf16 K-dim 784 = 49*16 stays sublane-aligned).
    xp = jnp.pad(x.astype(jnp.bfloat16), ((0, Bp - B), (0, 0)))

    args = (
        xp,
        prepped["w1"], prepped["b1"],
        prepped["w2"], prepped["b2"],
        prepped["wm"], prepped["bm"],
        prepped["d1w"], prepped["d1b"],
        prepped["d2w"], prepped["d2b"],
        prepped["d3w"], prepped["d3b"],
    )

    def resident(a):
        # Same block every grid step -> DMA'd once, stays resident in VMEM.
        # (pl.Buffered(1) would also drop the unused second buffer, but the
        # total footprint already fits the 32 MiB request with headroom.)
        return pl.BlockSpec(a.shape, lambda i: (0, 0))

    in_specs = [pl.BlockSpec((TB, in_features), lambda i: (i, 0))] + [
        resident(a) for a in args[1:]
    ]
    out_specs = (
        pl.BlockSpec((TB, out_p), lambda i: (i, 0)),
        pl.BlockSpec((TB, z_p), lambda i: (i, 0)),
    )

    y_pad, z_pad = pl.pallas_call(
        vae_forward_kernel,
        grid=(n_tiles,),
        out_shape=(
            jax.ShapeDtypeStruct((Bp, out_p), jnp.bfloat16),  # y (batch/lane padded)
            jax.ShapeDtypeStruct((Bp, z_p), jnp.float32),     # z (batch/lane padded)
        ),
        in_specs=in_specs,
        out_specs=out_specs,
        compiler_params=pltpu.CompilerParams(
            dimension_semantics=("parallel",),
            vmem_limit_bytes=32 << 20,
        ),
    )(*args)

    # Strip padding; y back to f32 for the external API (fused slice + convert).
    y = y_pad[:B, :in_features].astype(jnp.float32)
    z = z_pad[:B, :z_dim]
    return y, z


def init_params(key, z_dim, in_features=28 * 28):
    """Deterministic PyTorch-style uniform init; weights stored as (in, out)."""
    def linear(key, fan_in, fan_out):
        kw, kb = jax.random.split(key)
        bound = 1.0 / jnp.sqrt(fan_in)
        w = jax.random.uniform(kw, (fan_in, fan_out), jnp.float32, -bound, bound)
        b = jax.random.uniform(kb, (1, fan_out), jnp.float32, -bound, bound)
        return w, b

    keys = jax.random.split(key, 7)
    params = {}
    params["w1"], params["b1"] = linear(keys[0], in_features, 400)
    params["w2"], params["b2"] = linear(keys[1], 400, 200)
    params["wm"], params["bm"] = linear(keys[2], 200, z_dim)
    params["wv"], params["bv"] = linear(keys[3], 200, z_dim)  # unused in eval fwd
    params["d1w"], params["d1b"] = linear(keys[4], z_dim, 200)
    params["d2w"], params["d2b"] = linear(keys[5], 200, 400)
    params["d3w"], params["d3b"] = linear(keys[6], 400, in_features)
    return params


def vae_forward_ref(x, params):
    """Pure-JAX f32 reference of the eval-mode forward."""
    h1 = jax.nn.relu(x @ params["w1"] + params["b1"])
    h2 = jax.nn.relu(h1 @ params["w2"] + params["b2"])
    z = jax.nn.relu(h2 @ params["wm"] + params["bm"])
    d1 = jax.nn.relu(z @ params["d1w"] + params["d1b"])
    d2 = jax.nn.relu(d1 @ params["d2w"] + params["d2b"])
    y = jax.nn.sigmoid(d2 @ params["d3w"] + params["d3b"])
    return y, z


if __name__ == "__main__":
    key = jax.random.PRNGKey(0)
    k_params, k_x = jax.random.split(key)

    B = 8
    Z_DIM = 16
    IN_FEATURES = 28 * 28

    params = init_params(k_params, Z_DIM, IN_FEATURES)
    prepped = prepare_params(params)   # one-time pad + bf16 cast, off the hot path

    # MNIST-like input: pixel values in [0, 1], flattened to (B, 784).
    x = jax.random.uniform(k_x, (B, IN_FEATURES), jnp.float32, 0.0, 1.0)

    fwd = jax.jit(functools.partial(vae_forward, z_dim=Z_DIM))
    y, z = fwd(x, prepped)
    jax.block_until_ready((y, z))

    assert y.shape == (B, IN_FEATURES) and z.shape == (B, Z_DIM)

    # Loose tolerance: kernel runs matmuls with bf16 operands (f32 accumulate)
    # and stores y in bf16 with an approx-reciprocal sigmoid.
    y_ref, z_ref = vae_forward_ref(x, params)
    assert bool(jnp.max(jnp.abs(y - y_ref)) < 0.1)
    assert bool(jnp.max(jnp.abs(z - z_ref)) < 0.1)

    print("KERNEL_OK")
</pallas_src>

<mosaic_0001>
module attributes {stable_mosaic.version = 11 : i64} {
  func.func @vae_forward_kernel(%arg0: i32, %arg1: memref<16x784xbf16, #tpu.memory_space<vmem>>, %arg2: memref<784x512xbf16, #tpu.memory_space<vmem>>, %arg3: memref<1x512xf32, #tpu.memory_space<vmem>>, %arg4: memref<512x256xbf16, #tpu.memory_space<vmem>>, %arg5: memref<1x256xf32, #tpu.memory_space<vmem>>, %arg6: memref<256x128xbf16, #tpu.memory_space<vmem>>, %arg7: memref<1x128xf32, #tpu.memory_space<vmem>>, %arg8: memref<128x256xbf16, #tpu.memory_space<vmem>>, %arg9: memref<1x256xf32, #tpu.memory_space<vmem>>, %arg10: memref<256x512xbf16, #tpu.memory_space<vmem>>, %arg11: memref<1x512xf32, #tpu.memory_space<vmem>>, %arg12: memref<512x896xbf16, #tpu.memory_space<vmem>>, %arg13: memref<1x896xf32, #tpu.memory_space<vmem>>, %arg14: memref<16x896xbf16, #tpu.memory_space<vmem>>, %arg15: memref<16x128xf32, #tpu.memory_space<vmem>>) attributes {dimension_semantics = [#tpu.dimension_semantics<parallel>], iteration_bounds = array<i64: 1>, scalar_prefetch = 0 : i64, scratch_operands = 0 : i64, tpu.core_type = #tpu.core_type<tc>, window_params = [{transform_indices = @transform_0, window_bounds = array<i64: 16, 784>}, {pipeline_mode = #tpu.pipeline_mode<synchronous>, transform_indices = @transform_1, window_bounds = array<i64: 784, 512>}, {pipeline_mode = #tpu.pipeline_mode<synchronous>, transform_indices = @transform_2, window_bounds = array<i64: 1, 512>}, {pipeline_mode = #tpu.pipeline_mode<synchronous>, transform_indices = @transform_3, window_bounds = array<i64: 512, 256>}, {pipeline_mode = #tpu.pipeline_mode<synchronous>, transform_indices = @transform_4, window_bounds = array<i64: 1, 256>}, {pipeline_mode = #tpu.pipeline_mode<synchronous>, transform_indices = @transform_5, window_bounds = array<i64: 256, 128>}, {pipeline_mode = #tpu.pipeline_mode<synchronous>, transform_indices = @transform_6, window_bounds = array<i64: 1, 128>}, {pipeline_mode = #tpu.pipeline_mode<synchronous>, transform_indices = @transform_7, window_bounds = array<i64: 128, 256>}, {pipeline_mode = #tpu.pipeline_mode<synchronous>, transform_indices = @transform_8, window_bounds = array<i64: 1, 256>}, {pipeline_mode = #tpu.pipeline_mode<synchronous>, transform_indices = @transform_9, window_bounds = array<i64: 256, 512>}, {pipeline_mode = #tpu.pipeline_mode<synchronous>, transform_indices = @transform_10, window_bounds = array<i64: 1, 512>}, {pipeline_mode = #tpu.pipeline_mode<synchronous>, transform_indices = @transform_11, window_bounds = array<i64: 512, 896>}, {pipeline_mode = #tpu.pipeline_mode<synchronous>, transform_indices = @transform_12, window_bounds = array<i64: 1, 896>}, {transform_indices = @transform_13, window_bounds = array<i64: 16, 896>}, {transform_indices = @transform_14, window_bounds = array<i64: 16, 128>}]} {
    %c0 = arith.constant 0 : index
    %c0_0 = arith.constant 0 : index
    %0 = vector.load %arg1[%c0, %c0_0] : memref<16x784xbf16, #tpu.memory_space<vmem>>, vector<16x784xbf16>
    %c0_1 = arith.constant 0 : index
    %c0_2 = arith.constant 0 : index
    %1 = vector.load %arg2[%c0_1, %c0_2] : memref<784x512xbf16, #tpu.memory_space<vmem>>, vector<784x512xbf16>
    %cst = arith.constant dense<0.000000e+00> : vector<16x512xf32>
    %2 = tpu.matmul %0, %1, %cst {dimension_numbers = #tpu.dot_dimension_numbers<[1], [0], [0], [1], [0, 0, 1, 1], [], []>} : vector<16x784xbf16>, vector<784x512xbf16>, vector<16x512xf32> -> vector<16x512xf32>
    %c0_3 = arith.constant 0 : index
    %c0_4 = arith.constant 0 : index
    %3 = vector.load %arg3[%c0_3, %c0_4] : memref<1x512xf32, #tpu.memory_space<vmem>>, vector<1x512xf32>
    %4 = vector.broadcast %3 : vector<1x512xf32> to vector<16x512xf32>
    %5 = arith.addf %2, %4 : vector<16x512xf32>
    %cst_5 = arith.constant 0.000000e+00 : f32
    %6 = vector.broadcast %cst_5 : f32 to vector<16x512xf32>
    %7 = arith.maximumf %5, %6 : vector<16x512xf32>
    %8 = arith.truncf %7 : vector<16x512xf32> to vector<16x512xbf16>
    %c0_6 = arith.constant 0 : index
    %c0_7 = arith.constant 0 : index
    %9 = vector.load %arg4[%c0_6, %c0_7] : memref<512x256xbf16, #tpu.memory_space<vmem>>, vector<512x256xbf16>
    %cst_8 = arith.constant dense<0.000000e+00> : vector<16x256xf32>
    %10 = tpu.matmul %8, %9, %cst_8 {dimension_numbers = #tpu.dot_dimension_numbers<[1], [0], [0], [1], [0, 0, 1, 1], [], []>} : vector<16x512xbf16>, vector<512x256xbf16>, vector<16x256xf32> -> vector<16x256xf32>
    %c0_9 = arith.constant 0 : index
    %c0_10 = arith.constant 0 : index
    %11 = vector.load %arg5[%c0_9, %c0_10] : memref<1x256xf32, #tpu.memory_space<vmem>>, vector<1x256xf32>
    %12 = vector.broadcast %11 : vector<1x256xf32> to vector<16x256xf32>
    %13 = arith.addf %10, %12 : vector<16x256xf32>
    %cst_11 = arith.constant 0.000000e+00 : f32
    %14 = vector.broadcast %cst_11 : f32 to vector<16x256xf32>
    %15 = arith.maximumf %13, %14 : vector<16x256xf32>
    %16 = arith.truncf %15 : vector<16x256xf32> to vector<16x256xbf16>
    %c0_12 = arith.constant 0 : index
    %c0_13 = arith.constant 0 : index
    %17 = vector.load %arg6[%c0_12, %c0_13] : memref<256x128xbf16, #tpu.memory_space<vmem>>, vector<256x128xbf16>
    %cst_14 = arith.constant dense<0.000000e+00> : vector<16x128xf32>
    %18 = tpu.matmul %16, %17, %cst_14 {dimension_numbers = #tpu.dot_dimension_numbers<[1], [0], [0], [1], [0, 0, 1, 1], [], []>} : vector<16x256xbf16>, vector<256x128xbf16>, vector<16x128xf32> -> vector<16x128xf32>
    %c0_15 = arith.constant 0 : index
    %c0_16 = arith.constant 0 : index
    %19 = vector.load %arg7[%c0_15, %c0_16] : memref<1x128xf32, #tpu.memory_space<vmem>>, vector<1x128xf32>
    %20 = vector.broadcast %19 : vector<1x128xf32> to vector<16x128xf32>
    %21 = arith.addf %18, %20 : vector<16x128xf32>
    %cst_17 = arith.constant 0.000000e+00 : f32
    %22 = vector.broadcast %cst_17 : f32 to vector<16x128xf32>
    %23 = arith.maximumf %21, %22 : vector<16x128xf32>
    %c0_18 = arith.constant 0 : index
    %c0_19 = arith.constant 0 : index
    %24 = vector.load %arg15[%c0_18, %c0_19] : memref<16x128xf32, #tpu.memory_space<vmem>>, vector<16x128xf32>
    tpu.vector_store %arg15[%c0_18, %c0_19], %23 {strides = array<i32>} : memref<16x128xf32, #tpu.memory_space<vmem>>, vector<16x128xf32>,
    %25 = arith.truncf %23 : vector<16x128xf32> to vector<16x128xbf16>
    %c0_20 = arith.constant 0 : index
    %c0_21 = arith.constant 0 : index
    %26 = vector.load %arg8[%c0_20, %c0_21] : memref<128x256xbf16, #tpu.memory_space<vmem>>, vector<128x256xbf16>
    %cst_22 = arith.constant dense<0.000000e+00> : vector<16x256xf32>
    %27 = tpu.matmul %25, %26, %cst_22 {dimension_numbers = #tpu.dot_dimension_numbers<[1], [0], [0], [1], [0, 0, 1, 1], [], []>} : vector<16x128xbf16>, vector<128x256xbf16>, vector<16x256xf32> -> vector<16x256xf32>
    %c0_23 = arith.constant 0 : index
    %c0_24 = arith.constant 0 : index
    %28 = vector.load %arg9[%c0_23, %c0_24] : memref<1x256xf32, #tpu.memory_space<vmem>>, vector<1x256xf32>
    %29 = vector.broadcast %28 : vector<1x256xf32> to vector<16x256xf32>
    %30 = arith.addf %27, %29 : vector<16x256xf32>
    %cst_25 = arith.constant 0.000000e+00 : f32
    %31 = vector.broadcast %cst_25 : f32 to vector<16x256xf32>
    %32 = arith.maximumf %30, %31 : vector<16x256xf32>
    %33 = arith.truncf %32 : vector<16x256xf32> to vector<16x256xbf16>
    %c0_26 = arith.constant 0 : index
    %c0_27 = arith.constant 0 : index
    %34 = vector.load %arg10[%c0_26, %c0_27] : memref<256x512xbf16, #tpu.memory_space<vmem>>, vector<256x512xbf16>
    %cst_28 = arith.constant dense<0.000000e+00> : vector<16x512xf32>
    %35 = tpu.matmul %33, %34, %cst_28 {dimension_numbers = #tpu.dot_dimension_numbers<[1], [0], [0], [1], [0, 0, 1, 1], [], []>} : vector<16x256xbf16>, vector<256x512xbf16>, vector<16x512xf32> -> vector<16x512xf32>
    %c0_29 = arith.constant 0 : index
    %c0_30 = arith.constant 0 : index
    %36 = vector.load %arg11[%c0_29, %c0_30] : memref<1x512xf32, #tpu.memory_space<vmem>>, vector<1x512xf32>
    %37 = vector.broadcast %36 : vector<1x512xf32> to vector<16x512xf32>
    %38 = arith.addf %35, %37 : vector<16x512xf32>
    %cst_31 = arith.constant 0.000000e+00 : f32
    %39 = vector.broadcast %cst_31 : f32 to vector<16x512xf32>
    %40 = arith.maximumf %38, %39 : vector<16x512xf32>
    %41 = arith.truncf %40 : vector<16x512xf32> to vector<16x512xbf16>
    %c0_32 = arith.constant 0 : index
    %c0_33 = arith.constant 0 : index
    %42 = vector.load %arg12[%c0_32, %c0_33] : memref<512x896xbf16, #tpu.memory_space<vmem>>, vector<512x896xbf16>
    %cst_34 = arith.constant dense<0.000000e+00> : vector<16x896xf32>
    %43 = tpu.matmul %41, %42, %cst_34 {dimension_numbers = #tpu.dot_dimension_numbers<[1], [0], [0], [1], [0, 0, 1, 1], [], []>} : vector<16x512xbf16>, vector<512x896xbf16>, vector<16x896xf32> -> vector<16x896xf32>
    %c0_35 = arith.constant 0 : index
    %c0_36 = arith.constant 0 : index
    %44 = vector.load %arg13[%c0_35, %c0_36] : memref<1x896xf32, #tpu.memory_space<vmem>>, vector<1x896xf32>
    %45 = vector.broadcast %44 : vector<1x896xf32> to vector<16x896xf32>
    %46 = arith.addf %43, %45 : vector<16x896xf32>
    %cst_37 = arith.constant 0.000000e+00 : f32
    %47 = vector.broadcast %cst_37 : f32 to vector<16x896xf32>
    %48 = arith.subf %47, %46 : vector<16x896xf32>
    %49 = math.exp %48 : vector<16x896xf32>
    %cst_38 = arith.constant 1.000000e+00 : f32
    %50 = vector.broadcast %cst_38 : f32 to vector<16x896xf32>
    %51 = arith.addf %50, %49 : vector<16x896xf32>
    %52 = tpu.reciprocal %51 {approx = true} : vector<16x896xf32> -> vector<16x896xf32>
    %53 = arith.truncf %52 : vector<16x896xf32> to vector<16x896xbf16>
    %c0_39 = arith.constant 0 : index
    %c0_40 = arith.constant 0 : index
    %54 = vector.load %arg14[%c0_39, %c0_40] : memref<16x896xbf16, #tpu.memory_space<vmem>>, vector<16x896xbf16>
    tpu.vector_store %arg14[%c0_39, %c0_40], %53 {strides = array<i32>} : memref<16x896xbf16, #tpu.memory_space<vmem>>, vector<16x896xbf16>,
    return
  }
  func.func @transform_0(%arg0: i32) -> (i32, i32) {
    %c0_i32 = arith.constant 0 : i32
    %c0_i32_0 = arith.constant 0 : i32
    return %arg0, %c0_i32 : i32, i32
  }
  func.func @transform_1(%arg0: i32) -> (i32, i32) {
    %c0_i32 = arith.constant 0 : i32
    %c0_i32_0 = arith.constant 0 : i32
    %c0_i32_1 = arith.constant 0 : i32
    return %c0_i32, %c0_i32_0 : i32, i32
  }
  func.func @transform_2(%arg0: i32) -> (i32, i32) {
    %c0_i32 = arith.constant 0 : i32
    %c0_i32_0 = arith.constant 0 : i32
    %c0_i32_1 = arith.constant 0 : i32
    return %c0_i32, %c0_i32_0 : i32, i32
  }
  func.func @transform_3(%arg0: i32) -> (i32, i32) {
    %c0_i32 = arith.constant 0 : i32
    %c0_i32_0 = arith.constant 0 : i32
    %c0_i32_1 = arith.constant 0 : i32
    return %c0_i32, %c0_i32_0 : i32, i32
  }
  func.func @transform_4(%arg0: i32) -> (i32, i32) {
    %c0_i32 = arith.constant 0 : i32
    %c0_i32_0 = arith.constant 0 : i32
    %c0_i32_1 = arith.constant 0 : i32
    return %c0_i32, %c0_i32_0 : i32, i32
  }
  func.func @transform_5(%arg0: i32) -> (i32, i32) {
    %c0_i32 = arith.constant 0 : i32
    %c0_i32_0 = arith.constant 0 : i32
    %c0_i32_1 = arith.constant 0 : i32
    return %c0_i32, %c0_i32_0 : i32, i32
  }
  func.func @transform_6(%arg0: i32) -> (i32, i32) {
    %c0_i32 = arith.constant 0 : i32
    %c0_i32_0 = arith.constant 0 : i32
    %c0_i32_1 = arith.constant 0 : i32
    return %c0_i32, %c0_i32_0 : i32, i32
  }
  func.func @transform_7(%arg0: i32) -> (i32, i32) {
    %c0_i32 = arith.constant 0 : i32
    %c0_i32_0 = arith.constant 0 : i32
    %c0_i32_1 = arith.constant 0 : i32
    return %c0_i32, %c0_i32_0 : i32, i32
  }
  func.func @transform_8(%arg0: i32) -> (i32, i32) {
    %c0_i32 = arith.constant 0 : i32
    %c0_i32_0 = arith.constant 0 : i32
    %c0_i32_1 = arith.constant 0 : i32
    return %c0_i32, %c0_i32_0 : i32, i32
  }
  func.func @transform_9(%arg0: i32) -> (i32, i32) {
    %c0_i32 = arith.constant 0 : i32
    %c0_i32_0 = arith.constant 0 : i32
    %c0_i32_1 = arith.constant 0 : i32
    return %c0_i32, %c0_i32_0 : i32, i32
  }
  func.func @transform_10(%arg0: i32) -> (i32, i32) {
    %c0_i32 = arith.constant 0 : i32
    %c0_i32_0 = arith.constant 0 : i32
    %c0_i32_1 = arith.constant 0 : i32
    return %c0_i32, %c0_i32_0 : i32, i32
  }
  func.func @transform_11(%arg0: i32) -> (i32, i32) {
    %c0_i32 = arith.constant 0 : i32
    %c0_i32_0 = arith.constant 0 : i32
    %c0_i32_1 = arith.constant 0 : i32
    return %c0_i32, %c0_i32_0 : i32, i32
  }
  func.func @transform_12(%arg0: i32) -> (i32, i32) {
    %c0_i32 = arith.constant 0 : i32
    %c0_i32_0 = arith.constant 0 : i32
    %c0_i32_1 = arith.constant 0 : i32
    return %c0_i32, %c0_i32_0 : i32, i32
  }
  func.func @transform_13(%arg0: i32) -> (i32, i32) {
    %c0_i32 = arith.constant 0 : i32
    %c0_i32_0 = arith.constant 0 : i32
    return %arg0, %c0_i32 : i32, i32
  }
  func.func @transform_14(%arg0: i32) -> (i32, i32) {
    %c0_i32 = arith.constant 0 : i32
    %c0_i32_0 = arith.constant 0 : i32
    return %arg0, %c0_i32 : i32, i32
  }
}

</mosaic_0001>

<bundles_post_ra>
// kernel: vae_forward.1
= control target key start
LH: loop header
LB: loop body
LE: loop exit
PB: predicated region body
PF: predicated region fallthrough
CT: control target
= control target key end

     0   :  { %20 = vsyncpa [#allocation3], 0  ;;  %s8496_s0 = inlined_call_operand.vmem [shape: bf16[16,784], index: 0, kind: input, shape index: {}]   ;;  %s8497_s1 = inlined_call_operand.hbm [shape: bf16[784,512], index: 1, kind: input, shape index: {}]   ;;  %s8498_s2 = inlined_call_operand.vmem [shape: f32[1,512], index: 2, kind: input, shape index: {}]   ;;  %s8499_s3 = inlined_call_operand.hbm [shape: bf16[512,256], index: 3, kind: input, shape index: {}]   ;;  %s8500_s4 = inlined_call_operand.vmem [shape: f32[1,256], index: 4, kind: input, shape index: {}]   ;;  %s8501_s5 = inlined_call_operand.vmem [shape: bf16[256,128], index: 5, kind: input, shape index: {}]   ;;  %s8502_s6 = inlined_call_operand.vmem [shape: f32[1,128], index: 6, kind: input, shape index: {}]   ;;  %s8503_s7 = inlined_call_operand.hbm [shape: bf16[128,256], index: 7, kind: input, shape index: {}]   ;;  %s8504_s8 = inlined_call_operand.vmem [shape: f32[1,256], index: 8, kind: input, shape index: {}]   ;;  %s8505_s9 = inlined_call_operand.hbm [shape: bf16[256,512], index: 9, kind: input, shape index: {}]   ;;  %s8506_s10 = inlined_call_operand.vmem [shape: f32[1,512], index: 10, kind: input, shape index: {}]   ;;  %s8507_s11 = inlined_call_operand.hbm [shape: bf16[512,896], index: 11, kind: input, shape index: {}]   ;;  %s8508_s12 = inlined_call_operand.vmem [shape: f32[1,896], index: 12, kind: input, shape index: {}]   ;;  %s8509_s13 = inlined_call_operand.vmem [shape: bf16[16,896], index: 13, kind: output, shape index: {0}]   ;;  %s8510_s14 = inlined_call_operand.vmem [shape: f32[16,128], index: 14, kind: output, shape index: {1}]  }
   0x1   :  { %21 = vsyncpa [#allocation5], 0  ;;  %s44_s15 = sshll.u32 %s8499_s3, 4  ;;  %s45_s15 = int_to_ptr.hbm [resolvable:$true] %s44_s15 }
   0x2   :  { %22 = vsyncpa [#allocation8], 0  ;;  %s8135_s16 = smov [#allocation4]   ;;  %s8136_s18 = smov 128  }
   0x3   :  { %s46_s17 = sshll.u32 %s8135_s16, 4  ;;  %s8137_s19 = smov 8   ;;  %s47_s17 = int_to_ptr.vmem [resolvable:$true] %s46_s17 }
   0x4   :  { %52 = dma.hbm_to_vmem [thread:$0]  %s45_s15, 8192, %s47_s17, [#allocation5], %s8136_s18, %s8136_s18, %s8137_s19  }
   0x5   :  { %s78_s22 = sshll.u32 %s8505_s9, 4  ;;  %s8138_s23 = smov [#allocation7]   ;;  %s79_s22 = int_to_ptr.hbm [resolvable:$true] %s78_s22 }
   0x6   :  { %s80_s24 = sshll.u32 %s8138_s23, 4  ;;  %s29_s27 = sshll.u32 %s8497_s1, 4  ;;  %s81_s24 = int_to_ptr.vmem [resolvable:$true] %s80_s24  ;;  %s30_s27 = int_to_ptr.hbm [resolvable:$true] %s29_s27 }
   0x7   :  { %s8139_s3 = smov 256   ;;  %s8140_s28 = smov 16  }
   0x8   :  { %86 = dma.hbm_to_vmem [thread:$0]  %s79_s22, 8192, %s81_s24, [#allocation8], %s8139_s3, %s8139_s3, %s8140_s28  }
   0x9   :  { %s63_s15 = sshll.u32 %s8503_s7, 4  ;;  %s8141_s16 = smov [#allocation2]   ;;  %s64_s15 = int_to_ptr.hbm [resolvable:$true] %s63_s15 }
   0xa   :  { %s31_s17 = sshll.u32 %s8141_s16, 4  ;;  %s8142_s9 = smov [#allocation6]   ;;  %s32_s17 = int_to_ptr.vmem [resolvable:$true] %s31_s17 }
   0xb   :  { %37 = dma.hbm_to_vmem [thread:$0]  %s30_s27, 25088, %s32_s17, [#allocation3], %s8139_s3, %s8139_s3, %s8140_s28  }
   0xc   :  { %s65_s20 = sshll.u32 %s8142_s9, 4  ;;  %s93_s1 = sshll.u32 %s8507_s11, 4  ;;  %s66_s20 = int_to_ptr.vmem [resolvable:$true] %s65_s20  ;;  %s94_s1 = int_to_ptr.hbm [resolvable:$true] %s93_s1 }
   0xd   :  { %71 = dma.hbm_to_vmem [thread:$0]  %s64_s15, 2048, %s66_s20, [#allocation5], %s8136_s18, %s8136_s18, %s8137_s19  }
   0xe   :  { %s8143_s25 = smov [#allocation9]   ;;  %s8144_s24 = smov 448  }
   0xf   :  { %s95_s22 = sshll.u32 %s8143_s25, 4  ;;  %s8145_s26 = smov 28   ;;  %s96_s22 = int_to_ptr.vmem [resolvable:$true] %s95_s22 }
  0x10   :  { %101 = dma.hbm_to_vmem [thread:$0]  %s94_s1, 28672, %s96_s22, [#allocation8], %s8144_s24, %s8144_s24, %s8145_s26  }
  0x11   :  { %8129 = dma.done.wait [#allocation3], 25088  }
  0x12   :  { %8130 = vsyncadd [#allocation3], 4294942208 }
  0x13   :  { %8131 = dma.done.wait [#allocation5], 10240  }
  0x14   :  { %8132 = vsyncadd [#allocation5], 4294957056 }
  0x15   :  { %8133 = dma.done.wait [#allocation8], 36864  }
  0x16   :  { %8134 = vsyncadd [#allocation8], 4294930432  ;;  %v5144_v0 = vld [vmem:[#allocation2 + $0xe0] sm:$0xf]  ;;  %v7391_v1 = vld [vmem:[#allocation2 + $0xec] sm:$0xf0] }
  0x17   :  { %v5272_v2 = vld [vmem:[#allocation2 + $0x1e0] sm:$0xf]  ;;  %v5145_v3 = vor.u32 %v7391_v1, %v5144_v0  ;;  %v7423_v4 = vld [vmem:[#allocation2 + $0x1ec] sm:$0xf0]  ;;  %vm1354_vm0 = vcmask 130048  }
  0x18   :  { %v5400_v5 = vld [vmem:[#allocation2 + $0x2e0] sm:$0xf]  ;;  %v7455_v6 = vld [vmem:[#allocation2 + $0x2ec] sm:$0xf0]  ;;  %v5273_v7 = vor.u32 %v7423_v4, %v5272_v2 }
  0x19   :  { %v5401_v8 = vor.u32 %v7455_v6, %v5400_v5  ;;  %v5528_v9 = vld [vmem:[#allocation2 + $0x3e0] sm:$0xf]  ;;  %v7487_v10 = vld [vmem:[#allocation2 + $0x3ec] sm:$0xf0]  ;;  %1358 = vmatpush.bf16.msra.mxu0 %v5145_v3 }
  0x1a   :  { %v5128_v11 = vld [vmem:[#allocation2 + $0xc0] sm:$0xf]  ;;  %v5529_v12 = vor.u32 %v7487_v10, %v5528_v9  ;;  %v7387_v13 = vld [vmem:[#allocation2 + $0xcc] sm:$0xf0]  ;;  %1372 = vmatpush.bf16.msra.mxu1 %v5273_v7 }
  0x1b   :  { %v5256_v14 = vld [vmem:[#allocation2 + $0x1c0] sm:$0xf]  ;;  %v7419_v15 = vld [vmem:[#allocation2 + $0x1cc] sm:$0xf0]  ;;  %1386 = vmatpush.bf16.msra.mxu2 %v5401_v8  ;;  %v5129_v16 = vor.u32 %v7387_v13, %v5128_v11 }
  0x1c   :  { %v5257_v17 = vor.u32 %v7419_v15, %v5256_v14  ;;  %v5384_v18 = vld [vmem:[#allocation2 + $0x2c0] sm:$0xf]  ;;  %v7451_v19 = vld [vmem:[#allocation2 + $0x2cc] sm:$0xf0]  ;;  %1400 = vmatpush.bf16.msra.mxu3 %v5529_v12 }
  0x1d   :  { %v5512_v20 = vld [vmem:[#allocation2 + $0x3c0] sm:$0xf]  ;;  %v5385_v21 = vor.u32 %v7451_v19, %v5384_v18  ;;  %v7483_v22 = vld [vmem:[#allocation2 + $0x3cc] sm:$0xf0]  ;;  %1359 = vmatpush.bf16.msra.mxu0 %v5129_v16 }
  0x1e   :  { %v5112_v23 = vld [vmem:[#allocation2 + $0xa0] sm:$0xf]  ;;  %v7383_v24 = vld [vmem:[#allocation2 + $0xac] sm:$0xf0]  ;;  %v5513_v25 = vor.u32 %v7483_v22, %v5512_v20  ;;  %1373 = vmatpush.bf16.msra.mxu1 %v5257_v17 }
  0x1f   :  { %v5240_v26 = vld [vmem:[#allocation2 + $0x1a0] sm:$0xf]  ;;  %v7415_v27 = vld [vmem:[#allocation2 + $0x1ac] sm:$0xf0]  ;;  %v5113_v29 = vor.u32 %v7383_v24, %v5112_v23  ;;  %1387 = vmatpush.bf16.msra.mxu2 %v5385_v21 }
  0x20   :  { %v5368_v28 = vld [vmem:[#allocation2 + $0x2a0] sm:$0xf]  ;;  %v7447_v30 = vld [vmem:[#allocation2 + $0x2ac] sm:$0xf0]  ;;  %v5241_v33 = vor.u32 %v7415_v27, %v5240_v26  ;;  %1401 = vmatpush.bf16.msra.mxu3 %v5513_v25 }
  0x21   :  { %v5496_v31 = vld [vmem:[#allocation2 + $0x3a0] sm:$0xf]  ;;  %v7479_v32 = vld [vmem:[#allocation2 + $0x3ac] sm:$0xf0]  ;;  %v5369_v34 = vor.u32 %v7447_v30, %v5368_v28  ;;  %1360 = vmatpush.bf16.msra.mxu0 %v5113_v29 }
  0x22   :  { %v5096_v35 = vld [vmem:[#allocation2 + $0x80] sm:$0xf]  ;;  %v7379_v36 = vld [vmem:[#allocation2 + $0x8c] sm:$0xf0]  ;;  %v5497_v38 = vor.u32 %v7479_v32, %v5496_v31  ;;  %1374 = vmatpush.bf16.msra.mxu1 %v5241_v33  ;;  %v7389_v32 = vld [vmem:[#allocation2 + $0xe4] sm:$0xf] }
  0x23   :  { %v5224_v37 = vld [vmem:[#allocation2 + $0x180] sm:$0xf]  ;;  %v7411_v39 = vld [vmem:[#allocation2 + $0x18c] sm:$0xf0]  ;;  %v5097_v44 = vor.u32 %v7379_v36, %v5096_v35  ;;  %1388 = vmatpush.bf16.msra.mxu2 %v5369_v34  ;;  %v5146_v33 = vld [vmem:[#allocation2 + $0xf0] sm:$0xf0] }
  0x24   :  { %v5352_v40 = vld [vmem:[#allocation2 + $0x280] sm:$0xf]  ;;  %v7443_v41 = vld [vmem:[#allocation2 + $0x28c] sm:$0xf0]  ;;  %v5225_v45 = vor.u32 %v7411_v39, %v5224_v37  ;;  %1402 = vmatpush.bf16.msra.mxu3 %v5497_v38  ;;  %v5012_v34 = vld [vmem:[%s8496_s0 + $0x8] sm:$0xf] }
  0x25   :  { %v5480_v42 = vld [vmem:[#allocation2 + $0x380] sm:$0xf]  ;;  %v7475_v43 = vld [vmem:[#allocation2 + $0x38c] sm:$0xf0]  ;;  %v5353_v46 = vor.u32 %v7443_v41, %v5352_v40  ;;  %1361 = vmatpush.bf16.msra.mxu0 %v5097_v44  ;;  %v7358_v36 = vld [vmem:[%s8496_s0 + $0x20] sm:$0xf0] }
  0x26   :  { %v5080_v47 = vld [vmem:[#allocation2 + $0x60] sm:$0xf]  ;;  %v7375_v48 = vld [vmem:[#allocation2 + $0x6c] sm:$0xf0]  ;;  %v5481_v50 = vor.u32 %v7475_v43, %v5480_v42  ;;  %1375 = vmatpush.bf16.msra.mxu1 %v5225_v45  ;;  %v7421_v41 = vld [vmem:[#allocation2 + $0x1e4] sm:$0xf] }
  0x27   :  { %v5208_v49 = vld [vmem:[#allocation2 + $0x160] sm:$0xf]  ;;  %v7407_v51 = vld [vmem:[#allocation2 + $0x16c] sm:$0xf0]  ;;  %v5081_v56 = vor.u32 %v7375_v48, %v5080_v47  ;;  %1389 = vmatpush.bf16.msra.mxu2 %v5353_v46  ;;  %v7357_v43 = vld [vmem:[%s8496_s0 + $0x18] sm:$0xf0] }
  0x28   :  { %v5336_v52 = vld [vmem:[#allocation2 + $0x260] sm:$0xf]  ;;  %v7439_v53 = vld [vmem:[#allocation2 + $0x26c] sm:$0xf0]  ;;  %v5209_v57 = vor.u32 %v7407_v51, %v5208_v49  ;;  %1403 = vmatpush.bf16.msra.mxu3 %v5481_v50  ;;  %v5274_v46 = vld [vmem:[#allocation2 + $0x1f0] sm:$0xf0]  ;;  %v5149_v50 = vor.u32 %v7389_v32, %v5146_v33 }
  0x29   :  { %v5464_v54 = vld [vmem:[#allocation2 + $0x360] sm:$0xf]  ;;  %v7471_v55 = vld [vmem:[#allocation2 + $0x36c] sm:$0xf0]  ;;  %v5337_v58 = vor.u32 %v7439_v53, %v5336_v52  ;;  %1362 = vmatpush.bf16.msra.mxu0 %v5081_v56  ;;  %v7355_v47 = vld [vmem:[%s8496_s0 + $0xc] sm:$0xf] }
  0x2a   :  { %v5064_v59 = vld [vmem:[#allocation2 + $0x40] sm:$0xf]  ;;  %v7371_v60 = vld [vmem:[#allocation2 + $0x4c] sm:$0xf0]  ;;  %v5465_v62 = vor.u32 %v7471_v55, %v5464_v54  ;;  %1376 = vmatpush.bf16.msra.mxu1 %v5209_v57  ;;  %v5014_v48 = vld [vmem:[%s8496_s0 + $0x24] sm:$0xf0]  ;;  %v8254_v54 = vor.u32 %v7358_v36, %v5012_v34 }
  0x2b   :  { %v5192_v61 = vld [vmem:[#allocation2 + $0x140] sm:$0xf]  ;;  %v7403_v63 = vld [vmem:[#allocation2 + $0x14c] sm:$0xf0]  ;;  %v5065_v4 = vor.u32 %v7371_v60, %v5064_v59  ;;  %1390 = vmatpush.bf16.msra.mxu2 %v5337_v58  ;;  %v7385_v57 = vld [vmem:[#allocation2 + $0xc4] sm:$0xf]  ;;  %v8258_v60 = vor.u32 %v7355_v47, %v5014_v48 }
  0x2c   :  { %v5320_v0 = vld [vmem:[#allocation2 + $0x240] sm:$0xf]  ;;  %v7435_v1 = vld [vmem:[#allocation2 + $0x24c] sm:$0xf0]  ;;  %v5193_v6 = vor.u32 %v7403_v63, %v5192_v61  ;;  %1404 = vmatpush.bf16.msra.mxu3 %v5465_v62  ;;  %v5130_v58 = vld [vmem:[#allocation2 + $0xd0] sm:$0xf0]  ;;  %v5277_v63 = vor.u32 %v7421_v41, %v5274_v46 }
  0x2d   :  { %v5448_v2 = vld [vmem:[#allocation2 + $0x340] sm:$0xf]  ;;  %v7467_v3 = vld [vmem:[#allocation2 + $0x34c] sm:$0xf0]  ;;  %v5321_v7 = vor.u32 %v7435_v1, %v5320_v0  ;;  %1363 = vmatpush.bf16.msra.mxu0 %v5065_v4  ;;  %v7354_v61 = vld [vmem:[%s8496_s0 + $0x4] sm:$0xf]  ;;  %v5133_v4 = vor.u32 %v7385_v57, %v5130_v58 }
  0x2e   :  { %v5048_v5 = vld [vmem:[#allocation2 + $0x20] sm:$0xf]  ;;  %v7367_v8 = vld [vmem:[#allocation2 + $0x2c] sm:$0xf0]  ;;  %v5449_v11 = vor.u32 %v7467_v3, %v5448_v2  ;;  %1377 = vmatpush.bf16.msra.mxu1 %v5193_v6  ;;  %v7417_v1 = vld [vmem:[#allocation2 + $0x1c4] sm:$0xf] }
  0x2f   :  { %v5176_v9 = vld [vmem:[#allocation2 + $0x120] sm:$0xf]  ;;  %v7399_v10 = vld [vmem:[#allocation2 + $0x12c] sm:$0xf0]  ;;  %v5049_v18 = vor.u32 %v7367_v8, %v5048_v5  ;;  %1391 = vmatpush.bf16.msra.mxu2 %v5321_v7  ;;  %v5258_v2 = vld [vmem:[#allocation2 + $0x1d0] sm:$0xf0] }
  0x30   :  { %v5304_v12 = vld [vmem:[#allocation2 + $0x220] sm:$0xf]  ;;  %v7431_v13 = vld [vmem:[#allocation2 + $0x22c] sm:$0xf0]  ;;  %v5177_v23 = vor.u32 %v7399_v10, %v5176_v9  ;;  %1405 = vmatpush.bf16.msra.mxu3 %v5449_v11  ;;  %v7381_v10 = vld [vmem:[#allocation2 + $0xa4] sm:$0xf] }
  0x31   :  { %v5432_v14 = vld [vmem:[#allocation2 + $0x320] sm:$0xf]  ;;  %v7463_v15 = vld [vmem:[#allocation2 + $0x32c] sm:$0xf0]  ;;  %v5305_v24 = vor.u32 %v7431_v13, %v5304_v12  ;;  %1364 = vmatpush.bf16.msra.mxu0 %v5049_v18  ;;  %v5114_v11 = vld [vmem:[#allocation2 + $0xb0] sm:$0xf0]  ;;  %v5261_v12 = vor.u32 %v7417_v1, %v5258_v2 }
  0x32   :  { %v5032_v16 = vld [vmem:[#allocation2] sm:$0xf]  ;;  %v7363_v17 = vld [vmem:[#allocation2 + $0xc] sm:$0xf0]  ;;  %v5433_v28 = vor.u32 %v7463_v15, %v5432_v14  ;;  %1378 = vmatpush.bf16.msra.mxu1 %v5177_v23  ;;  %v7413_v14 = vld [vmem:[#allocation2 + $0x1a4] sm:$0xf] }
  0x33   :  { %v5160_v19 = vld [vmem:[#allocation2 + $0x100] sm:$0xf]  ;;  %v7395_v20 = vld [vmem:[#allocation2 + $0x10c] sm:$0xf0]  ;;  %v5033_v35 = vor.u32 %v7363_v17, %v5032_v16  ;;  %1392 = vmatpush.bf16.msra.mxu2 %v5305_v24  ;;  %v5242_v15 = vld [vmem:[#allocation2 + $0x1b0] sm:$0xf0]  ;;  %v5117_v17 = vor.u32 %v7381_v10, %v5114_v11 }
  0x34   :  { %v5288_v21 = vld [vmem:[#allocation2 + $0x200] sm:$0xf]  ;;  %v7427_v22 = vld [vmem:[#allocation2 + $0x20c] sm:$0xf0]  ;;  %v5161_v39 = vor.u32 %v7395_v20, %v5160_v19  ;;  %1406 = vmatpush.bf16.msra.mxu3 %v5433_v28  ;;  %v5098_v23 = vld [vmem:[#allocation2 + $0x90] sm:$0xf0]  ;;  %v5245_v24 = vor.u32 %v7413_v14, %v5242_v15 }
  0x35   :  { %v5416_v25 = vld [vmem:[#allocation2 + $0x300] sm:$0xf]  ;;  %v7459_v26 = vld [vmem:[#allocation2 + $0x30c] sm:$0xf0]  ;;  %v5289_v40 = vor.u32 %v7427_v22, %v5288_v21  ;;  %1365 = vmatpush.bf16.msra.mxu0 %v5033_v35  ;;  %v7377_v22 = vld [vmem:[#allocation2 + $0x84] sm:$0xf] }
  0x36   :  { %v5656_v27 = vld [vmem:[#allocation2 + $0x4e0] sm:$0xf]  ;;  %v7519_v29 = vld [vmem:[#allocation2 + $0x4ec] sm:$0xf0]  ;;  %v5417_v44 = vor.u32 %v7459_v26, %v5416_v25  ;;  %1379 = vmatpush.bf16.msra.mxu1 %v5161_v39  ;;  %v7409_v26 = vld [vmem:[#allocation2 + $0x184] sm:$0xf] }
  0x37   :  { %v5784_v30 = vld [vmem:[#allocation2 + $0x5e0] sm:$0xf]  ;;  %v7551_v31 = vld [vmem:[#allocation2 + $0x5ec] sm:$0xf0]  ;;  %v5657_v45 = vor.u32 %v7519_v29, %v5656_v27  ;;  %1393 = vmatpush.bf16.msra.mxu2 %v5289_v40  ;;  %v5226_v27 = vld [vmem:[#allocation2 + $0x190] sm:$0xf0]  ;;  %v5101_v29 = vor.u32 %v7377_v22, %v5098_v23 }
  0x38   :  { %v5800_v37 = vld [vmem:[#allocation2 + $0x600] sm:$0xf]  ;;  %v7555_v38 = vld [vmem:[#allocation2 + $0x60c] sm:$0xf0]  ;;  %v5785_v49 = vor.u32 %v7551_v31, %v5784_v30  ;;  %1407 = vmatpush.bf16.msra.mxu3 %v5417_v44  ;;  %v7373_v34 = vld [vmem:[#allocation2 + $0x64] sm:$0xf] }
  0x39   :  { %v5004_v42 = vld [vmem:[%s8496_s0] sm:$0xf]  ;;  %v7515_v52 = vld [vmem:[#allocation2 + $0x4cc] sm:$0xf0]  ;;  %v5801_v59 = vor.u32 %v7555_v38, %v5800_v37  ;;  %1414 = vmatpush.bf16.msrb.mxu0 %v5657_v45  ;;  %v5082_v35 = vld [vmem:[#allocation2 + $0x70] sm:$0xf0]  ;;  %v5229_v38 = vor.u32 %v7409_v26, %v5226_v27 }
  0x3a   :  { %v5640_v51 = vld [vmem:[#allocation2 + $0x4c0] sm:$0xf]  ;;  %v8256_v55 = vor.u32 %v7357_v43, %v5004_v42  ;;  %v7547_v56 = vld [vmem:[#allocation2 + $0x5cc] sm:$0xf0]  ;;  %1428 = vmatpush.bf16.msrb.mxu1 %v5785_v49  ;;  %1394 = vmatmul.bf16.vlgmr.msra.gmra.mxu2 %v8254_v54  ;;  %v5028_v36 = vld [vmem:[%s8496_s0 + $0x18] sm:$0xf]  ;;  %v5085_v43 = vor.u32 %v7373_v34, %v5082_v35 }
  0x3b   :  { %v5768_v53 = vld [vmem:[#allocation2 + $0x5c0] sm:$0xf]  ;;  %v5641_v0 = vor.u32 %v7515_v52, %v5640_v51  ;;  %v7511_v6 = vld [vmem:[#allocation2 + $0x4ac] sm:$0xf0]  ;;  %1449 = vmatpush.bf16.msrb.mxu2 %v5801_v59  ;;  %1408 = vmatmul.bf16.vlgmr.msra.gmra.mxu3 %v8258_v60  ;;  %v7360_v37 = vld [vmem:[%s8496_s0 + $0x30] sm:$0xf0] }
  0x3c   :  { %v5006_v62 = vld [vmem:[%s8496_s0 + $0x1c] sm:$0xf0]  ;;  %1456 = vmatpush.bf16.msrb.mxu3 %v5149_v50  ;;  %v5769_v3 = vor.u32 %v7547_v56, %v5768_v53  ;;  %1366 = vmatmul.bf16.vlgmr.msra.gmra.mxu0 %v8256_v55  ;;  %v7543_v9 = vld [vmem:[#allocation2 + $0x5ac] sm:$0xf0]  ;;  %v7405_v40 = vld [vmem:[#allocation2 + $0x164] sm:$0xf]  ;;  %v8278_v50 = vor.u32 %v7360_v37, %v5028_v36 }
  0x3d   :  { %v5624_v5 = vld [vmem:[#allocation2 + $0x4a0] sm:$0xf]  ;;  %v8268_v8 = vor.u32 %v7354_v61, %v5006_v62  ;;  %1415 = vmatpush.bf16.msrb.mxu0 %v5641_v0  ;;  %v7507_v19 = vld [vmem:[#allocation2 + $0x48c] sm:$0xf0]  ;;  %v5210_v41 = vld [vmem:[#allocation2 + $0x170] sm:$0xf0] }
  0x3e   :  { %v5752_v7 = vld [vmem:[#allocation2 + $0x5a0] sm:$0xf]  ;;  %v5625_v13 = vor.u32 %v7511_v6, %v5624_v5  ;;  %1429 = vmatpush.bf16.msrb.mxu1 %v5769_v3  ;;  %v7539_v21 = vld [vmem:[#allocation2 + $0x58c] sm:$0xf0]  ;;  %v7369_v48 = vld [vmem:[#allocation2 + $0x44] sm:$0xf]  ;;  %v5213_v51 = vor.u32 %v7405_v40, %v5210_v41 }
  0x3f   :  { %1470 = vmatpush.bf16.msra.mxu2 %v5277_v63  ;;  %v5753_v16 = vor.u32 %v7543_v9, %v5752_v7  ;;  %v5608_v18 = vld [vmem:[#allocation2 + $0x480] sm:$0xf]  ;;  %1380 = vmatmul.bf16.vlgmr.msra.gmra.mxu1 %v8268_v8  ;;  %v7503_v31 = vld [vmem:[#allocation2 + $0x46c] sm:$0xf0]  ;;  %v5066_v49 = vld [vmem:[#allocation2 + $0x50] sm:$0xf0] }
  0x40   :  { %1457 = vmatpush.bf16.msrb.mxu3 %v5133_v4  ;;  %v5736_v20 = vld [vmem:[#allocation2 + $0x580] sm:$0xf]  ;;  %v5609_v25 = vor.u32 %v7507_v19, %v5608_v18  ;;  %v7535_v33 = vld [vmem:[#allocation2 + $0x56c] sm:$0xf0]  ;;  %v7401_v53 = vld [vmem:[#allocation2 + $0x144] sm:$0xf]  ;;  %v5069_v58 = vor.u32 %v7369_v48, %v5066_v49 }
  0x41   :  { %1416 = vmatpush.bf16.msrb.mxu0 %v5625_v13  ;;  %v5737_v28 = vor.u32 %v7539_v21, %v5736_v20  ;;  %v5592_v30 = vld [vmem:[#allocation2 + $0x460] sm:$0xf]  ;;  %v7499_v45 = vld [vmem:[#allocation2 + $0x44c] sm:$0xf0]  ;;  %v5194_v56 = vld [vmem:[#allocation2 + $0x150] sm:$0xf0] }
  0x42   :  { %1430 = vmatpush.bf16.msrb.mxu1 %v5753_v16  ;;  %v5720_v32 = vld [vmem:[#allocation2 + $0x560] sm:$0xf]  ;;  %v5593_v39 = vor.u32 %v7503_v31, %v5592_v30  ;;  %v7531_v47 = vld [vmem:[#allocation2 + $0x54c] sm:$0xf0]  ;;  %v7365_v0 = vld [vmem:[#allocation2 + $0x24] sm:$0xf]  ;;  %v5197_v4 = vor.u32 %v7401_v53, %v5194_v56 }
  0x43   :  { %1471 = vmatpush.bf16.msra.mxu2 %v5261_v12  ;;  %v5721_v42 = vor.u32 %v7535_v33, %v5720_v32  ;;  %v5576_v44 = vld [vmem:[#allocation2 + $0x440] sm:$0xf]  ;;  %v7495_v61 = vld [vmem:[#allocation2 + $0x42c] sm:$0xf0]  ;;  %v5050_v1 = vld [vmem:[#allocation2 + $0x30] sm:$0xf0] }
  0x44   :  { %1458 = vmatpush.bf16.msrb.mxu3 %v5117_v17  ;;  %v5704_v46 = vld [vmem:[#allocation2 + $0x540] sm:$0xf]  ;;  %v5577_v52 = vor.u32 %v7499_v45, %v5576_v44  ;;  %v7527_v63 = vld [vmem:[#allocation2 + $0x52c] sm:$0xf0]  ;;  %v7397_v2 = vld [vmem:[#allocation2 + $0x124] sm:$0xf]  ;;  %v5053_v11 = vor.u32 %v7365_v0, %v5050_v1 }
  0x45   :  { %1417 = vmatpush.bf16.msrb.mxu0 %v5609_v25  ;;  %v5705_v57 = vor.u32 %v7531_v47, %v5704_v46  ;;  %v5560_v59 = vld [vmem:[#allocation2 + $0x420] sm:$0xf]  ;;  %v5178_v3 = vld [vmem:[#allocation2 + $0x130] sm:$0xf0]  ;;  %v7491_v7 = vld [vmem:[#allocation2 + $0x40c] sm:$0xf0] }
  0x46   :  { %1431 = vmatpush.bf16.msrb.mxu1 %v5737_v28  ;;  %v5688_v62 = vld [vmem:[#allocation2 + $0x520] sm:$0xf]  ;;  %v5561_v5 = vor.u32 %v7495_v61, %v5560_v59  ;;  %v7523_v12 = vld [vmem:[#allocation2 + $0x50c] sm:$0xf0]  ;;  %v7361_v13 = vld [vmem:[#allocation2 + $0x4] sm:$0xf]  ;;  %v5181_v21 = vor.u32 %v7397_v2, %v5178_v3 }
  0x47   :  { %1472 = vmatpush.bf16.msra.mxu2 %v5245_v24  ;;  %v5544_v6 = vld [vmem:[#allocation2 + $0x400] sm:$0xf]  ;;  %v5689_v10 = vor.u32 %v7527_v63, %v5688_v62  ;;  %v5034_v14 = vld [vmem:[#allocation2 + $0x10] sm:$0xf0]  ;;  %v7453_v15 = vld [vmem:[#allocation2 + $0x2e4] sm:$0xf] }
  0x48   :  { %1459 = vmatpush.bf16.msrb.mxu3 %v5101_v29  ;;  %v5672_v9 = vld [vmem:[#allocation2 + $0x500] sm:$0xf]  ;;  %v5402_v16 = vld [vmem:[#allocation2 + $0x2f0] sm:$0xf0]  ;;  %v7485_v17 = vld [vmem:[#allocation2 + $0x3e4] sm:$0xf]  ;;  %v5545_v22 = vor.u32 %v7491_v7, %v5544_v6  ;;  %v5037_v27 = vor.u32 %v7361_v13, %v5034_v14 }
  0x49   :  { %1418 = vmatpush.bf16.msrb.mxu0 %v5593_v39  ;;  %v5530_v18 = vld [vmem:[#allocation2 + $0x3f0] sm:$0xf0]  ;;  %v7517_v19 = vld [vmem:[#allocation2 + $0x4e4] sm:$0xf]  ;;  %v5020_v23 = vld [vmem:[%s8496_s0 + $0x10] sm:$0xf]  ;;  %v5673_v26 = vor.u32 %v7523_v12, %v5672_v9  ;;  %v5405_v31 = vor.u32 %v7453_v15, %v5402_v16 }
  0x4a   :  { %1432 = vmatpush.bf16.msrb.mxu1 %v5721_v42  ;;  %5814 = vmatmul.msk.bf16.vlgmr.msrb.gmra.mxu2 %vm1354_vm0, %v8278_v50  ;;  %v5658_v20 = vld [vmem:[#allocation2 + $0x4f0] sm:$0xf0]  ;;  %v7359_v24 = vld [vmem:[%s8496_s0 + $0x28] sm:$0xf0]  ;;  %v7393_v25 = vld [vmem:[#allocation2 + $0x104] sm:$0xf]  ;;  %v5533_v32 = vor.u32 %v7485_v17, %v5530_v18 }
  0x4b   :  { %1473 = vmatpush.bf16.msra.mxu2 %v5229_v38  ;;  %v5162_v28 = vld [vmem:[#allocation2 + $0x110] sm:$0xf0]  ;;  %v5022_v30 = vld [vmem:[%s8496_s0 + $0x2c] sm:$0xf0]  ;;  %v7549_v33 = vld [vmem:[#allocation2 + $0x5e4] sm:$0xf]  ;;  %v5661_v36 = vor.u32 %v7517_v19, %v5658_v20  ;;  %v8294_v37 = vor.u32 %v7359_v24, %v5020_v23 }
  0x4c   :  { %1460 = vmatpush.bf16.msrb.mxu3 %v5085_v43  ;;  %v7356_v29 = vld [vmem:[%s8496_s0 + $0x14] sm:$0xf]  ;;  %v7449_v35 = vld [vmem:[#allocation2 + $0x2c4] sm:$0xf]  ;;  %v5165_v41 = vor.u32 %v7393_v25, %v5162_v28 }
  0x4d   :  { %1419 = vmatpush.bf16.msrb.mxu0 %v5577_v52  ;;  %v5786_v34 = vld [vmem:[#allocation2 + $0x5f0] sm:$0xf0]  ;;  %v7481_v39 = vld [vmem:[#allocation2 + $0x3c4] sm:$0xf]  ;;  %v8296_v42 = vor.u32 %v7356_v29, %v5022_v30 }
  0x4e   :  { %1433 = vmatpush.bf16.msrb.mxu1 %v5705_v57  ;;  %v5386_v38 = vld [vmem:[#allocation2 + $0x2d0] sm:$0xf0]  ;;  %v7513_v43 = vld [vmem:[#allocation2 + $0x4c4] sm:$0xf]  ;;  %v5789_v45 = vor.u32 %v7549_v33, %v5786_v34 }
  0x4f   :  { %1474 = vmatpush.bf16.msra.mxu2 %v5213_v51  ;;  %v5514_v40 = vld [vmem:[#allocation2 + $0x3d0] sm:$0xf0]  ;;  %v5389_v46 = vor.u32 %v7449_v35, %v5386_v38  ;;  %v7545_v48 = vld [vmem:[#allocation2 + $0x5c4] sm:$0xf] }
  0x50   :  { %1461 = vmatpush.bf16.msrb.mxu3 %v5069_v58  ;;  %v5642_v44 = vld [vmem:[#allocation2 + $0x4d0] sm:$0xf0]  ;;  %v5517_v47 = vor.u32 %v7481_v39, %v5514_v40  ;;  %v7445_v51 = vld [vmem:[#allocation2 + $0x2a4] sm:$0xf] }
  0x51   :  { %1420 = vmatpush.bf16.msrb.mxu0 %v5561_v5  ;;  %v5770_v49 = vld [vmem:[#allocation2 + $0x5d0] sm:$0xf0]  ;;  %v5645_v52 = vor.u32 %v7513_v43, %v5642_v44  ;;  %v7477_v56 = vld [vmem:[#allocation2 + $0x3a4] sm:$0xf] }
  0x52   :  { %1434 = vmatpush.bf16.msrb.mxu1 %v5689_v10  ;;  %v5370_v53 = vld [vmem:[#allocation2 + $0x2b0] sm:$0xf0]  ;;  %v7509_v58 = vld [vmem:[#allocation2 + $0x4a4] sm:$0xf]  ;;  %v5773_v61 = vor.u32 %v7545_v48, %v5770_v49 }
  0x53   :  { %1475 = vmatpush.bf16.msra.mxu2 %v5197_v4  ;;  %v5498_v57 = vld [vmem:[#allocation2 + $0x3b0] sm:$0xf0]  ;;  %v5373_v62 = vor.u32 %v7445_v51, %v5370_v53  ;;  %v7541_v0 = vld [vmem:[#allocation2 + $0x5a4] sm:$0xf] }
  0x54   :  { %1462 = vmatpush.bf16.msrb.mxu3 %v5053_v11  ;;  %v5626_v59 = vld [vmem:[#allocation2 + $0x4b0] sm:$0xf0]  ;;  %v5501_v63 = vor.u32 %v7477_v56, %v5498_v57  ;;  %v7441_v2 = vld [vmem:[#allocation2 + $0x284] sm:$0xf] }
  0x55   :  { %1421 = vmatpush.bf16.msrb.mxu0 %v5545_v22  ;;  %v5754_v1 = vld [vmem:[#allocation2 + $0x5b0] sm:$0xf0]  ;;  %v5629_v3 = vor.u32 %v7509_v58, %v5626_v59  ;;  %v7473_v5 = vld [vmem:[#allocation2 + $0x384] sm:$0xf] }
  0x56   :  { %1435 = vmatpush.bf16.msrb.mxu1 %v5673_v26  ;;  %v5354_v4 = vld [vmem:[#allocation2 + $0x290] sm:$0xf0]  ;;  %v7505_v7 = vld [vmem:[#allocation2 + $0x484] sm:$0xf]  ;;  %v5757_v10 = vor.u32 %v7541_v0, %v5754_v1  ;;  %v5152_v0 = vld [vmem:[#allocation2 + $0xe8] sm:$0xf] }
  0x57   :  { %1476 = vmatpush.bf16.msra.mxu2 %v5181_v21  ;;  %v5482_v6 = vld [vmem:[#allocation2 + $0x390] sm:$0xf0]  ;;  %v5357_v11 = vor.u32 %v7441_v2, %v5354_v4  ;;  %v7537_v13 = vld [vmem:[#allocation2 + $0x584] sm:$0xf]  ;;  %v7392_v1 = vld [vmem:[#allocation2 + $0xf4] sm:$0xf0] }
  0x58   :  { %1463 = vmatpush.bf16.msrb.mxu3 %v5037_v27  ;;  %1422 = vmatmul.bf16.vlgmr.msrb.gmra.mxu0 %v8294_v37  ;;  %v5610_v9 = vld [vmem:[#allocation2 + $0x490] sm:$0xf0]  ;;  %v5485_v12 = vor.u32 %v7473_v5, %v5482_v6  ;;  %v7437_v15 = vld [vmem:[#allocation2 + $0x264] sm:$0xf]  ;;  %v5408_v5 = vld [vmem:[#allocation2 + $0x2e8] sm:$0xf] }
  0x59   :  { %1484 = vmatpush.bf16.msra.mxu0 %v5405_v31  ;;  %1436 = vmatmul.bf16.vlgmr.msrb.gmra.mxu1 %v8296_v42  ;;  %v5738_v14 = vld [vmem:[#allocation2 + $0x590] sm:$0xf0]  ;;  %v5613_v16 = vor.u32 %v7505_v7, %v5610_v9  ;;  %v7469_v18 = vld [vmem:[#allocation2 + $0x364] sm:$0xf]  ;;  %v7456_v6 = vld [vmem:[#allocation2 + $0x2f4] sm:$0xf0] }
  0x5a   :  { %1498 = vmatpush.bf16.msra.mxu1 %v5533_v32  ;;  %v5338_v17 = vld [vmem:[#allocation2 + $0x270] sm:$0xf0]  ;;  %v7501_v20 = vld [vmem:[#allocation2 + $0x464] sm:$0xf]  ;;  %v5741_v22 = vor.u32 %v7537_v13, %v5738_v14  ;;  %v5153_v13 = vor.u32 %v7392_v1, %v5152_v0  ;;  %v5536_v14 = vld [vmem:[#allocation2 + $0x3e8] sm:$0xf] }
  0x5b   :  { %1477 = vmatpush.bf16.msra.mxu2 %v5165_v41  ;;  %1464 = vmatmul.bf16.vlgmr.msrb.gmra.mxu3 %v8256_v55  ;;  %v5466_v19 = vld [vmem:[#allocation2 + $0x370] sm:$0xf0]  ;;  %v5341_v23 = vor.u32 %v7437_v15, %v5338_v17  ;;  %v7533_v25 = vld [vmem:[#allocation2 + $0x564] sm:$0xf]  ;;  %v7488_v15 = vld [vmem:[#allocation2 + $0x3f4] sm:$0xf0] }
  0x5c   :  { %1512 = vmatpush.bf16.msra.mxu3 %v5661_v36  ;;  %v5594_v21 = vld [vmem:[#allocation2 + $0x470] sm:$0xf0]  ;;  %v5469_v24 = vor.u32 %v7469_v18, %v5466_v19  ;;  %v7433_v27 = vld [vmem:[#allocation2 + $0x244] sm:$0xf]  ;;  %v5280_v17 = vld [vmem:[#allocation2 + $0x1e8] sm:$0xf]  ;;  %v5409_v19 = vor.u32 %v7456_v6, %v5408_v5 }
  0x5d   :  { %1485 = vmatpush.bf16.msra.mxu0 %v5389_v46  ;;  %v5722_v26 = vld [vmem:[#allocation2 + $0x570] sm:$0xf0]  ;;  %v5597_v28 = vor.u32 %v7501_v20, %v5594_v21  ;;  %v7465_v30 = vld [vmem:[#allocation2 + $0x344] sm:$0xf]  ;;  %v7424_v18 = vld [vmem:[#allocation2 + $0x1f4] sm:$0xf0] }
  0x5e   :  { %1499 = vmatpush.bf16.msra.mxu1 %v5517_v47  ;;  %1478 = vmatmul.bf16.vlgmr.msra.gmra.mxu2 %v8268_v8  ;;  %v5322_v29 = vld [vmem:[#allocation2 + $0x250] sm:$0xf0]  ;;  %v7497_v32 = vld [vmem:[#allocation2 + $0x444] sm:$0xf]  ;;  %v5725_v34 = vor.u32 %v7533_v25, %v5722_v26  ;;  %v5136_v21 = vld [vmem:[#allocation2 + $0xc8] sm:$0xf]  ;;  %v5281_v26 = vor.u32 %v7424_v18, %v5280_v17 }
  0x5f   :  { %1526 = vmatpush.bf16.msrb.mxu2 %v5789_v45  ;;  %v5450_v31 = vld [vmem:[#allocation2 + $0x350] sm:$0xf0]  ;;  %v5325_v35 = vor.u32 %v7433_v27, %v5322_v29  ;;  %v7529_v38 = vld [vmem:[#allocation2 + $0x544] sm:$0xf]  ;;  %v7452_v25 = vld [vmem:[#allocation2 + $0x2d4] sm:$0xf0] }
  0x60   :  { %1513 = vmatpush.bf16.msra.mxu3 %v5645_v52  ;;  %v5578_v33 = vld [vmem:[#allocation2 + $0x450] sm:$0xf0]  ;;  %v5453_v36 = vor.u32 %v7465_v30, %v5450_v31  ;;  %v7429_v40 = vld [vmem:[#allocation2 + $0x224] sm:$0xf]  ;;  %v5520_v27 = vld [vmem:[#allocation2 + $0x3c8] sm:$0xf] }
  0x61   :  { %1486 = vmatpush.bf16.msra.mxu0 %v5373_v62  ;;  %v5706_v39 = vld [vmem:[#allocation2 + $0x550] sm:$0xf0]  ;;  %v5581_v41 = vor.u32 %v7497_v32, %v5578_v33  ;;  %v7461_v44 = vld [vmem:[#allocation2 + $0x324] sm:$0xf]  ;;  %v5264_v30 = vld [vmem:[#allocation2 + $0x1c8] sm:$0xf] }
  0x62   :  { %1500 = vmatpush.bf16.msra.mxu1 %v5501_v63  ;;  %v5306_v43 = vld [vmem:[#allocation2 + $0x230] sm:$0xf0]  ;;  %v7493_v46 = vld [vmem:[#allocation2 + $0x424] sm:$0xf]  ;;  %v5709_v48 = vor.u32 %v7529_v38, %v5706_v39  ;;  %v7420_v31 = vld [vmem:[#allocation2 + $0x1d4] sm:$0xf0] }
  0x63   :  { %1527 = vmatpush.bf16.msrb.mxu2 %v5773_v61  ;;  %v5434_v45 = vld [vmem:[#allocation2 + $0x330] sm:$0xf0]  ;;  %v7525_v49 = vld [vmem:[#allocation2 + $0x524] sm:$0xf]  ;;  %v5309_v52 = vor.u32 %v7429_v40, %v5306_v43  ;;  %v5120_v33 = vld [vmem:[#allocation2 + $0xa8] sm:$0xf]  ;;  %v5265_v39 = vor.u32 %v7420_v31, %v5264_v30 }
  0x64   :  { %1514 = vmatpush.bf16.msra.mxu3 %v5629_v3  ;;  %v5562_v47 = vld [vmem:[#allocation2 + $0x430] sm:$0xf0]  ;;  %v5437_v53 = vor.u32 %v7461_v44, %v5434_v45  ;;  %v7425_v56 = vld [vmem:[#allocation2 + $0x204] sm:$0xf]  ;;  %v7448_v38 = vld [vmem:[#allocation2 + $0x2b4] sm:$0xf0] }
  0x65   :  { %1487 = vmatpush.bf16.msra.mxu0 %v5357_v11  ;;  %v5690_v51 = vld [vmem:[#allocation2 + $0x530] sm:$0xf0]  ;;  %v7457_v58 = vld [vmem:[#allocation2 + $0x304] sm:$0xf]  ;;  %v5565_v59 = vor.u32 %v7493_v46, %v5562_v47  ;;  %v5504_v40 = vld [vmem:[#allocation2 + $0x3a8] sm:$0xf] }
  0x66   :  { %1501 = vmatpush.bf16.msra.mxu1 %v5485_v12  ;;  %v5290_v57 = vld [vmem:[#allocation2 + $0x210] sm:$0xf0]  ;;  %v7489_v62 = vld [vmem:[#allocation2 + $0x404] sm:$0xf]  ;;  %v5693_v3 = vor.u32 %v7525_v49, %v5690_v51  ;;  %v5248_v44 = vld [vmem:[#allocation2 + $0x1a8] sm:$0xf] }
  0x67   :  { %1528 = vmatpush.bf16.msrb.mxu2 %v5757_v10  ;;  %v5418_v61 = vld [vmem:[#allocation2 + $0x310] sm:$0xf0]  ;;  %v7553_v2 = vld [vmem:[#allocation2 + $0x604] sm:$0xf]  ;;  %v5293_v7 = vor.u32 %v7425_v56, %v5290_v57  ;;  %v7416_v45 = vld [vmem:[#allocation2 + $0x1b4] sm:$0xf0] }
  0x68   :  { %1515 = vmatpush.bf16.msra.mxu3 %v5613_v16  ;;  %v5546_v63 = vld [vmem:[#allocation2 + $0x410] sm:$0xf0]  ;;  %v5421_v9 = vor.u32 %v7457_v58, %v5418_v61  ;;  %v7521_v10 = vld [vmem:[#allocation2 + $0x504] sm:$0xf]  ;;  %v5104_v47 = vld [vmem:[#allocation2 + $0x88] sm:$0xf] }
  0x69   :  { %1488 = vmatpush.bf16.msra.mxu0 %v5341_v23  ;;  %v5802_v4 = vld [vmem:[#allocation2 + $0x610] sm:$0xf0]  ;;  %v5549_v12 = vor.u32 %v7489_v62, %v5546_v63  ;;  %v5537_v23 = vor.u32 %v7488_v15, %v5536_v14  ;;  %v5360_v51 = vld [vmem:[#allocation2 + $0x288] sm:$0xf]  ;;  %v7476_v57 = vld [vmem:[#allocation2 + $0x394] sm:$0xf0] }
  0x6a   :  { %1502 = vmatpush.bf16.msra.mxu1 %v5469_v24  ;;  %v5674_v11 = vld [vmem:[#allocation2 + $0x510] sm:$0xf0]  ;;  %v5805_v16 = vor.u32 %v7553_v2, %v5802_v4  ;;  %v5392_v24 = vld [vmem:[#allocation2 + $0x2c8] sm:$0xf]  ;;  %v7412_v61 = vld [vmem:[#allocation2 + $0x194] sm:$0xf0] }
  0x6b   :  { %1529 = vmatpush.bf16.msrb.mxu2 %v5741_v22  ;;  %v5677_v20 = vor.u32 %v7521_v10, %v5674_v11  ;;  %v7388_v22 = vld [vmem:[#allocation2 + $0xd4] sm:$0xf0]  ;;  %v5393_v32 = vor.u32 %v7452_v25, %v5392_v24  ;;  %v5488_v56 = vld [vmem:[#allocation2 + $0x388] sm:$0xf] }
  0x6c   :  { %1516 = vmatpush.bf16.msra.mxu3 %v5597_v28  ;;  %v7484_v28 = vld [vmem:[#allocation2 + $0x3d4] sm:$0xf0]  ;;  %v5137_v29 = vor.u32 %v7388_v22, %v5136_v21  ;;  %v5088_v63 = vld [vmem:[#allocation2 + $0x68] sm:$0xf]  ;;  %v5489_v1 = vor.u32 %v7476_v57, %v5488_v56  ;;  %v7390_v56 = vld [vmem:[#allocation2 + $0xec] sm:$0xf] }
  0x6d   :  { %1489 = vmatpush.bf16.msra.mxu0 %v5325_v35  ;;  %v5521_v35 = vor.u32 %v7484_v28, %v5520_v27  ;;  %v7376_v0 = vld [vmem:[#allocation2 + $0x74] sm:$0xf0]  ;;  %v5344_v2 = vld [vmem:[#allocation2 + $0x268] sm:$0xf]  ;;  %v5154_v57 = vld [vmem:[#allocation2 + $0xf8] sm:$0xf0] }
  0x6e   :  { %1503 = vmatpush.bf16.msra.mxu1 %v5453_v36  ;;  %v5376_v36 = vld [vmem:[#allocation2 + $0x2a8] sm:$0xf]  ;;  %v7472_v6 = vld [vmem:[#allocation2 + $0x374] sm:$0xf0] }
  0x6f   :  { %1530 = vmatpush.bf16.msrb.mxu2 %v5725_v34  ;;  %v7384_v34 = vld [vmem:[#allocation2 + $0xb4] sm:$0xf0]  ;;  %v5377_v46 = vor.u32 %v7448_v38, %v5376_v36  ;;  %v5472_v5 = vld [vmem:[#allocation2 + $0x368] sm:$0xf] }
  0x70   :  { %1517 = vmatpush.bf16.msra.mxu3 %v5581_v41  ;;  %v7480_v41 = vld [vmem:[#allocation2 + $0x3b4] sm:$0xf0]  ;;  %v5121_v43 = vor.u32 %v7384_v34, %v5120_v33  ;;  %v5473_v14 = vor.u32 %v7472_v6, %v5472_v5  ;;  %v5328_v15 = vld [vmem:[#allocation2 + $0x248] sm:$0xf]  ;;  %v5157_v6 = vor.u32 %v7390_v56, %v5154_v57 }
  0x71   :  { %1490 = vmatpush.bf16.msra.mxu0 %v5309_v52  ;;  %v5505_v49 = vor.u32 %v7480_v41, %v5504_v40  ;;  %v7444_v52 = vld [vmem:[#allocation2 + $0x294] sm:$0xf0]  ;;  %v5456_v18 = vld [vmem:[#allocation2 + $0x348] sm:$0xf] }
  0x72   :  { %1504 = vmatpush.bf16.msra.mxu1 %v5437_v53  ;;  %v5249_v53 = vor.u32 %v7416_v45, %v5248_v44  ;;  %v5361_v62 = vor.u32 %v7444_v52, %v5360_v51  ;;  %v7408_v10 = vld [vmem:[#allocation2 + $0x174] sm:$0xf0]  ;;  %v5200_v21 = vld [vmem:[#allocation2 + $0x148] sm:$0xf] }
  0x73   :  { %1531 = vmatpush.bf16.msrb.mxu2 %v5709_v48  ;;  %v7380_v48 = vld [vmem:[#allocation2 + $0x94] sm:$0xf0]  ;;  %v5056_v24 = vld [vmem:[#allocation2 + $0x28] sm:$0xf] }
  0x74   :  { %1518 = vmatpush.bf16.msra.mxu3 %v5565_v59  ;;  %v5105_v58 = vor.u32 %v7380_v48, %v5104_v47  ;;  %v5232_v59 = vld [vmem:[#allocation2 + $0x188] sm:$0xf]  ;;  %v7404_v22 = vld [vmem:[#allocation2 + $0x154] sm:$0xf0] }
  0x75   :  { %1491 = vmatpush.bf16.msra.mxu0 %v5293_v7  ;;  %v5233_v4 = vor.u32 %v7412_v61, %v5232_v59  ;;  %v5089_v7 = vor.u32 %v7376_v0, %v5088_v63  ;;  %v7368_v25 = vld [vmem:[#allocation2 + $0x34] sm:$0xf0]  ;;  %v5312_v27 = vld [vmem:[#allocation2 + $0x228] sm:$0xf] }
  0x76   :  { %1505 = vmatpush.bf16.msra.mxu1 %v5421_v9  ;;  %v5216_v9 = vld [vmem:[#allocation2 + $0x168] sm:$0xf]  ;;  %v7432_v28 = vld [vmem:[#allocation2 + $0x234] sm:$0xf0] }
  0x77   :  { %1532 = vmatpush.bf16.msrb.mxu2 %v5693_v3  ;;  %v7440_v3 = vld [vmem:[#allocation2 + $0x274] sm:$0xf0]  ;;  %v5217_v17 = vor.u32 %v7408_v10, %v5216_v9  ;;  %v5440_v30 = vld [vmem:[#allocation2 + $0x328] sm:$0xf]  ;;  %v5313_v36 = vor.u32 %v7432_v28, %v5312_v27  ;;  %v7386_v9 = vld [vmem:[#allocation2 + $0xcc] sm:$0xf] }
  0x78   :  { %1519 = vmatpush.bf16.msra.mxu3 %v5549_v12  ;;  %1492 = vmatmul.bf16.vlgmr.msra.gmra.mxu0 %v8254_v54  ;;  %v5345_v11 = vor.u32 %v7440_v3, %v5344_v2  ;;  %v5072_v12 = vld [vmem:[#allocation2 + $0x48] sm:$0xf]  ;;  %v7464_v31 = vld [vmem:[#allocation2 + $0x334] sm:$0xf0]  ;;  %v7422_v3 = vld [vmem:[#allocation2 + $0x1ec] sm:$0xf] }
  0x79   :  { %1582 = vmatpush.bf16.msrb.mxu0 %v5409_v19  ;;  %1506 = vmatmul.bf16.vlgmr.msra.gmra.mxu1 %v8258_v60  ;;  %v7468_v19 = vld [vmem:[#allocation2 + $0x354] sm:$0xf0]  ;;  %v5184_v33 = vld [vmem:[#allocation2 + $0x128] sm:$0xf]  ;;  %v5441_v41 = vor.u32 %v7464_v31, %v5440_v30  ;;  %v5138_v10 = vld [vmem:[#allocation2 + $0xd8] sm:$0xf0] }
  0x7a   :  { %1554 = vmatpush.bf16.msrb.mxu1 %v5153_v13  ;;  %v7372_v13 = vld [vmem:[#allocation2 + $0x54] sm:$0xf0]  ;;  %v5296_v44 = vld [vmem:[#allocation2 + $0x208] sm:$0xf]  ;;  %v5250_v30 = vld [vmem:[#allocation2 + $0x1b8] sm:$0xf0] }
  0x7b   :  { %1533 = vmatpush.bf16.msrb.mxu2 %v5677_v20  ;;  %1520 = vmatmul.bf16.vlgmr.msra.gmra.mxu3 %v8294_v37  ;;  %v5073_v20 = vor.u32 %v7372_v13, %v5072_v12  ;;  %v7400_v34 = vld [vmem:[#allocation2 + $0x134] sm:$0xf0]  ;;  %v5792_v61 = vld [vmem:[#allocation2 + $0x5e8] sm:$0xf] }
  0x7c   :  { %1547 = vmatpush.bf16.msrb.mxu3 %v5805_v16  ;;  %v7436_v16 = vld [vmem:[#allocation2 + $0x254] sm:$0xf0]  ;;  %v5185_v47 = vor.u32 %v7400_v34, %v5184_v33  ;;  %v5648_v63 = vld [vmem:[#allocation2 + $0x4c8] sm:$0xf]  ;;  %v7378_v33 = vld [vmem:[#allocation2 + $0x8c] sm:$0xf] }
  0x7d   :  { %1583 = vmatpush.bf16.msrb.mxu0 %v5393_v32  ;;  %v5057_v32 = vor.u32 %v7368_v25, %v5056_v24  ;;  %v7364_v38 = vld [vmem:[#allocation2 + $0x14] sm:$0xf0]  ;;  %v5776_v13 = vld [vmem:[#allocation2 + $0x5c8] sm:$0xf]  ;;  %v5106_v34 = vld [vmem:[#allocation2 + $0x98] sm:$0xf0] }
  0x7e   :  { %1555 = vmatpush.bf16.msrb.mxu1 %v5137_v29  ;;  %1534 = vmatmul.bf16.vlgmr.msrb.gmra.mxu2 %v8296_v42  ;;  %v5201_v29 = vor.u32 %v7404_v22, %v5200_v21  ;;  %v7520_v40 = vld [vmem:[#allocation2 + $0x4f4] sm:$0xf0]  ;;  %v7382_v21 = vld [vmem:[#allocation2 + $0xac] sm:$0xf]  ;;  %v5122_v22 = vld [vmem:[#allocation2 + $0xb8] sm:$0xf0] }
  0x7f   :  { %1596 = vmatpush.bf16.msra.mxu2 %v5537_v23  ;;  %v5329_v23 = vor.u32 %v7436_v16, %v5328_v15  ;;  %v7428_v45 = vld [vmem:[#allocation2 + $0x214] sm:$0xf0]  ;;  %v5632_v15 = vld [vmem:[#allocation2 + $0x4a8] sm:$0xf]  ;;  %v5125_v31 = vor.u32 %v7382_v21, %v5122_v22  ;;  %v5186_v21 = vld [vmem:[#allocation2 + $0x138] sm:$0xf0] }
  0x80   :  { %1568 = vmatpush.bf16.msra.mxu3 %v5281_v26  ;;  %v5457_v26 = vor.u32 %v7468_v19, %v5456_v18  ;;  %v7460_v48 = vld [vmem:[#allocation2 + $0x314] sm:$0xf0]  ;;  %v5297_v59 = vor.u32 %v7428_v45, %v5296_v44  ;;  %v5266_v18 = vld [vmem:[#allocation2 + $0x1d8] sm:$0xf0]  ;;  %v5141_v19 = vor.u32 %v7386_v9, %v5138_v10  ;;  %v5760_v25 = vld [vmem:[#allocation2 + $0x5a8] sm:$0xf]  ;;  %v5109_v45 = vor.u32 %v7378_v33, %v5106_v34 }
  0x81   :  { %1584 = vmatpush.bf16.msrb.mxu0 %v5377_v46  ;;  %v5424_v46 = vld [vmem:[#allocation2 + $0x308] sm:$0xf]  ;;  %v7556_v51 = vld [vmem:[#allocation2 + $0x614] sm:$0xf0]  ;;  %v5234_v44 = vld [vmem:[#allocation2 + $0x198] sm:$0xf0] }
  0x82   :  { %1556 = vmatpush.bf16.msrb.mxu1 %v5121_v43  ;;  %v5168_v43 = vld [vmem:[#allocation2 + $0x108] sm:$0xf]  ;;  %v5425_v0 = vor.u32 %v7460_v48, %v5424_v46  ;;  %v7512_v16 = vld [vmem:[#allocation2 + $0x4b4] sm:$0xf0]  ;;  %v5090_v48 = vld [vmem:[#allocation2 + $0x78] sm:$0xf0] }
  0x83   :  { %1597 = vmatpush.bf16.msra.mxu2 %v5521_v35  ;;  %v5040_v35 = vld [vmem:[#allocation2 + $0x8] sm:$0xf]  ;;  %v7508_v28 = vld [vmem:[#allocation2 + $0x494] sm:$0xf0]  ;;  %v5202_v9 = vld [vmem:[#allocation2 + $0x158] sm:$0xf0] }
  0x84   :  { %1569 = vmatpush.bf16.msra.mxu3 %v5265_v39  ;;  %v5664_v39 = vld [vmem:[#allocation2 + $0x4e8] sm:$0xf]  ;;  %v5041_v52 = vor.u32 %v7364_v38, %v5040_v35  ;;  %v7500_v57 = vld [vmem:[#allocation2 + $0x454] sm:$0xf0]  ;;  %v5538_v33 = vld [vmem:[#allocation2 + $0x3f8] sm:$0xf0] }
  0x85   :  { %1585 = vmatpush.bf16.msrb.mxu0 %v5361_v62  ;;  %v7552_v62 = vld [vmem:[#allocation2 + $0x5f4] sm:$0xf0]  ;;  %v5616_v27 = vld [vmem:[#allocation2 + $0x488] sm:$0xf] }
  0x86   :  { %1557 = vmatpush.bf16.msrb.mxu1 %v5105_v58  ;;  %v5665_v58 = vor.u32 %v7520_v40, %v5664_v39  ;;  %v5617_v35 = vor.u32 %v7508_v28, %v5616_v27  ;;  %v5744_v38 = vld [vmem:[#allocation2 + $0x588] sm:$0xf]  ;;  %v7540_v39 = vld [vmem:[#allocation2 + $0x594] sm:$0xf0]  ;;  %v7362_v27 = vld [vmem:[#allocation2 + $0xc] sm:$0xf] }
  0x87   :  { %1598 = vmatpush.bf16.msra.mxu2 %v5505_v49  ;;  %v5808_v49 = vld [vmem:[#allocation2 + $0x608] sm:$0xf]  ;;  %v5745_v46 = vor.u32 %v7540_v39, %v5744_v38  ;;  %v5042_v28 = vld [vmem:[#allocation2 + $0x18] sm:$0xf0]  ;;  %v7450_v38 = vld [vmem:[#allocation2 + $0x2cc] sm:$0xf] }
  0x88   :  { %1570 = vmatpush.bf16.msra.mxu3 %v5249_v53  ;;  %v7396_v53 = vld [vmem:[#allocation2 + $0x114] sm:$0xf0]  ;;  %v5809_v2 = vor.u32 %v7556_v51, %v5808_v49  ;;  %v5600_v40 = vld [vmem:[#allocation2 + $0x468] sm:$0xf]  ;;  %v5045_v39 = vor.u32 %v7362_v27, %v5042_v28  ;;  %v5474_v28 = vld [vmem:[#allocation2 + $0x378] sm:$0xf0] }
  0x89   :  { %1586 = vmatpush.bf16.msrb.mxu0 %v5345_v11  ;;  %v5169_v5 = vor.u32 %v7396_v53, %v5168_v43  ;;  %v7410_v43 = vld [vmem:[#allocation2 + $0x18c] sm:$0xf]  ;;  %v7536_v53 = vld [vmem:[#allocation2 + $0x574] sm:$0xf0]  ;;  %v5584_v56 = vld [vmem:[#allocation2 + $0x448] sm:$0xf] }
  0x8a   :  { %1558 = vmatpush.bf16.msrb.mxu1 %v5089_v7  ;;  %v5793_v7 = vor.u32 %v7552_v62, %v5792_v61  ;;  %v5237_v51 = vor.u32 %v7410_v43, %v5234_v44  ;;  %v5170_v43 = vld [vmem:[#allocation2 + $0x118] sm:$0xf0] }
  0x8b   :  { %1599 = vmatpush.bf16.msra.mxu2 %v5489_v1  ;;  %5815 = vmatmul.msk.bf16.vlgmr.msrb.gmra.mxu3 %vm1354_vm0, %v8278_v50  ;;  %v7516_v1 = vld [vmem:[#allocation2 + $0x4d4] sm:$0xf0] }
  0x8c   :  { %1571 = vmatpush.bf16.msra.mxu3 %v5233_v4  ;;  %v5282_v4 = vld [vmem:[#allocation2 + $0x1f8] sm:$0xf0]  ;;  %v5649_v11 = vor.u32 %v7516_v1, %v5648_v63  ;;  %v7370_v63 = vld [vmem:[#allocation2 + $0x4c] sm:$0xf]  ;;  %v5585_v1 = vor.u32 %v7500_v57, %v5584_v56 }
  0x8d   :  { %1587 = vmatpush.bf16.msrb.mxu0 %v5329_v23  ;;  %v5285_v12 = vor.u32 %v7422_v3, %v5282_v4  ;;  %v5633_v23 = vor.u32 %v7512_v16, %v5632_v15  ;;  %v5712_v3 = vld [vmem:[#allocation2 + $0x548] sm:$0xf]  ;;  %v7532_v4 = vld [vmem:[#allocation2 + $0x554] sm:$0xf0]  ;;  %v7514_v56 = vld [vmem:[#allocation2 + $0x4cc] sm:$0xf] }
  0x8e   :  { %1559 = vmatpush.bf16.msrb.mxu1 %v5073_v20  ;;  %v5696_v16 = vld [vmem:[#allocation2 + $0x528] sm:$0xf]  ;;  %v5650_v57 = vld [vmem:[#allocation2 + $0x4d8] sm:$0xf0] }
  0x8f   :  { %1600 = vmatpush.bf16.msra.mxu2 %v5473_v14  ;;  %v7548_v14 = vld [vmem:[#allocation2 + $0x5d4] sm:$0xf0] }
  0x90   :  { %1572 = vmatpush.bf16.msra.mxu3 %v5217_v17  ;;  %v7418_v17 = vld [vmem:[#allocation2 + $0x1cc] sm:$0xf]  ;;  %v5777_v20 = vor.u32 %v7548_v14, %v5776_v13  ;;  %v5058_v13 = vld [vmem:[#allocation2 + $0x38] sm:$0xf0] }
  0x91   :  { %1588 = vmatpush.bf16.msrb.mxu0 %v5313_v36  ;;  %v5269_v24 = vor.u32 %v7418_v17, %v5266_v18  ;;  %v7528_v17 = vld [vmem:[#allocation2 + $0x534] sm:$0xf0]  ;;  %v5552_v18 = vld [vmem:[#allocation2 + $0x408] sm:$0xf] }
  0x92   :  { %1560 = vmatpush.bf16.msrb.mxu1 %v5057_v32 }
  0x93   :  { %1601 = vmatpush.bf16.msra.mxu2 %v5457_v26  ;;  %v7544_v26 = vld [vmem:[#allocation2 + $0x5b4] sm:$0xf0] }
  0x94   :  { %1573 = vmatpush.bf16.msra.mxu3 %v5201_v29  ;;  %v7414_v29 = vld [vmem:[#allocation2 + $0x1ac] sm:$0xf]  ;;  %v5761_v32 = vor.u32 %v7544_v26, %v5760_v25  ;;  %v5697_v25 = vor.u32 %v7528_v17, %v5696_v16  ;;  %v5680_v26 = vld [vmem:[#allocation2 + $0x508] sm:$0xf]  ;;  %v5490_v17 = vld [vmem:[#allocation2 + $0x398] sm:$0xf0] }
  0x95   :  { %1589 = vmatpush.bf16.msrb.mxu0 %v5297_v59  ;;  %v5253_v36 = vor.u32 %v7414_v29, %v5250_v30  ;;  %v5218_v59 = vld [vmem:[#allocation2 + $0x178] sm:$0xf0] }
  0x96   :  { %1561 = vmatpush.bf16.msrb.mxu1 %v5041_v52  ;;  %v5728_v52 = vld [vmem:[#allocation2 + $0x568] sm:$0xf] }
  0x97   :  { %1602 = vmatpush.bf16.msra.mxu2 %v5441_v41  ;;  %v7504_v41 = vld [vmem:[#allocation2 + $0x474] sm:$0xf0]  ;;  %v5729_v62 = vor.u32 %v7536_v53, %v5728_v52  ;;  %v5522_v53 = vld [vmem:[#allocation2 + $0x3d8] sm:$0xf0] }
  0x98   :  { %1574 = vmatpush.bf16.msra.mxu3 %v5185_v47  ;;  %1590 = vmatmul.bf16.vlgmr.msrb.gmra.mxu0 %v8254_v54  ;;  %v7374_v47 = vld [vmem:[#allocation2 + $0x6c] sm:$0xf]  ;;  %v5601_v49 = vor.u32 %v7504_v41, %v5600_v40  ;;  %v5394_v40 = vld [vmem:[#allocation2 + $0x2d8] sm:$0xf0] }
  0x99   :  { %1645 = vmatpush.bf16.msra.mxu0 %v5809_v2  ;;  %1562 = vmatmul.bf16.vlgmr.msrb.gmra.mxu1 %v8256_v55  ;;  %v5093_v61 = vor.u32 %v7374_v47, %v5090_v48  ;;  %v7394_v41 = vld [vmem:[#allocation2 + $0x10c] sm:$0xf] }
  0x9a   :  { %1610 = vmatpush.bf16.msra.mxu1 %v5665_v58  ;;  %v7406_v58 = vld [vmem:[#allocation2 + $0x16c] sm:$0xf]  ;;  %v5173_v52 = vor.u32 %v7394_v41, %v5170_v43  ;;  %v5586_v43 = vld [vmem:[#allocation2 + $0x458] sm:$0xf0] }
  0x9b   :  { %1603 = vmatpush.bf16.msra.mxu2 %v5425_v0  ;;  %v5074_v0 = vld [vmem:[#allocation2 + $0x58] sm:$0xf0]  ;;  %v5221_v2 = vor.u32 %v7406_v58, %v5218_v59  ;;  %v7446_v59 = vld [vmem:[#allocation2 + $0x2ac] sm:$0xf] }
  0x9c   :  { %1575 = vmatpush.bf16.msra.mxu3 %v5169_v5  ;;  %v5568_v5 = vld [vmem:[#allocation2 + $0x428] sm:$0xf]  ;;  %v5077_v10 = vor.u32 %v7370_v63, %v5074_v0  ;;  %v5778_v63 = vld [vmem:[#allocation2 + $0x5d8] sm:$0xf0]  ;;  %v7498_v41 = vld [vmem:[#allocation2 + $0x44c] sm:$0xf] }
  0x9d   :  { %1666 = vmatpush.bf16.msrb.mxu0 %v5285_v12  ;;  %v7366_v12 = vld [vmem:[#allocation2 + $0x2c] sm:$0xf] }
  0x9e   :  { %1611 = vmatpush.bf16.msra.mxu1 %v5649_v11  ;;  %1604 = vmatmul.bf16.vlgmr.msra.gmra.mxu2 %v8258_v60  ;;  %v5713_v11 = vor.u32 %v7532_v4, %v5712_v3  ;;  %v5061_v22 = vor.u32 %v7366_v12, %v5058_v13  ;;  %v5506_v4 = vld [vmem:[#allocation2 + $0x3b8] sm:$0xf0] }
  0x9f   :  { %1652 = vmatpush.bf16.msrb.mxu2 %v5157_v6  ;;  %1576 = vmatmul.bf16.vlgmr.msra.gmra.mxu3 %v8268_v8  ;;  %v7496_v6 = vld [vmem:[#allocation2 + $0x434] sm:$0xf0]  ;;  %v5762_v12 = vld [vmem:[#allocation2 + $0x5b8] sm:$0xf0] }
  0xa0   :  { %1624 = vmatpush.bf16.msrb.mxu3 %v5793_v7  ;;  %v7402_v7 = vld [vmem:[#allocation2 + $0x14c] sm:$0xf]  ;;  %v5569_v14 = vor.u32 %v7496_v6, %v5568_v5  ;;  %v5634_v6 = vld [vmem:[#allocation2 + $0x4b8] sm:$0xf0] }
  0xa1   :  { %1667 = vmatpush.bf16.msrb.mxu0 %v5269_v24  ;;  %v5205_v15 = vor.u32 %v7402_v7, %v5202_v9  ;;  %v5410_v24 = vld [vmem:[#allocation2 + $0x2f8] sm:$0xf0]  ;;  %v7510_v5 = vld [vmem:[#allocation2 + $0x4ac] sm:$0xf] }
  0xa2   :  { %1612 = vmatpush.bf16.msra.mxu1 %v5633_v23  ;;  %v7454_v23 = vld [vmem:[#allocation2 + $0x2ec] sm:$0xf] }
  0xa3   :  { %1653 = vmatpush.bf16.msrb.mxu2 %v5141_v19  ;;  %v7492_v19 = vld [vmem:[#allocation2 + $0x414] sm:$0xf0]  ;;  %v5413_v34 = vor.u32 %v7454_v23, %v5410_v24  ;;  %v7442_v9 = vld [vmem:[#allocation2 + $0x28c] sm:$0xf] }
  0xa4   :  { %1625 = vmatpush.bf16.msrb.mxu3 %v5777_v20  ;;  %v7398_v20 = vld [vmem:[#allocation2 + $0x12c] sm:$0xf]  ;;  %v5553_v29 = vor.u32 %v7492_v19, %v5552_v18  ;;  %v5618_v19 = vld [vmem:[#allocation2 + $0x498] sm:$0xf0] }
  0xa5   :  { %1668 = vmatpush.bf16.msrb.mxu0 %v5253_v36  ;;  %v5189_v30 = vor.u32 %v7398_v20, %v5186_v21  ;;  %v5666_v36 = vld [vmem:[#allocation2 + $0x4f8] sm:$0xf0]  ;;  %v7506_v18 = vld [vmem:[#allocation2 + $0x48c] sm:$0xf] }
  0xa6   :  { %1613 = vmatpush.bf16.msra.mxu1 %v5617_v35  ;;  %v7518_v35 = vld [vmem:[#allocation2 + $0x4ec] sm:$0xf] }
  0xa7   :  { %1654 = vmatpush.bf16.msrb.mxu2 %v5125_v31  ;;  %v7524_v31 = vld [vmem:[#allocation2 + $0x514] sm:$0xf0]  ;;  %v5669_v48 = vor.u32 %v7518_v35, %v5666_v36  ;;  %v7438_v21 = vld [vmem:[#allocation2 + $0x26c] sm:$0xf] }
  0xa8   :  { %1626 = vmatpush.bf16.msrb.mxu3 %v5761_v32  ;;  %5816 = vmatmul.msk.bf16.vlgmr.msra.gmra.mxu0 %vm1354_vm0, %v8278_v50  ;;  %v7486_v32 = vld [vmem:[#allocation2 + $0x3ec] sm:$0xf]  ;;  %v5681_v44 = vor.u32 %v7524_v31, %v5680_v26 }
  0xa9   :  { %1669 = vmatpush.bf16.msrb.mxu0 %v5237_v51  ;;  %v5541_v47 = vor.u32 %v7486_v32, %v5538_v33  ;;  %v5397_v51 = vor.u32 %v7450_v38, %v5394_v40  ;;  %v7538_v23 = vld [vmem:[#allocation2 + $0x58c] sm:$0xf]  ;;  %v5458_v40 = vld [vmem:[#allocation2 + $0x358] sm:$0xf0] }
  0xaa   :  { %1614 = vmatpush.bf16.msra.mxu1 %v5601_v49  ;;  %v7482_v49 = vld [vmem:[#allocation2 + $0x3cc] sm:$0xf] }
  0xab   :  { %1655 = vmatpush.bf16.msrb.mxu2 %v5109_v45  ;;  %v7550_v45 = vld [vmem:[#allocation2 + $0x5ec] sm:$0xf]  ;;  %v5525_v0 = vor.u32 %v7482_v49, %v5522_v53 }
  0xac   :  { %1627 = vmatpush.bf16.msrb.mxu3 %v5745_v46  ;;  %v5794_v46 = vld [vmem:[#allocation2 + $0x5f8] sm:$0xf0]  ;;  %v7470_v26 = vld [vmem:[#allocation2 + $0x36c] sm:$0xf] }
  0xad   :  { %1670 = vmatpush.bf16.msrb.mxu0 %v5221_v2  ;;  %v5797_v58 = vor.u32 %v7550_v45, %v5794_v46  ;;  %v7478_v2 = vld [vmem:[#allocation2 + $0x3ac] sm:$0xf]  ;;  %v5477_v35 = vor.u32 %v7470_v26, %v5474_v28  ;;  %v5314_v46 = vld [vmem:[#allocation2 + $0x238] sm:$0xf0]  ;;  %v7570_v28 = vld [vmem:[#allocation4 + $0x64] sm:$0xf0] }
  0xae   :  { %1615 = vmatpush.bf16.msra.mxu1 %v5585_v1  ;;  %v5653_v1 = vor.u32 %v7514_v56, %v5650_v57  ;;  %v5509_v13 = vor.u32 %v7478_v2, %v5506_v4  ;;  %v7434_v32 = vld [vmem:[#allocation2 + $0x24c] sm:$0xf]  ;;  %v5442_v57 = vld [vmem:[#allocation2 + $0x338] sm:$0xf0] }
  0xaf   :  { %1656 = vmatpush.bf16.msrb.mxu2 %v5093_v61  ;;  %v5378_v61 = vld [vmem:[#allocation2 + $0x2b8] sm:$0xf0]  ;;  %v7534_v33 = vld [vmem:[#allocation2 + $0x56c] sm:$0xf] }
  0xb0   :  { %1628 = vmatpush.bf16.msrb.mxu3 %v5729_v62  ;;  %v7546_v62 = vld [vmem:[#allocation2 + $0x5cc] sm:$0xf]  ;;  %v5381_v3 = vor.u32 %v7446_v59, %v5378_v61  ;;  %v5570_v59 = vld [vmem:[#allocation2 + $0x438] sm:$0xf0] }
  0xb1   :  { %1671 = vmatpush.bf16.msrb.mxu0 %v5205_v15  ;;  %v5781_v7 = vor.u32 %v7546_v62, %v5778_v63  ;;  %v7474_v15 = vld [vmem:[#allocation2 + $0x38c] sm:$0xf]  ;;  %v5698_v2 = vld [vmem:[#allocation2 + $0x538] sm:$0xf0] }
  0xb2   :  { %1616 = vmatpush.bf16.msra.mxu1 %v5569_v14  ;;  %v5637_v14 = vor.u32 %v7510_v5, %v5634_v6  ;;  %v5493_v24 = vor.u32 %v7474_v15, %v5490_v17  ;;  %v7466_v38 = vld [vmem:[#allocation2 + $0x34c] sm:$0xf]  ;;  %v5810_v4 = vld [vmem:[#allocation2 + $0x618] sm:$0xf0]  ;;  %v5876_v15 = vld [vmem:[#allocation4 + $0x70] sm:$0xf] }
  0xb3   :  { %1657 = vmatpush.bf16.msrb.mxu2 %v5077_v10  ;;  %v5362_v10 = vld [vmem:[#allocation2 + $0x298] sm:$0xf0]  ;;  %v7430_v45 = vld [vmem:[#allocation2 + $0x22c] sm:$0xf]  ;;  %v5461_v49 = vor.u32 %v7466_v38, %v5458_v40  ;;  %v5860_v38 = vld [vmem:[#allocation4 + $0x50] sm:$0xf] }
  0xb4   :  { %1629 = vmatpush.bf16.msrb.mxu3 %v5713_v11  ;;  %v7542_v11 = vld [vmem:[#allocation2 + $0x5ac] sm:$0xf]  ;;  %v5365_v16 = vor.u32 %v7442_v9, %v5362_v10  ;;  %v5317_v56 = vor.u32 %v7430_v45, %v5314_v46 }
  0xb5   :  { %1672 = vmatpush.bf16.msrb.mxu0 %v5189_v30  ;;  %v5765_v20 = vor.u32 %v7542_v11, %v5762_v12  ;;  %v5602_v30 = vld [vmem:[#allocation2 + $0x478] sm:$0xf0]  ;;  %v7426_v63 = vld [vmem:[#allocation2 + $0x20c] sm:$0xf] }
  0xb6   :  { %1617 = vmatpush.bf16.msra.mxu1 %v5553_v29  ;;  %v7502_v29 = vld [vmem:[#allocation2 + $0x46c] sm:$0xf]  ;;  %v5426_v11 = vld [vmem:[#allocation2 + $0x318] sm:$0xf0] }
  0xb7   :  { %1658 = vmatpush.bf16.msrb.mxu2 %v5061_v22  ;;  %v5346_v22 = vld [vmem:[#allocation2 + $0x278] sm:$0xf0]  ;;  %v5605_v36 = vor.u32 %v7502_v29, %v5602_v30  ;;  %v7458_v10 = vld [vmem:[#allocation2 + $0x30c] sm:$0xf] }
  0xb8   :  { %1630 = vmatpush.bf16.msrb.mxu3 %v5697_v25  ;;  %v5621_v25 = vor.u32 %v7506_v18, %v5618_v19  ;;  %v5349_v27 = vor.u32 %v7438_v21, %v5346_v22  ;;  %v7490_v12 = vld [vmem:[#allocation2 + $0x40c] sm:$0xf]  ;;  %v8325_v18 = vld [vmem:[%s8498_s2] sm:$0xf]  ;;  %v5429_v21 = vor.u32 %v7458_v10, %v5426_v11 }
  0xb9   :  { %1618 = vmatmul.bf16.vlgmr.msra.gmra.mxu1 %v8294_v37  ;;  %1673 = vmatpush.bf16.msrb.mxu0 %v5173_v52  ;;  %v7462_v52 = vld [vmem:[#allocation2 + $0x32c] sm:$0xf]  ;;  %v1367_v53 = vpop.f32.mrf.mxu0 }
  0xba   :  { %1680 = vmatpush.bf16.msrb.mxu1 %v5413_v34  ;;  %v5730_v34 = vld [vmem:[#allocation2 + $0x578] sm:$0xf0]  ;;  %v5445_v5 = vor.u32 %v7462_v52, %v5442_v57  ;;  %v7522_v19 = vld [vmem:[#allocation2 + $0x50c] sm:$0xf] }
  0xbb   :  { %1659 = vmatpush.bf16.msrb.mxu2 %v5045_v39 }
  0xbc   :  { %1631 = vmatpush.bf16.msrb.mxu3 %v5681_v44  ;;  %1674 = vmatmul.bf16.vlgmr.msrb.gmra.mxu0 %v8268_v8  ;;  %v5330_v8 = vld [vmem:[#allocation2 + $0x258] sm:$0xf0]  ;;  %v5733_v44 = vor.u32 %v7534_v33, %v5730_v34  ;;  %v8318_v61 = vpop.f32.mrf.mxu1  ;;  %v5932_v33 = vld [vmem:[#allocation4 + $0xe0] sm:$0xf]  ;;  %v7586_v34 = vld [vmem:[#allocation4 + $0xe4] sm:$0xf0] }
  0xbd   :  { %1722 = vmatpush.bf16.msra.mxu0 %v5797_v58  ;;  %v5333_v39 = vor.u32 %v7434_v32, %v5330_v8  ;;  %v7494_v58 = vld [vmem:[#allocation2 + $0x42c] sm:$0xf]  ;;  %v5933_v40 = vor.u32 %v7586_v34, %v5932_v33 }
  0xbe   :  { %1681 = vmatpush.bf16.msrb.mxu1 %v5397_v51  ;;  %1660 = vmatmul.bf16.vlgmr.msrb.gmra.mxu2 %v8256_v55  ;;  %v5746_v55 = vld [vmem:[#allocation2 + $0x598] sm:$0xf0]  ;;  %v5589_v51 = vor.u32 %v7498_v41, %v5586_v43  ;;  %v5573_v6 = vor.u32 %v7494_v58, %v5570_v59  ;;  %v1409_v32 = vpop.f32.mrf.mxu3  ;;  %v5924_v43 = vld [vmem:[#allocation4 + $0xd0] sm:$0xf]  ;;  %v7564_v58 = vld [vmem:[#allocation4 + $0x34] sm:$0xf0] }
  0xbf   :  { %1708 = vmatpush.bf16.msra.mxu2 %v5669_v48  ;;  %1632 = vmatmul.bf16.vlgmr.msrb.gmra.mxu3 %v8296_v42  ;;  %v5749_v31 = vor.u32 %v7538_v23, %v5746_v55  ;;  %v5714_v48 = vld [vmem:[#allocation2 + $0x558] sm:$0xf0]  ;;  %v5940_v55 = vld [vmem:[#allocation4 + $0xf0] sm:$0xf] }
  0xc0   :  { %1694 = vmatpush.bf16.msra.mxu3 %v5541_v47  ;;  %v7530_v47 = vld [vmem:[#allocation2 + $0x54c] sm:$0xf] }
  0xc1   :  { %1723 = vmatpush.bf16.msra.mxu0 %v5781_v7  ;;  %v5717_v62 = vor.u32 %v7530_v47, %v5714_v48  ;;  %v8320_v7 = vpop.f32.mrf.mxu2  ;;  %v1369_v30 = vpop.f32.mrf.mxu0  ;;  %v5852_v47 = vld [vmem:[#allocation4 + $0x40] sm:$0xf]  ;;  %v7566_v48 = vld [vmem:[#allocation4 + $0x44] sm:$0xf0] }
  0xc2   :  { %1682 = vmatpush.bf16.msrb.mxu1 %v5381_v3  ;;  %v7554_v3 = vld [vmem:[#allocation2 + $0x60c] sm:$0xf] }
  0xc3   :  { %1709 = vmatpush.bf16.msra.mxu2 %v5653_v1  ;;  %v7526_v1 = vld [vmem:[#allocation2 + $0x52c] sm:$0xf]  ;;  %v5813_v17 = vor.u32 %v7554_v3, %v5810_v4  ;;  %v5836_v4 = vld [vmem:[#allocation4 + $0x20] sm:$0xf] }
  0xc4   :  { %1695 = vmatpush.bf16.msra.mxu3 %v5525_v0  ;;  %v5298_v0 = vld [vmem:[#allocation2 + $0x218] sm:$0xf0] }
  0xc5   :  { %1724 = vmatpush.bf16.msra.mxu0 %v5765_v20  ;;  %v5301_v9 = vor.u32 %v7426_v63, %v5298_v0  ;;  %v5682_v20 = vld [vmem:[#allocation2 + $0x518] sm:$0xf0]  ;;  %v5908_v0 = vld [vmem:[#allocation4 + $0xb0] sm:$0xf] }
  0xc6   :  { %1683 = vmatpush.bf16.msrb.mxu1 %v5365_v16  ;;  %v7572_v16 = vld [vmem:[#allocation4 + $0x74] sm:$0xf0]  ;;  %v5685_v26 = vor.u32 %v7522_v19, %v5682_v20 }
  0xc7   :  { %1710 = vmatpush.bf16.msra.mxu2 %v5637_v14  ;;  %v5554_v14 = vld [vmem:[#allocation2 + $0x418] sm:$0xf0]  ;;  %v5877_v23 = vor.u32 %v7572_v16, %v5876_v15  ;;  %v5828_v16 = vld [vmem:[#allocation4 + $0x10] sm:$0xf] }
  0xc8   :  { %1696 = vmatpush.bf16.msra.mxu3 %v5509_v13  ;;  %v5701_v13 = vor.u32 %v7526_v1, %v5698_v2  ;;  %v5557_v22 = vor.u32 %v7490_v12, %v5554_v14  ;;  %v7580_v1 = vld [vmem:[#allocation4 + $0xb4] sm:$0xf0]  ;;  %v7578_v14 = vld [vmem:[#allocation4 + $0xa4] sm:$0xf0] }
  0xc9   :  { %1725 = vmatpush.bf16.msra.mxu0 %v5749_v31  ;;  %v1383_v31 = vpop.f32.mrf.mxu1  ;;  %v1397_v41 = vpop.f32.mrf.mxu2 }
  0xca   :  { %1684 = vmatpush.bf16.msrb.mxu1 %v5349_v27  ;;  %v5868_v27 = vld [vmem:[#allocation4 + $0x60] sm:$0xf] }
  0xcb   :  { %1711 = vmatpush.bf16.msra.mxu2 %v5621_v25  ;;  %v331_v25 = vperm.slane %v8325_v18, 0  ;;  %v5869_v8 = vor.u32 %v7570_v28, %v5868_v27  ;;  %v7571_v27 = vld [vmem:[#allocation4 + $0x74] sm:$0xf]  ;;  %v5878_v28 = vld [vmem:[#allocation4 + $0x78] sm:$0xf0] }
  0xcc   :  { %1697 = vmatpush.bf16.msra.mxu3 %v5493_v24  ;;  %v7588_v24 = vld [vmem:[#allocation4 + $0xf4] sm:$0xf0]  ;;  %v5881_v34 = vor.u32 %v7571_v27, %v5878_v28  ;;  %v5894_v27 = vld [vmem:[#allocation4 + $0x98] sm:$0xf0] }
  0xcd   :  { %1726 = vmatpush.bf16.msra.mxu0 %v5733_v44  ;;  %v5941_v29 = vor.u32 %v7588_v24, %v5940_v55  ;;  %v7584_v44 = vld [vmem:[#allocation4 + $0xd4] sm:$0xf0] }
  0xce   :  { %1685 = vmatpush.bf16.msrb.mxu1 %v5333_v39  ;;  %v7568_v39 = vld [vmem:[#allocation4 + $0x54] sm:$0xf0] }
  0xcf   :  { %1712 = vmatpush.bf16.msra.mxu2 %v5605_v36  ;;  %v1370_v36 = vadd.f32 %v1369_v30, %v331_v25  ;;  %v7576_v55 = vld [vmem:[#allocation4 + $0x94] sm:$0xf0] }
  0xd0   :  { %1698 = vmatpush.bf16.msra.mxu3 %v5477_v35  ;;  %v1368_v35 = vadd.f32 %v1367_v53, %v331_v25  ;;  %v5853_v53 = vor.u32 %v7566_v48, %v5852_v47  ;;  %v5820_v25 = vld [vmem:[#allocation4] sm:$0xf]  ;;  %v7567_v47 = vld [vmem:[#allocation4 + $0x54] sm:$0xf]  ;;  %v5862_v48 = vld [vmem:[#allocation4 + $0x58] sm:$0xf0] }
  0xd1   :  { %1727 = vmatpush.bf16.msra.mxu0 %v5717_v62  ;;  %v1384_v46 = vadd.f32 %v1383_v31, %v1370_v36  ;;  %v1411_v62 = vpop.f32.mrf.mxu3  ;;  %v5884_v31 = vld [vmem:[#allocation4 + $0x80] sm:$0xf]  ;;  %v7587_v36 = vld [vmem:[#allocation4 + $0xf4] sm:$0xf] }
  0xd2   :  { %1686 = vmatpush.bf16.msrb.mxu1 %v5317_v56  ;;  %v1382_v45 = vadd.f32 %v8318_v61, %v1368_v35  ;;  %v7582_v56 = vld [vmem:[#allocation4 + $0xc4] sm:$0xf0]  ;;  %v1451_v61 = vpop.f32.mrf.mxu2 }
  0xd3   :  { %1713 = vmatpush.bf16.msra.mxu2 %v5589_v51  ;;  %v1398_v57 = vadd.f32 %v1397_v41, %v1384_v46  ;;  %v5934_v46 = vld [vmem:[#allocation4 + $0xe8] sm:$0xf0] }
  0xd4   :  { %1699 = vmatpush.bf16.msra.mxu3 %v5461_v49  ;;  %v5925_v49 = vor.u32 %v7584_v44, %v5924_v43 }
  0xd5   :  { %1728 = vmatpush.bf16.msra.mxu0 %v5701_v13  ;;  %v1423_v51 = vpop.f32.mrf.mxu0  ;;  %v1412_v3 = vadd.f32 %v1411_v62, %v1398_v57  ;;  %v5900_v13 = vld [vmem:[#allocation4 + $0xa0] sm:$0xf]  ;;  %v5918_v62 = vld [vmem:[#allocation4 + $0xc8] sm:$0xf0] }
  0xd6   :  { %1687 = vmatpush.bf16.msrb.mxu1 %v5301_v9  ;;  %v1437_v52 = vpop.f32.mrf.mxu1  ;;  %v5901_v19 = vor.u32 %v7578_v14, %v5900_v13 }
  0xd7   :  { %1714 = vmatpush.bf16.msra.mxu2 %v5573_v6  ;;  %v5909_v6 = vor.u32 %v7580_v1, %v5908_v0 }
  0xd8   :  { %1700 = vmatpush.bf16.msra.mxu3 %v5445_v5  ;;  %v7562_v5 = vld [vmem:[#allocation4 + $0x24] sm:$0xf0] }
  0xd9   :  { %1688 = vmatmul.bf16.vlgmr.msrb.gmra.mxu1 %v8254_v54  ;;  %1729 = vmatpush.bf16.msra.mxu0 %v5685_v26  ;;  %v5861_v54 = vor.u32 %v7568_v39, %v5860_v38  ;;  %v5837_v12 = vor.u32 %v7562_v5, %v5836_v4  ;;  %v5942_v38 = vld [vmem:[#allocation4 + $0xf8] sm:$0xf0]  ;;  %v7569_v39 = vld [vmem:[#allocation4 + $0x64] sm:$0xf]  ;;  %v5838_v5 = vld [vmem:[#allocation4 + $0x28] sm:$0xf0] }
  0xda   :  { %1743 = vmatpush.bf16.msra.mxu1 %v5813_v17  ;;  %v7560_v17 = vld [vmem:[#allocation4 + $0x14] sm:$0xf0]  ;;  %v5945_v41 = vor.u32 %v7587_v36, %v5942_v38  ;;  %v7561_v4 = vld [vmem:[#allocation4 + $0x24] sm:$0xf] }
  0xdb   :  { %1715 = vmatpush.bf16.msra.mxu2 %v5557_v22  ;;  %v5829_v22 = vor.u32 %v7560_v17, %v5828_v16  ;;  %v7577_v16 = vld [vmem:[#allocation4 + $0xa4] sm:$0xf]  ;;  %v5902_v17 = vld [vmem:[#allocation4 + $0xa8] sm:$0xf0] }
  0xdc   :  { %1701 = vmatpush.bf16.msra.mxu3 %v5429_v21  ;;  %1730 = vmatmul.bf16.vlgmr.msra.gmra.mxu0 %v8296_v42  ;;  %v5844_v42 = vld [vmem:[#allocation4 + $0x30] sm:$0xf]  ;;  %v1453_v21 = vpop.f32.mrf.mxu2 }
  0xdd   :  { %v5845_v63 = vor.u32 %v7564_v58, %v5844_v42  ;;  %v1425_v9 = vpop.f32.mrf.mxu0 }
  0xde   :  { %2166 = vmatpush.bf16.msrb.mxu1 %v5941_v29  ;;  %1716 = vmatmul.bf16.vlgmr.msra.gmra.mxu2 %v8294_v37  ;;  %v1396_v37 = vadd.f32 %v8320_v7, %v1382_v45  ;;  %v1426_v7 = vadd.f32 %v1425_v9, %v1412_v3  ;;  %v1439_v11 = vpop.f32.mrf.mxu1  ;;  %v8336_v33 = vpop.f32.mrf.mxu3  ;;  %v7585_v45 = vld [vmem:[#allocation4 + $0xe4] sm:$0xf]  ;;  %v5910_v3 = vld [vmem:[#allocation4 + $0xb8] sm:$0xf0] }
  0xdf   :  { %1702 = vmatmul.bf16.vlgmr.msra.gmra.mxu3 %v8258_v60  ;;  %v5916_v60 = vld [vmem:[#allocation4 + $0xc0] sm:$0xf] }
  0xe0   :  { %2152 = vmatpush.bf16.msrb.mxu3 %v5877_v23  ;;  %v5917_v59 = vor.u32 %v7582_v56, %v5916_v60  ;;  %v1410_v2 = vadd.f32 %v1409_v32, %v1396_v37  ;;  %v1440_v15 = vadd.f32 %v1439_v11, %v1426_v7  ;;  %v5892_v23 = vld [vmem:[#allocation4 + $0x90] sm:$0xf]  ;;  %v7574_v32 = vld [vmem:[#allocation4 + $0x84] sm:$0xf0]  ;;  %v7565_v60 = vld [vmem:[#allocation4 + $0x44] sm:$0xf] }
  0xe1   :  { %v5893_v26 = vor.u32 %v7576_v55, %v5892_v23  ;;  %v5885_v35 = vor.u32 %v7574_v32, %v5884_v31  ;;  %v5854_v56 = vld [vmem:[#allocation4 + $0x48] sm:$0xf0]  ;;  %v6004_v7 = vld [vmem:[#allocation4 + $0x170] sm:$0xf]  ;;  %v7604_v11 = vld [vmem:[#allocation4 + $0x174] sm:$0xf0] }
  0xe2   :  { %2167 = vmatpush.bf16.msrb.mxu1 %v5933_v40  ;;  %v1424_v10 = vadd.f32 %v1423_v51, %v1410_v2  ;;  %v1454_v24 = vadd.f32 %v1453_v21, %v1440_v15  ;;  %v5870_v40 = vld [vmem:[#allocation4 + $0x68] sm:$0xf0]  ;;  %v5865_v51 = vor.u32 %v7567_v47, %v5862_v48  ;;  %v5857_v58 = vor.u32 %v7565_v60, %v5854_v56  ;;  %v7579_v2 = vld [vmem:[#allocation4 + $0xb4] sm:$0xf]  ;;  %v5996_v23 = vld [vmem:[#allocation4 + $0x160] sm:$0xf] }
  0xe3   :  { %v5873_v44 = vor.u32 %v7569_v39, %v5870_v40  ;;  %v6005_v13 = vor.u32 %v7604_v11, %v6004_v7  ;;  %v5841_v15 = vor.u32 %v7561_v4, %v5838_v5  ;;  %v5905_v21 = vor.u32 %v7577_v16, %v5902_v17  ;;  %v7602_v55 = vld [vmem:[#allocation4 + $0x164] sm:$0xf0]  ;;  %v7573_v40 = vld [vmem:[#allocation4 + $0x84] sm:$0xf]  ;;  %v7596_v60 = vld [vmem:[#allocation4 + $0x134] sm:$0xf0] }
  0xe4   :  { %2153 = vmatpush.bf16.msrb.mxu3 %v5869_v8  ;;  %v1438_v20 = vadd.f32 %v1437_v52, %v1424_v10  ;;  %v1754_v8 = vmax.f32 %v1454_v24, 0.0  ;;  %v7583_v52 = vld [vmem:[#allocation4 + $0xd4] sm:$0xf]  ;;  %v1479_v57 = vpop.f32.mrf.mxu2  ;;  %v7598_v47 = vld [vmem:[#allocation4 + $0x144] sm:$0xf0] }
  0xe5   :  { %2180 = vmatpush.bf16.msrb.mxu2 %v6005_v13  ;;  %v5948_v11 = vld [vmem:[#allocation4 + $0x100] sm:$0xf]  ;;  %v7601_v17 = vld [vmem:[#allocation4 + $0x164] sm:$0xf] }
  0xe6   :  { %2168 = vmatpush.bf16.msrb.mxu1 %v5925_v49  ;;  %v1452_v29 = vadd.f32 %v1451_v61, %v1438_v20  ;;  %v5937_v49 = vor.u32 %v7585_v45, %v5934_v46  ;;  %v1467_v42 = vpop.f32.mrf.mxu3  ;;  %v7563_v61 = vld [vmem:[#allocation4 + $0x34] sm:$0xf]  ;;  %v5830_v20 = vld [vmem:[#allocation4 + $0x18] sm:$0xf0]  ;;  %v5980_v46 = vld [vmem:[#allocation4 + $0x140] sm:$0xf] }
  0xe8   :  { %2154 = vmatpush.bf16.msrb.mxu3 %v5861_v54  ;;  %v1750_v54 = vmax.f32 %v1452_v29, 0.0  ;;  %v7557_v29 = vld [vmem:[#allocation4 + $0x4] sm:$0xf] }
  0xe9   :  { %5817 = vmatmul.msk.bf16.vlgmr.msra.gmra.mxu1 %vm1354_vm0, %v8278_v50  ;;  %v7558_v50 = vld [vmem:[#allocation4 + $0x4] sm:$0xf0] }
  0xea   :  { %2169 = vmatpush.bf16.msrb.mxu1 %v5917_v59  ;;  %v5821_v30 = vor.u32 %v7558_v50, %v5820_v25  ;;  %v8338_v43 = vpack.c.bf16 %v1754_v8, %v1750_v54  ;;  %v7581_v59 = vld [vmem:[#allocation4 + $0xc4] sm:$0xf]  ;;  %v5997_v25 = vor.u32 %v7602_v55, %v5996_v23  ;;  %v5988_v8 = vld [vmem:[#allocation4 + $0x150] sm:$0xf]  ;;  %v7620_v23 = vld [vmem:[#allocation4 + $0x1f4] sm:$0xf0] }
  0xeb   :  { %v5921_v0 = vor.u32 %v7581_v59, %v5918_v62  ;;  %v5964_v62 = vld [vmem:[#allocation4 + $0x120] sm:$0xf] }
  0xec   :  { %2155 = vmatpush.bf16.msrb.mxu3 %v5853_v53  ;;  %v5926_v53 = vld [vmem:[#allocation4 + $0xd8] sm:$0xf0]  ;;  %v1481_v14 = vpop.f32.mrf.mxu2  ;;  %2181 = vmatpush.bf16.msrb.mxu2 %v5997_v25  ;;  %v7599_v25 = vld [vmem:[#allocation4 + $0x154] sm:$0xf] }
  0xed   :  { %v5929_v37 = vor.u32 %v7583_v52, %v5926_v53  ;;  %v5972_v53 = vld [vmem:[#allocation4 + $0x130] sm:$0xf] }
  0xee   :  { %2170 = vmatpush.bf16.msrb.mxu1 %v5909_v6  ;;  %v5913_v6 = vor.u32 %v7579_v2, %v5910_v3  ;;  %v7592_v2 = vld [vmem:[#allocation4 + $0x114] sm:$0xf0] }
  0xf0   :  { %2156 = vmatpush.bf16.msrb.mxu3 %v5845_v63  ;;  %v5846_v63 = vld [vmem:[#allocation4 + $0x38] sm:$0xf0] }
  0xf1   :  { %v5849_v1 = vor.u32 %v7563_v61, %v5846_v63  ;;  %v7594_v61 = vld [vmem:[#allocation4 + $0x124] sm:$0xf0] }
  0xf2   :  { %2171 = vmatpush.bf16.msrb.mxu1 %v5901_v19  ;;  %v7559_v19 = vld [vmem:[#allocation4 + $0x14] sm:$0xf] }
  0xf3   :  { %v5833_v50 = vor.u32 %v7559_v19, %v5830_v20  ;;  %v5998_v19 = vld [vmem:[#allocation4 + $0x168] sm:$0xf0] }
  0xf4   :  { %2157 = vmatpush.bf16.msrb.mxu3 %v5837_v12  ;;  %v332_v12 = vperm.slane %v8325_v18, 1 }
  0xf5   :  { %v1493_v9 = vpop.f32.mrf.mxu0 }
  0xf6   :  { %2172 = vmatpush.bf16.msrb.mxu1 %v5893_v26  ;;  %v1466_v24 = vadd.f32 %v8336_v33, %v332_v12  ;;  %v7575_v26 = vld [vmem:[#allocation4 + $0x94] sm:$0xf]  ;;  %v1468_v28 = vadd.f32 %v1467_v42, %v332_v12 }
  0xf7   :  { %v5897_v31 = vor.u32 %v7575_v26, %v5894_v27  ;;  %v6060_v27 = vld [vmem:[#allocation4 + $0x1e0] sm:$0xf] }
  0xf8   :  { %2158 = vmatpush.bf16.msrb.mxu3 %v5829_v22  ;;  %v1507_v22 = vpop.f32.mrf.mxu1  ;;  %v1482_v54 = vadd.f32 %v1481_v14, %v1468_v28  ;;  %v7603_v14 = vld [vmem:[#allocation4 + $0x174] sm:$0xf]  ;;  %v7618_v28 = vld [vmem:[#allocation4 + $0x1e4] sm:$0xf0] }
  0xfa   :  { %2173 = vmatpush.bf16.msrb.mxu1 %v5885_v35  ;;  %v1480_v35 = vadd.f32 %v1479_v57, %v1466_v24 }
  0xfc   :  { %2159 = vmatpush.bf16.msrb.mxu3 %v5821_v30  ;;  %v5822_v30 = vld [vmem:[#allocation4 + $0x8] sm:$0xf0] }
  0xfd   :  { %v1495_v38 = vpop.f32.mrf.mxu0  ;;  %v5825_v33 = vor.u32 %v7557_v29, %v5822_v30  ;;  %v6061_v29 = vor.u32 %v7618_v28, %v6060_v27  ;;  %v7597_v30 = vld [vmem:[#allocation4 + $0x144] sm:$0xf] }
  0xfe   :  { %2222 = vmatpush.bf16.msra.mxu1 %v5945_v41  ;;  %v1521_v10 = vpop.f32.mrf.mxu3  ;;  %v5886_v41 = vld [vmem:[#allocation4 + $0x88] sm:$0xf0]  ;;  %v1496_v48 = vadd.f32 %v1495_v38, %v1482_v54  ;;  %v6044_v54 = vld [vmem:[#allocation4 + $0x1c0] sm:$0xf] }
  0xff   :  { %2160 = vmatmul.bf16.vlgmr.msrb.gmra.mxu3 %v8338_v43  ;;  %v5889_v45 = vor.u32 %v7573_v40, %v5886_v41  ;;  %v333_v40 = vperm.slane %v8325_v18, 2 }
 0x100   :  { %2208 = vmatpush.bf16.msra.mxu3 %v5881_v34  ;;  %v7600_v34 = vld [vmem:[#allocation4 + $0x154] sm:$0xf0] }
 0x101   :  { %v5989_v36 = vor.u32 %v7600_v34, %v5988_v8  ;;  %v1535_v39 = vpop.f32.mrf.mxu2  ;;  %v6052_v8 = vld [vmem:[#allocation4 + $0x1d0] sm:$0xf]  ;;  %v7616_v34 = vld [vmem:[#allocation4 + $0x1d4] sm:$0xf0] }
 0x102   :  { %2223 = vmatpush.bf16.msra.mxu1 %v5937_v49  ;;  %v5981_v49 = vor.u32 %v7598_v47, %v5980_v46  ;;  %v7593_v47 = vld [vmem:[#allocation4 + $0x124] sm:$0xf] }
 0x103   :  { %2182 = vmatpush.bf16.msrb.mxu2 %v5989_v36  ;;  %v6053_v36 = vor.u32 %v7616_v34, %v6052_v8  ;;  %v6054_v8 = vld [vmem:[#allocation4 + $0x1d8] sm:$0xf0] }
 0x104   :  { %2209 = vmatpush.bf16.msra.mxu3 %v5873_v44  ;;  %v1494_v44 = vadd.f32 %v1493_v9, %v1480_v35 }
 0x106   :  { %2224 = vmatpush.bf16.msra.mxu1 %v5929_v37  ;;  %v1523_v32 = vpop.f32.mrf.mxu3  ;;  %v1508_v52 = vadd.f32 %v1507_v22, %v1494_v44  ;;  %v5973_v37 = vor.u32 %v7596_v60, %v5972_v53  ;;  %v6068_v22 = vld [vmem:[#allocation4 + $0x1f0] sm:$0xf]  ;;  %v7614_v44 = vld [vmem:[#allocation4 + $0x1c4] sm:$0xf0]  ;;  %v7612_v53 = vld [vmem:[#allocation4 + $0x1b4] sm:$0xf0] }
 0x107   :  { %2183 = vmatpush.bf16.msrb.mxu2 %v5981_v49  ;;  %v6069_v55 = vor.u32 %v7620_v23, %v6068_v22  ;;  %v6045_v46 = vor.u32 %v7614_v44, %v6044_v54  ;;  %v6070_v22 = vld [vmem:[#allocation4 + $0x1f8] sm:$0xf0] }
 0x108   :  { %2210 = vmatpush.bf16.msra.mxu3 %v5865_v51  ;;  %v1509_v51 = vpop.f32.mrf.mxu1  ;;  %v1522_v57 = vadd.f32 %v1521_v10, %v1508_v52  ;;  %v6036_v52 = vld [vmem:[#allocation4 + $0x1b0] sm:$0xf] }
 0x109   :  { %v1510_v42 = vadd.f32 %v1509_v51, %v1496_v48  ;;  %v1537_v59 = vpop.f32.mrf.mxu2  ;;  %2194 = vmatpush.bf16.msrb.mxu0 %v6069_v55  ;;  %v5966_v48 = vld [vmem:[#allocation4 + $0x128] sm:$0xf0]  ;;  %v6037_v60 = vor.u32 %v7612_v53, %v6036_v52 }
 0x10a   :  { %2225 = vmatpush.bf16.msra.mxu1 %v5921_v0  ;;  %v1536_v63 = vadd.f32 %v1535_v39, %v1522_v57  ;;  %v5965_v0 = vor.u32 %v7594_v61, %v5964_v62  ;;  %v7595_v39 = vld [vmem:[#allocation4 + $0x134] sm:$0xf]  ;;  %v5969_v51 = vor.u32 %v7593_v47, %v5966_v48  ;;  %v6038_v47 = vld [vmem:[#allocation4 + $0x1b8] sm:$0xf0] }
 0x10b   :  { %2184 = vmatpush.bf16.msrb.mxu2 %v5973_v37 }
 0x10c   :  { %2211 = vmatpush.bf16.msra.mxu3 %v5857_v58  ;;  %v1524_v58 = vadd.f32 %v1523_v32, %v1510_v42  ;;  %v7591_v42 = vld [vmem:[#allocation4 + $0x114] sm:$0xf] }
 0x10d   :  { %2195 = vmatpush.bf16.msrb.mxu0 %v6061_v29 }
 0x10e   :  { %2226 = vmatpush.bf16.msra.mxu1 %v5913_v6  ;;  %v1549_v56 = vpop.f32.mrf.mxu3  ;;  %v1538_v3 = vadd.f32 %v1537_v59, %v1524_v58  ;;  %v5958_v58 = vld [vmem:[#allocation4 + $0x118] sm:$0xf0] }
 0x10f   :  { %v1550_v4 = vadd.f32 %v1549_v56, %v1536_v63  ;;  %2185 = vmatpush.bf16.msrb.mxu2 %v5965_v0  ;;  %v5961_v61 = vor.u32 %v7591_v42, %v5958_v58  ;;  %v6028_v63 = vld [vmem:[#allocation4 + $0x1a0] sm:$0xf]  ;;  %v7610_v0 = vld [vmem:[#allocation4 + $0x1a4] sm:$0xf0]  ;;  %v7607_v42 = vld [vmem:[#allocation4 + $0x194] sm:$0xf] }
 0x110   :  { %2212 = vmatpush.bf16.msra.mxu3 %v5849_v1  ;;  %v5956_v1 = vld [vmem:[#allocation4 + $0x110] sm:$0xf]  ;;  %v6022_v58 = vld [vmem:[#allocation4 + $0x198] sm:$0xf0] }
 0x111   :  { %v5957_v5 = vor.u32 %v7592_v2, %v5956_v1  ;;  %v1751_v7 = vmax.f32 %v1550_v4, 0.0  ;;  %2196 = vmatpush.bf16.msrb.mxu0 %v6053_v36  ;;  %v6029_v2 = vor.u32 %v7610_v0, %v6028_v63  ;;  %v5950_v4 = vld [vmem:[#allocation4 + $0x108] sm:$0xf0] }
 0x112   :  { %2227 = vmatpush.bf16.msra.mxu1 %v5905_v21  ;;  %v6001_v21 = vor.u32 %v7601_v17, %v5998_v19 }
 0x113   :  { %2186 = vmatpush.bf16.msrb.mxu2 %v5957_v5 }
 0x114   :  { %2213 = vmatpush.bf16.msra.mxu3 %v5841_v15  ;;  %v6006_v15 = vld [vmem:[#allocation4 + $0x178] sm:$0xf0] }
 0x115   :  { %v6009_v16 = vor.u32 %v7603_v14, %v6006_v15  ;;  %v1591_v20 = vpop.f32.mrf.mxu0  ;;  %2197 = vmatpush.bf16.msrb.mxu0 %v6045_v46  ;;  %v6012_v15 = vld [vmem:[#allocation4 + $0x180] sm:$0xf]  ;;  %v7611_v46 = vld [vmem:[#allocation4 + $0x1b4] sm:$0xf] }
 0x116   :  { %2228 = vmatpush.bf16.msra.mxu1 %v5897_v31  ;;  %v1551_v6 = vpop.f32.mrf.mxu3  ;;  %v1563_v24 = vpop.f32.mrf.mxu1  ;;  %v5982_v31 = vld [vmem:[#allocation4 + $0x148] sm:$0xf0]  ;;  %v6041_v48 = vor.u32 %v7611_v46, %v6038_v47  ;;  %v6196_v46 = vld [vmem:[#allocation6 + $0x70] sm:$0xf]  ;;  %v7652_v47 = vld [vmem:[#allocation6 + $0x74] sm:$0xf0] }
 0x117   :  { %v1552_v9 = vadd.f32 %v1551_v6, %v1538_v3  ;;  %v5985_v32 = vor.u32 %v7597_v30, %v5982_v31  ;;  %v1564_v49 = vadd.f32 %v1563_v24, %v333_v40  ;;  %v7589_v3 = vld [vmem:[#allocation4 + $0x104] sm:$0xf] }
 0x118   :  { %2214 = vmatpush.bf16.msra.mxu3 %v5833_v50  ;;  %v5990_v50 = vld [vmem:[#allocation4 + $0x158] sm:$0xf0] }
 0x119   :  { %v1755_v10 = vmax.f32 %v1552_v9, 0.0  ;;  %v5993_v26 = vor.u32 %v7599_v25, %v5990_v50  ;;  %2198 = vmatpush.bf16.msrb.mxu0 %v6037_v60  ;;  %v5953_v9 = vor.u32 %v7589_v3, %v5950_v4  ;;  %v7617_v50 = vld [vmem:[#allocation4 + $0x1e4] sm:$0xf] }
 0x11a   :  { %2229 = vmatpush.bf16.msra.mxu1 %v5889_v45 }
 0x11b   :  { %v1759_v12 = vpack.c.bf16 %v1755_v10, %v1751_v7  ;;  %v6020_v7 = vld [vmem:[#allocation4 + $0x190] sm:$0xf]  ;;  %v7608_v10 = vld [vmem:[#allocation4 + $0x194] sm:$0xf0] }
 0x11c   :  { %2215 = vmatpush.bf16.msra.mxu3 %v5825_v33  ;;  %v5974_v33 = vld [vmem:[#allocation4 + $0x138] sm:$0xf0] }
 0x11d   :  { %2174 = vmatmul.bf16.vlgmr.msrb.gmra.mxu1 %v1759_v12  ;;  %v1593_v38 = vpop.f32.mrf.mxu0  ;;  %v5977_v41 = vor.u32 %v7595_v39, %v5974_v33  ;;  %2199 = vmatpush.bf16.msrb.mxu0 %v6029_v2 }
 0x11e   :  { %v1565_v45 = vpop.f32.mrf.mxu1 }
 0x11f   :  { %2216 = vmatmul.bf16.vlgmr.msra.gmra.mxu3 %v8338_v43  ;;  %v7590_v43 = vld [vmem:[#allocation4 + $0x104] sm:$0xf0]  ;;  %v1566_v62 = vadd.f32 %v1565_v45, %v333_v40  ;;  %v7613_v40 = vld [vmem:[#allocation4 + $0x1c4] sm:$0xf]  ;;  %v334_v45 = vperm.slane %v8325_v18, 3 }
 0x120   :  { %v5949_v13 = vor.u32 %v7590_v43, %v5948_v11  ;;  %v6021_v11 = vor.u32 %v7608_v10, %v6020_v7  ;;  %v6014_v18 = vld [vmem:[#allocation4 + $0x188] sm:$0xf0] }
 0x121   :  { %v1605_v37 = vpop.f32.mrf.mxu2 }
 0x122   :  { %2187 = vmatpush.bf16.msrb.mxu2 %v5949_v13  ;;  %v1577_v35 = vpop.f32.mrf.mxu3  ;;  %2200 = vmatpush.bf16.msrb.mxu0 %v6021_v11 }
 0x123   :  { %v1578_v59 = vadd.f32 %v1577_v35, %v1564_v49  ;;  %v7609_v49 = vld [vmem:[#allocation4 + $0x1a4] sm:$0xf] }
 0x125   :  { %v1647_v56 = vpop.f32.mrf.mxu0  ;;  %v1592_v5 = vadd.f32 %v1591_v20, %v1578_v59  ;;  %v6025_v59 = vor.u32 %v7607_v42, %v6022_v58  ;;  %v7649_v42 = vld [vmem:[#allocation6 + $0x64] sm:$0xf]  ;;  %v6190_v58 = vld [vmem:[#allocation6 + $0x68] sm:$0xf0] }
 0x126   :  { %2236 = vmatpush.bf16.msra.mxu2 %v6009_v16  ;;  %v7606_v16 = vld [vmem:[#allocation4 + $0x184] sm:$0xf0] }
 0x127   :  { %v6013_v19 = vor.u32 %v7606_v16, %v6012_v15 }
 0x129   :  { %v1607_v17 = vpop.f32.mrf.mxu2  ;;  %2201 = vmatpush.bf16.msrb.mxu0 %v6013_v19 }
 0x12a   :  { %2237 = vmatpush.bf16.msra.mxu2 %v6001_v21  ;;  %v1579_v57 = vpop.f32.mrf.mxu3  ;;  %v7619_v21 = vld [vmem:[#allocation4 + $0x1f4] sm:$0xf] }
 0x12b   :  { %v1580_v6 = vadd.f32 %v1579_v57, %v1566_v62  ;;  %v6073_v55 = vor.u32 %v7619_v21, %v6070_v22  ;;  %v7605_v62 = vld [vmem:[#allocation4 + $0x184] sm:$0xf] }
 0x12d   :  { %2230 = vmatmul.bf16.vlgmr.msra.gmra.mxu1 %v1759_v12  ;;  %v1606_v12 = vadd.f32 %v1605_v37, %v1592_v5  ;;  %v1594_v13 = vadd.f32 %v1593_v38, %v1580_v6  ;;  %v1649_v14 = vpop.f32.mrf.mxu0  ;;  %2250 = vmatpush.bf16.msra.mxu0 %v6073_v55 }
 0x12e   :  { %2238 = vmatpush.bf16.msra.mxu2 %v5993_v26  ;;  %v6062_v26 = vld [vmem:[#allocation4 + $0x1e8] sm:$0xf0] }
 0x12f   :  { %v1608_v24 = vadd.f32 %v1607_v17, %v1594_v13  ;;  %v6065_v28 = vor.u32 %v7617_v50, %v6062_v26  ;;  %v7625_v50 = vld [vmem:[%s8501_s5 + $0x20] sm:$0xff]  ;;  %v7624_v26 = vld [vmem:[%s8501_s5 + $0x18] sm:$0xff] }
 0x131   :  { %2251 = vmatpush.bf16.msra.mxu0 %v6065_v28  ;;  %v7623_v28 = vld [vmem:[%s8501_s5 + $0x10] sm:$0xff] }
 0x132   :  { %2239 = vmatpush.bf16.msra.mxu2 %v5985_v32  ;;  %v7615_v32 = vld [vmem:[#allocation4 + $0x1d4] sm:$0xf] }
 0x133   :  { %v6057_v36 = vor.u32 %v7615_v32, %v6054_v8  ;;  %v7621_v32 = vld [vmem:[%s8501_s5] sm:$0xff] }
 0x134   :  { %v7633_v8 = vld [vmem:[%s8501_s5 + $0x60] sm:$0xff] }
 0x135   :  { %2252 = vmatpush.bf16.msra.mxu0 %v6057_v36 }
 0x136   :  { %2240 = vmatpush.bf16.msra.mxu2 %v5977_v41  ;;  %v1619_v1 = vpop.f32.mrf.mxu1  ;;  %v6046_v41 = vld [vmem:[#allocation4 + $0x1c8] sm:$0xf0] }
 0x137   :  { %v1620_v23 = vadd.f32 %v1619_v1, %v1606_v12  ;;  %v6049_v44 = vor.u32 %v7613_v40, %v6046_v41  ;;  %v6017_v1 = vor.u32 %v7605_v62, %v6014_v18  ;;  %v1826_v40 = vld [vmem:[%s8500_s4] sm:$0x3] }
 0x138   :  { %v7629_v41 = vld [vmem:[%s8501_s5 + $0x40] sm:$0xff] }
 0x139   :  { %v1675_v35 = vpop.f32.mrf.mxu0  ;;  %2253 = vmatpush.bf16.msra.mxu0 %v6049_v44 }
 0x13a   :  { %2241 = vmatpush.bf16.msra.mxu2 %v5969_v51  ;;  %v6030_v51 = vld [vmem:[#allocation4 + $0x1a8] sm:$0xf0] }
 0x13d   :  { %2254 = vmatpush.bf16.msra.mxu0 %v6041_v48  ;;  %v7651_v48 = vld [vmem:[#allocation6 + $0x74] sm:$0xf] }
 0x13e   :  { %2242 = vmatpush.bf16.msra.mxu2 %v5961_v61  ;;  %v1621_v20 = vpop.f32.mrf.mxu1 }
 0x13f   :  { %v1622_v27 = vadd.f32 %v1621_v20, %v1608_v24  ;;  %v7628_v20 = vld [vmem:[%s8501_s5 + $0x38] sm:$0xff]  ;;  %v7627_v24 = vld [vmem:[%s8501_s5 + $0x30] sm:$0xff] }
 0x140   :  { %2402 = vmatpush.bf16.msrb.mxu3 %v7628_v20 }
 0x141   :  { %v1661_v38 = vpop.f32.mrf.mxu2  ;;  %v1677_v60 = vpop.f32.mrf.mxu0 }
 0x142   :  { %2243 = vmatpush.bf16.msra.mxu2 %v5953_v9  ;;  %v1633_v43 = vpop.f32.mrf.mxu3  ;;  %v1662_v53 = vadd.f32 %v1661_v38, %v334_v45 }
 0x143   :  { %v1634_v25 = vadd.f32 %v1633_v43, %v1620_v23 }
 0x144   :  { %v1676_v57 = vadd.f32 %v1675_v35, %v1662_v53  ;;  %2403 = vmatpush.bf16.msrb.mxu3 %v7627_v24  ;;  %v7631_v35 = vld [vmem:[%s8501_s5 + $0x50] sm:$0xff]  ;;  %v6198_v53 = vld [vmem:[#allocation6 + $0x78] sm:$0xf0] }
 0x145   :  { %v1648_v30 = vadd.f32 %v1647_v56, %v1634_v25  ;;  %v6033_v56 = vor.u32 %v7609_v49, %v6030_v51  ;;  %v7626_v25 = vld [vmem:[%s8501_s5 + $0x28] sm:$0xff] }
 0x147   :  { %v1752_v39 = vmax.f32 %v1648_v30, 0.0  ;;  %2255 = vmatpush.bf16.msra.mxu0 %v6033_v56  ;;  %v7622_v30 = vld [vmem:[%s8501_s5 + $0x8] sm:$0xff] }
 0x148   :  { %2404 = vmatpush.bf16.msrb.mxu3 %v7626_v25  ;;  %v7650_v56 = vld [vmem:[#allocation6 + $0x64] sm:$0xf0] }
 0x149   :  { %v1663_v37 = vpop.f32.mrf.mxu2 }
 0x14a   :  { %v1635_v29 = vpop.f32.mrf.mxu3  ;;  %v1664_v2 = vadd.f32 %v1663_v37, %v334_v45 }
 0x14b   :  { %v1636_v31 = vadd.f32 %v1635_v29, %v1622_v27  ;;  %2256 = vmatpush.bf16.msra.mxu0 %v6025_v59  ;;  %v7636_v27 = vld [vmem:[%s8501_s5 + $0x78] sm:$0xff]  ;;  %v7635_v29 = vld [vmem:[%s8501_s5 + $0x70] sm:$0xff] }
 0x14c   :  { %v1678_v6 = vadd.f32 %v1677_v60, %v1664_v2  ;;  %2405 = vmatpush.bf16.msrb.mxu3 %v7625_v50  ;;  %2416 = vmatpush.bf16.msrb.mxu1 %v7636_v27  ;;  %v6188_v60 = vld [vmem:[#allocation6 + $0x60] sm:$0xf]  ;;  %v6180_v27 = vld [vmem:[#allocation6 + $0x50] sm:$0xf] }
 0x14d   :  { %v1650_v34 = vadd.f32 %v1649_v14, %v1636_v31  ;;  %v7634_v31 = vld [vmem:[%s8501_s5 + $0x68] sm:$0xff]  ;;  %v6189_v59 = vor.u32 %v7650_v56, %v6188_v60  ;;  %v7640_v60 = vld [vmem:[#allocation6 + $0x14] sm:$0xf0]  ;;  %v7639_v56 = vld [vmem:[#allocation6 + $0x14] sm:$0xf] }
 0x14f   :  { %v1756_v33 = vmax.f32 %v1650_v34, 0.0  ;;  %2257 = vmatpush.bf16.msra.mxu0 %v6017_v1  ;;  %v7632_v34 = vld [vmem:[%s8501_s5 + $0x58] sm:$0xff] }
 0x150   :  { %2406 = vmatpush.bf16.msrb.mxu3 %v7624_v26  ;;  %2417 = vmatpush.bf16.msrb.mxu1 %v7635_v29  ;;  %v7647_v29 = vld [vmem:[#allocation6 + $0x54] sm:$0xf] }
 0x151   :  { %v1760_v54 = vpack.c.bf16 %v1756_v33, %v1752_v39  ;;  %v7630_v33 = vld [vmem:[%s8501_s5 + $0x48] sm:$0xff] }
 0x153   :  { %2188 = vmatmul.bf16.vlgmr.msrb.gmra.mxu2 %v1760_v54 }
 0x154   :  { %2407 = vmatpush.bf16.msrb.mxu3 %v7623_v28  ;;  %2418 = vmatpush.bf16.msrb.mxu1 %v7634_v31  ;;  %v7648_v28 = vld [vmem:[#allocation6 + $0x54] sm:$0xf0]  ;;  %v6182_v31 = vld [vmem:[#allocation6 + $0x58] sm:$0xf0] }
 0x156   :  { %v1689_v52 = vpop.f32.mrf.mxu1 }
 0x157   :  { %v1690_v63 = vadd.f32 %v1689_v52, %v1676_v57  ;;  %v6197_v52 = vor.u32 %v7652_v47, %v6196_v46  ;;  %v6201_v57 = vor.u32 %v7651_v48, %v6198_v53  ;;  %v6156_v46 = vld [vmem:[#allocation6 + $0x20] sm:$0xf]  ;;  %v7642_v47 = vld [vmem:[#allocation6 + $0x24] sm:$0xf0]  ;;  %v7641_v48 = vld [vmem:[#allocation6 + $0x24] sm:$0xf] }
 0x158   :  { %2408 = vmatpush.bf16.msrb.mxu3 %v7622_v30  ;;  %2419 = vmatpush.bf16.msrb.mxu1 %v7633_v8  ;;  %v6181_v30 = vor.u32 %v7648_v28, %v6180_v27  ;;  %v7646_v8 = vld [vmem:[#allocation6 + $0x44] sm:$0xf0]  ;;  %v6148_v53 = vld [vmem:[#allocation6 + $0x10] sm:$0xf]  ;;  %v6396_v28 = vld [vmem:[#allocation7 + $0x180] sm:$0xf] }
 0x159   :  { %v1731_v4 = vpop.f32.mrf.mxu0  ;;  %2537 = vmatpush.bf16.msrb.mxu2 %v6197_v52 }
 0x15c   :  { %2409 = vmatpush.bf16.msrb.mxu3 %v7621_v32  ;;  %2420 = vmatpush.bf16.msrb.mxu1 %v7632_v34  ;;  %v6172_v32 = vld [vmem:[#allocation6 + $0x40] sm:$0xf]  ;;  %v6185_v34 = vor.u32 %v7647_v29, %v6182_v31  ;;  %v7703_v29 = vld [vmem:[#allocation7 + $0x18c] sm:$0xf0] }
 0x15d   :  { %2538 = vmatpush.bf16.msrb.mxu2 %v6189_v59  ;;  %v7638_v59 = vld [vmem:[#allocation6 + $0x4] sm:$0xf0]  ;;  %v6284_v31 = vld [vmem:[#allocation7 + $0xa0] sm:$0xf] }
 0x15e   :  { %v1691_v61 = vpop.f32.mrf.mxu1 }
 0x15f   :  { %v1692_v7 = vadd.f32 %v1691_v61, %v1678_v6  ;;  %v6193_v61 = vor.u32 %v7649_v42, %v6190_v58  ;;  %v6140_v58 = vld [vmem:[#allocation6] sm:$0xf] }
 0x160   :  { %2421 = vmatpush.bf16.msrb.mxu1 %v7631_v35  ;;  %v7645_v35 = vld [vmem:[#allocation6 + $0x44] sm:$0xf] }
 0x161   :  { %v1717_v3 = vpop.f32.mrf.mxu2  ;;  %v1733_v15 = vpop.f32.mrf.mxu0  ;;  %2539 = vmatpush.bf16.msrb.mxu2 %v6181_v30 }
 0x162   :  { %v1703_v0 = vpop.f32.mrf.mxu3 }
 0x163   :  { %v1704_v5 = vadd.f32 %v1703_v0, %v1690_v63  ;;  %2244 = vmatmul.bf16.vlgmr.msra.gmra.mxu2 %v1760_v54  ;;  %v1828_v54 = vperm.slane %v1826_v40, 0 }
 0x164   :  { %2422 = vmatpush.bf16.msrb.mxu1 %v7630_v33  ;;  %v6164_v33 = vld [vmem:[#allocation6 + $0x30] sm:$0xf] }
 0x165   :  { %v1718_v9 = vadd.f32 %v1717_v3, %v1704_v5 }
 0x166   :  { %v1745_v10 = vpop.f32.mrf.mxu1 }
 0x167   :  { %v1732_v12 = vadd.f32 %v1731_v4, %v1718_v9 }
 0x168   :  { %2423 = vmatpush.bf16.msrb.mxu1 %v7629_v41  ;;  %v7643_v41 = vld [vmem:[#allocation6 + $0x34] sm:$0xf] }
 0x169   :  { %v1719_v13 = vpop.f32.mrf.mxu2  ;;  %v1746_v17 = vadd.f32 %v1745_v10, %v1732_v12 }
 0x16a   :  { %v1705_v11 = vpop.f32.mrf.mxu3 }
 0x16b   :  { %v1706_v43 = vadd.f32 %v1705_v11, %v1692_v7  ;;  %v1753_v22 = vmax.f32 %v1746_v17, 0.0  ;;  %v1829_v11 = vperm.slane %v1826_v40, 1  ;;  %v7644_v40 = vld [vmem:[#allocation6 + $0x34] sm:$0xf0] }
 0x16d   :  { %v1720_v14 = vadd.f32 %v1719_v13, %v1706_v43 }
 0x16e   :  { %v1747_v19 = vpop.f32.mrf.mxu1 }
 0x16f   :  { %v1734_v16 = vadd.f32 %v1733_v15, %v1720_v14 }
 0x171   :  { %v1748_v21 = vadd.f32 %v1747_v19, %v1734_v16 }
 0x173   :  { %v1757_v23 = vmax.f32 %v1748_v21, 0.0 }
 0x175   :  { %v1761_v55 = vpack.c.bf16 %v1757_v23, %v1753_v22 }
 0x177   :  { %2202 = vmatmul.bf16.vlgmr.msrb.gmra.mxu0 %v1761_v55 }
 0x178   :  { %2551 = vmatpush.bf16.msrb.mxu0 %v6201_v57  ;;  %v6150_v57 = vld [vmem:[#allocation6 + $0x18] sm:$0xf0] }
 0x179   :  { %v6153_v42 = vor.u32 %v7639_v56, %v6150_v57  ;;  %v6252_v56 = vld [vmem:[#allocation7 + $0x60] sm:$0xf]  ;;  %v7667_v57 = vld [vmem:[#allocation7 + $0x6c] sm:$0xf0] }
 0x17c   :  { %2552 = vmatpush.bf16.msrb.mxu0 %v6193_v61  ;;  %v6142_v61 = vld [vmem:[#allocation6 + $0x8] sm:$0xf0] }
 0x180   :  { %2553 = vmatpush.bf16.msrb.mxu0 %v6185_v34  ;;  %v7701_v34 = vld [vmem:[#allocation7 + $0x184] sm:$0xf] }
 0x182   :  { %v2161_v36 = vpop.f32.mrf.mxu3 }
 0x183   :  { %v2162_v37 = vadd.f32 %v2161_v36, %v1828_v54  ;;  %v6174_v36 = vld [vmem:[#allocation6 + $0x48] sm:$0xf0] }
 0x187   :  { %2258 = vmatmul.bf16.vlgmr.msra.gmra.mxu0 %v1761_v55 }
 0x18a   :  { %v2163_v44 = vpop.f32.mrf.mxu3 }
 0x18b   :  { %v2164_v62 = vadd.f32 %v2163_v44, %v1828_v54  ;;  %v6165_v54 = vor.u32 %v7644_v40, %v6164_v33  ;;  %v6166_v44 = vld [vmem:[#allocation6 + $0x38] sm:$0xf0]  ;;  %v6268_v33 = vld [vmem:[#allocation7 + $0x80] sm:$0xf] }
 0x19a   :  { %v2175_v38 = vpop.f32.mrf.mxu1 }
 0x19b   :  { %v2176_v18 = vadd.f32 %v2175_v38, %v2162_v37  ;;  %v6173_v38 = vor.u32 %v7646_v8, %v6172_v32  ;;  %v6149_v37 = vor.u32 %v7640_v60, %v6148_v53  ;;  %v7675_v32 = vld [vmem:[#allocation7 + $0xac] sm:$0xf0]  ;;  %v7673_v8 = vld [vmem:[#allocation7 + $0xa4] sm:$0xf] }
 0x19d   :  { %2540 = vmatpush.bf16.msrb.mxu2 %v6173_v38  ;;  %v6285_v38 = vor.u32 %v7675_v32, %v6284_v31  ;;  %v6452_v31 = vld [vmem:[#allocation7 + $0x1e8] sm:$0xf]  ;;  %v7716_v32 = vld [vmem:[#allocation7 + $0x1f4] sm:$0xf0] }
 0x1a1   :  { %2541 = vmatpush.bf16.msrb.mxu2 %v6165_v54  ;;  %v7671_v54 = vld [vmem:[#allocation7 + $0x8c] sm:$0xf0] }
 0x1a2   :  { %v2177_v45 = vpop.f32.mrf.mxu1  ;;  %v2217_v1 = vpop.f32.mrf.mxu3  ;;  %v6269_v53 = vor.u32 %v7671_v54, %v6268_v33 }
 0x1a3   :  { %v2178_v63 = vadd.f32 %v2177_v45, %v2164_v62  ;;  %v2218_v14 = vadd.f32 %v2217_v1, %v1829_v11  ;;  %v6169_v45 = vor.u32 %v7643_v41, %v6166_v44  ;;  %v7637_v62 = vld [vmem:[#allocation6 + $0x4] sm:$0xf]  ;;  %v7715_v1 = vld [vmem:[#allocation7 + $0x1ec] sm:$0xf0]  ;;  %v6397_v41 = vor.u32 %v7703_v29, %v6396_v28 }
 0x1a4   :  { %v7669_v44 = vld [vmem:[#allocation7 + $0x84] sm:$0xf] }
 0x1aa   :  { %v2231_v4 = vpop.f32.mrf.mxu1  ;;  %v2219_v12 = vpop.f32.mrf.mxu3 }
 0x1ab   :  { %v2220_v16 = vadd.f32 %v2219_v12, %v1829_v11  ;;  %v2232_v17 = vadd.f32 %v2231_v4, %v2218_v14  ;;  %v6446_v4 = vld [vmem:[#allocation7 + $0x1f0] sm:$0xf0]  ;;  %v6316_v11 = vld [vmem:[#allocation7 + $0xe0] sm:$0xf]  ;;  %v7683_v12 = vld [vmem:[#allocation7 + $0xec] sm:$0xf0] }
 0x1ac   :  { %v6318_v14 = vld [vmem:[#allocation7 + $0xf0] sm:$0xf0] }
 0x1b2   :  { %v2233_v15 = vpop.f32.mrf.mxu1 }
 0x1b3   :  { %v2234_v21 = vadd.f32 %v2233_v15, %v2220_v16  ;;  %v6317_v16 = vor.u32 %v7683_v12, %v6316_v11  ;;  %v6348_v12 = vld [vmem:[#allocation7 + $0x120] sm:$0xf] }
 0x1b5   :  { %2965 = vmatpush.bf16.msra.mxu3 %v6317_v16  ;;  %v6350_v16 = vld [vmem:[#allocation7 + $0x130] sm:$0xf0] }
 0x1d6   :  { %v2189_v39 = vpop.f32.mrf.mxu2 }
 0x1d7   :  { %v2190_v0 = vadd.f32 %v2189_v39, %v2176_v18  ;;  %v6177_v39 = vor.u32 %v7645_v35, %v6174_v36  ;;  %v6141_v18 = vor.u32 %v7638_v59, %v6140_v58  ;;  %v6398_v35 = vld [vmem:[#allocation7 + $0x190] sm:$0xf0] }
 0x1d8   :  { %v6286_v36 = vld [vmem:[#allocation7 + $0xb0] sm:$0xf0] }
 0x1d9   :  { %2554 = vmatpush.bf16.msrb.mxu0 %v6177_v39  ;;  %v6289_v39 = vor.u32 %v7673_v8, %v6286_v36  ;;  %v6254_v58 = vld [vmem:[#allocation7 + $0x70] sm:$0xf0]  ;;  %v7714_v8 = vld [vmem:[#allocation7 + $0x1ec] sm:$0xf]  ;;  %v6220_v36 = vld [vmem:[#allocation7 + $0x20] sm:$0xf] }
 0x1dd   :  { %2555 = vmatpush.bf16.msrb.mxu0 %v6169_v45  ;;  %v6270_v45 = vld [vmem:[#allocation7 + $0x90] sm:$0xf0] }
 0x1de   :  { %v2191_v49 = vpop.f32.mrf.mxu2  ;;  %v6273_v60 = vor.u32 %v7669_v44, %v6270_v45  ;;  %v6436_v44 = vld [vmem:[#allocation7 + $0x1c8] sm:$0xf]  ;;  %v7712_v45 = vld [vmem:[#allocation7 + $0x1d4] sm:$0xf0] }
 0x1df   :  { %v2192_v2 = vadd.f32 %v2191_v49, %v2178_v63  ;;  %v6157_v49 = vor.u32 %v7642_v47, %v6156_v46  ;;  %v6145_v63 = vor.u32 %v7637_v62, %v6142_v61  ;;  %v7952_v46 = vld [vmem:[%s8502_s6] ss:$0 sm:$0xff]  ;;  %v6401_v47 = vor.u32 %v7701_v34, %v6398_v35  ;;  %v7695_v61 = vld [vmem:[#allocation7 + $0x14c] sm:$0xf0]  ;;  %v6454_v35 = vld [vmem:[#allocation7 + $0x1f8] sm:$0xf0] }
 0x1e0   :  { %v6453_v34 = vor.u32 %v7716_v32, %v6452_v31  ;;  %v6278_v31 = vld [vmem:[#allocation7 + $0x98] sm:$0xf0] }
 0x1e1   :  { %2542 = vmatpush.bf16.msrb.mxu2 %v6157_v49  ;;  %v7699_v49 = vld [vmem:[#allocation7 + $0x16c] sm:$0xf0] }
 0x1e5   :  { %2543 = vmatpush.bf16.msrb.mxu2 %v6149_v37 }
 0x1e6   :  { %v2245_v9 = vpop.f32.mrf.mxu2 }
 0x1e7   :  { %v2246_v22 = vadd.f32 %v2245_v9, %v2232_v17 }
 0x1e9   :  { %2544 = vmatpush.bf16.msrb.mxu2 %v6141_v18  ;;  %v6364_v18 = vld [vmem:[#allocation7 + $0x140] sm:$0xf] }
 0x1ee   :  { %v2247_v19 = vpop.f32.mrf.mxu2 }
 0x1ef   :  { %v2248_v23 = vadd.f32 %v2247_v19, %v2234_v21  ;;  %v6412_v19 = vld [vmem:[#allocation7 + $0x1a0] sm:$0xf]  ;;  %v7707_v21 = vld [vmem:[#allocation7 + $0x1ac] sm:$0xf0] }
 0x1f4   :  { %v2203_v51 = vpop.f32.mrf.mxu0 }
 0x1f5   :  { %v2204_v3 = vadd.f32 %v2203_v51, %v2190_v0  ;;  %v6158_v51 = vld [vmem:[#allocation6 + $0x28] sm:$0xf0]  ;;  %v6444_v0 = vld [vmem:[#allocation7 + $0x1e0] sm:$0xf] }
 0x1f6   :  { %v6161_v52 = vor.u32 %v7641_v48, %v6158_v51  ;;  %v6380_v48 = vld [vmem:[#allocation7 + $0x160] sm:$0xf]  ;;  %v7697_v51 = vld [vmem:[#allocation7 + $0x164] sm:$0xf] }
 0x1f7   :  { %v2264_v7 = vmax.f32 %v2204_v3, 0.0  ;;  %v6445_v3 = vor.u32 %v7715_v1, %v6444_v0  ;;  %v6381_v37 = vor.u32 %v7699_v49, %v6380_v48  ;;  %v7693_v0 = vld [vmem:[#allocation7 + $0x144] sm:$0xf]  ;;  %v6366_v1 = vld [vmem:[#allocation7 + $0x150] sm:$0xf0] }
 0x1f8   :  { %2556 = vmatpush.bf16.msrb.mxu0 %v6161_v52  ;;  %v6382_v52 = vld [vmem:[#allocation7 + $0x170] sm:$0xf0]  ;;  %v6438_v48 = vld [vmem:[#allocation7 + $0x1d8] sm:$0xf0]  ;;  %v6204_v49 = vld [vmem:[#allocation7] sm:$0xf] }
 0x1f9   :  { %2979 = vmatpush.bf16.msra.mxu1 %v6445_v3  ;;  %v6385_v62 = vor.u32 %v7697_v51, %v6382_v52  ;;  %v6253_v3 = vor.u32 %v7667_v57, %v6252_v56  ;;  %v7655_v51 = vld [vmem:[#allocation7 + $0xc] sm:$0xf0]  ;;  %v6206_v56 = vld [vmem:[#allocation7 + $0x10] sm:$0xf0]  ;;  %v6324_v57 = vld [vmem:[#allocation7 + $0xe8] sm:$0xf] }
 0x1fc   :  { %v2205_v5 = vpop.f32.mrf.mxu0  ;;  %2557 = vmatpush.bf16.msrb.mxu0 %v6153_v42  ;;  %v7665_v42 = vld [vmem:[#allocation7 + $0x64] sm:$0xf] }
 0x1fd   :  { %v2206_v6 = vadd.f32 %v2205_v5, %v2192_v2  ;;  %v7713_v2 = vld [vmem:[#allocation7 + $0x1e4] sm:$0xf]  ;;  %v6428_v5 = vld [vmem:[#allocation7 + $0x1c0] sm:$0xf] }
 0x1fe   :  { %v6449_v9 = vor.u32 %v7713_v2, %v6446_v4  ;;  %v6257_v4 = vor.u32 %v7665_v42, %v6254_v58  ;;  %v7684_v42 = vld [vmem:[#allocation7 + $0xf4] sm:$0xf0]  ;;  %v7682_v58 = vld [vmem:[#allocation7 + $0xec] sm:$0xf] }
 0x1ff   :  { %v2266_v10 = vmax.f32 %v2206_v6, 0.0  ;;  %v7711_v6 = vld [vmem:[#allocation7 + $0x1cc] sm:$0xf0] }
 0x200   :  { %2558 = vmatpush.bf16.msrb.mxu0 %v6145_v63 }
 0x201   :  { %v2268_v43 = vpack.c.bf16 %v2266_v10, %v2264_v7  ;;  %v7709_v7 = vld [vmem:[#allocation7 + $0x1c4] sm:$0xf]  ;;  %v6430_v10 = vld [vmem:[#allocation7 + $0x1d0] sm:$0xf0] }
 0x202   :  { %v6433_v15 = vor.u32 %v7709_v7, %v6430_v10  ;;  %v7661_v7 = vld [vmem:[#allocation7 + $0x44] sm:$0xf]  ;;  %v6238_v10 = vld [vmem:[#allocation7 + $0x50] sm:$0xf0] }
 0x203   :  { %2410 = vmatmul.bf16.vlgmr.msrb.gmra.mxu3 %v2268_v43  ;;  %v6429_v43 = vor.u32 %v7711_v6, %v6428_v5  ;;  %v6236_v5 = vld [vmem:[#allocation7 + $0x40] sm:$0xf]  ;;  %v6365_v6 = vor.u32 %v7695_v61, %v6364_v18  ;;  %v6420_v18 = vld [vmem:[#allocation7 + $0x1a8] sm:$0xf]  ;;  %v7708_v61 = vld [vmem:[#allocation7 + $0x1b4] sm:$0xf0] }
 0x204   :  { %v2259_v13 = vpop.f32.mrf.mxu0  ;;  %3007 = vmatpush.bf16.msra.mxu0 %v6449_v9  ;;  %v7663_v9 = vld [vmem:[#allocation7 + $0x4c] sm:$0xf0] }
 0x205   :  { %v2260_v55 = vadd.f32 %v2259_v13, %v2246_v22  ;;  %v7681_v13 = vld [vmem:[#allocation7 + $0xe4] sm:$0xf]  ;;  %2980 = vmatpush.bf16.msra.mxu1 %v6429_v43  ;;  %v6369_v43 = vor.u32 %v7693_v0, %v6366_v1  ;;  %v6421_v0 = vor.u32 %v7708_v61, %v6420_v18  ;;  %v7706_v1 = vld [vmem:[#allocation7 + $0x1ac] sm:$0xf]  ;;  %v6342_v61 = vld [vmem:[#allocation7 + $0x118] sm:$0xf0] }
 0x206   :  { %v6321_v17 = vor.u32 %v7681_v13, %v6318_v14  ;;  %v7705_v22 = vld [vmem:[#allocation7 + $0x1a4] sm:$0xf]  ;;  %v7691_v13 = vld [vmem:[#allocation7 + $0x12c] sm:$0xf0] }
 0x207   :  { %v2265_v25 = vmax.f32 %v2260_v55, 0.0  ;;  %v6300_v55 = vld [vmem:[#allocation7 + $0xc0] sm:$0xf] }
 0x208   :  { %2993 = vmatpush.bf16.msra.mxu2 %v6321_v17  ;;  %3008 = vmatpush.bf16.msra.mxu0 %v6433_v15  ;;  %v7689_v15 = vld [vmem:[#allocation7 + $0x124] sm:$0xf]  ;;  %v6237_v17 = vor.u32 %v7663_v9, %v6236_v5  ;;  %v7680_v5 = vld [vmem:[#allocation7 + $0xd4] sm:$0xf0] }
 0x20c   :  { %v2261_v20 = vpop.f32.mrf.mxu0 }
 0x20d   :  { %v2262_v24 = vadd.f32 %v2261_v20, %v2248_v23  ;;  %v6414_v23 = vld [vmem:[#allocation7 + $0x1b0] sm:$0xf0]  ;;  %v7679_v20 = vld [vmem:[#allocation7 + $0xcc] sm:$0xf0] }
 0x20e   :  { %v6417_v30 = vor.u32 %v7705_v22, %v6414_v23  ;;  %v6353_v23 = vor.u32 %v7689_v15, %v6350_v16  ;;  %v6292_v16 = vld [vmem:[#allocation7 + $0xa8] sm:$0xf] }
 0x20f   :  { %v2267_v50 = vmax.f32 %v2262_v24, 0.0  ;;  %v6301_v24 = vor.u32 %v7679_v20, %v6300_v55  ;;  %v6332_v55 = vld [vmem:[#allocation7 + $0x100] sm:$0xf]  ;;  %v7687_v20 = vld [vmem:[#allocation7 + $0x10c] sm:$0xf0] }
 0x210   :  { %3009 = vmatpush.bf16.msra.mxu0 %v6417_v30 }
 0x211   :  { %v2269_v26 = vpack.c.bf16 %v2267_v50, %v2265_v25  ;;  %v7677_v25 = vld [vmem:[#allocation7 + $0xc4] sm:$0xf]  ;;  %v6302_v50 = vld [vmem:[#allocation7 + $0xd0] sm:$0xf0]  ;;  %2966 = vmatpush.bf16.msra.mxu3 %v6301_v24 }
 0x212   :  { %v6305_v27 = vor.u32 %v7677_v25, %v6302_v50  ;;  %v7685_v50 = vld [vmem:[#allocation7 + $0x104] sm:$0xf] }
 0x213   :  { %2424 = vmatmul.bf16.vlgmr.msrb.gmra.mxu1 %v2269_v26  ;;  %v6413_v26 = vor.u32 %v7707_v21, %v6412_v19  ;;  %v6241_v19 = vor.u32 %v7661_v7, %v6238_v10  ;;  %v6349_v21 = vor.u32 %v7691_v13, %v6348_v12  ;;  %v6310_v7 = vld [vmem:[#allocation7 + $0xd8] sm:$0xf0]  ;;  %v7702_v12 = vld [vmem:[#allocation7 + $0x18c] sm:$0xf] }
 0x214   :  { %2994 = vmatpush.bf16.msra.mxu2 %v6305_v27  ;;  %3010 = vmatpush.bf16.msra.mxu0 %v6401_v47  ;;  %v6333_v27 = vor.u32 %v7687_v20, %v6332_v55  ;;  %v6437_v47 = vor.u32 %v7712_v45, %v6436_v44  ;;  %v6388_v55 = vld [vmem:[#allocation7 + $0x168] sm:$0xf]  ;;  %v7700_v20 = vld [vmem:[#allocation7 + $0x174] sm:$0xf0]  ;;  %v6262_v44 = vld [vmem:[#allocation7 + $0x78] sm:$0xf0] }
 0x215   :  { %2981 = vmatpush.bf16.msra.mxu1 %v6413_v26  ;;  %2967 = vmatpush.bf16.msra.mxu3 %v6285_v38  ;;  %v6334_v26 = vld [vmem:[#allocation7 + $0x110] sm:$0xf0]  ;;  %v7659_v38 = vld [vmem:[#allocation7 + $0x2c] sm:$0xf0]  ;;  %v6356_v45 = vld [vmem:[#allocation7 + $0x128] sm:$0xf] }
 0x216   :  { %v6337_v29 = vor.u32 %v7685_v50, %v6334_v26  ;;  %v6221_v33 = vor.u32 %v7659_v38, %v6220_v36  ;;  %v6390_v50 = vld [vmem:[#allocation7 + $0x178] sm:$0xf0] }
 0x217   :  { %v6374_v38 = vld [vmem:[#allocation7 + $0x158] sm:$0xf0] }
 0x218   :  { %2995 = vmatpush.bf16.msra.mxu2 %v6289_v39  ;;  %3011 = vmatpush.bf16.msra.mxu0 %v6385_v62  ;;  %v6457_v39 = vor.u32 %v7714_v8, %v6454_v35  ;;  %v6326_v62 = vld [vmem:[#allocation7 + $0xf8] sm:$0xf0]  ;;  %v6372_v8 = vld [vmem:[#allocation7 + $0x148] sm:$0xf]  ;;  %v7694_v35 = vld [vmem:[#allocation7 + $0x14c] sm:$0xf] }
 0x219   :  { %2982 = vmatpush.bf16.msra.mxu1 %v6397_v41  ;;  %2968 = vmatpush.bf16.msra.mxu3 %v6269_v53  ;;  %v6222_v41 = vld [vmem:[#allocation7 + $0x30] sm:$0xf0]  ;;  %v6205_v53 = vor.u32 %v7655_v51, %v6204_v49  ;;  %v7690_v49 = vld [vmem:[#allocation7 + $0x12c] sm:$0xf]  ;;  %v6358_v51 = vld [vmem:[#allocation7 + $0x138] sm:$0xf0] }
 0x21c   :  { %2996 = vmatpush.bf16.msra.mxu2 %v6273_v60  ;;  %3012 = vmatpush.bf16.msra.mxu0 %v6369_v43  ;;  %v7653_v60 = vld [vmem:[#allocation7 + $0x4] sm:$0xf]  ;;  %v7704_v43 = vld [vmem:[#allocation7 + $0x194] sm:$0xf0] }
 0x21d   :  { %2983 = vmatpush.bf16.msra.mxu1 %v6381_v37  ;;  %2969 = vmatpush.bf16.msra.mxu3 %v6253_v3  ;;  %v6209_v37 = vor.u32 %v7653_v60, %v6206_v56  ;;  %v7664_v60 = vld [vmem:[#allocation7 + $0x54] sm:$0xf0]  ;;  %v7662_v56 = vld [vmem:[#allocation7 + $0x4c] sm:$0xf] }
 0x220   :  { %2997 = vmatpush.bf16.msra.mxu2 %v6257_v4  ;;  %3013 = vmatpush.bf16.msra.mxu0 %v6353_v23  ;;  %v6308_v4 = vld [vmem:[#allocation7 + $0xc8] sm:$0xf] }
 0x221   :  { %2984 = vmatpush.bf16.msra.mxu1 %v6365_v6  ;;  %2970 = vmatpush.bf16.msra.mxu3 %v6237_v17  ;;  %v7678_v6 = vld [vmem:[#allocation7 + $0xcc] sm:$0xf]  ;;  %v6309_v9 = vor.u32 %v7680_v5, %v6308_v4  ;;  %v7676_v17 = vld [vmem:[#allocation7 + $0xb4] sm:$0xf0] }
 0x222   :  { %v6313_v10 = vor.u32 %v7678_v6, %v6310_v7  ;;  %v6212_v6 = vld [vmem:[#allocation7 + $0x8] sm:$0xf]  ;;  %v7654_v7 = vld [vmem:[#allocation7 + $0xc] sm:$0xf] }
 0x224   :  { %2998 = vmatpush.bf16.msra.mxu2 %v6241_v19  ;;  %3014 = vmatpush.bf16.msra.mxu0 %v6337_v29  ;;  %v7674_v19 = vld [vmem:[#allocation7 + $0xac] sm:$0xf] }
 0x225   :  { %2985 = vmatpush.bf16.msra.mxu1 %v6349_v21  ;;  %2971 = vmatpush.bf16.msra.mxu3 %v6221_v33  ;;  %v6293_v21 = vor.u32 %v7676_v17, %v6292_v16  ;;  %v7670_v29 = vld [vmem:[#allocation7 + $0x8c] sm:$0xf]  ;;  %v6260_v33 = vld [vmem:[#allocation7 + $0x68] sm:$0xf] }
 0x226   :  { %v6281_v32 = vor.u32 %v7670_v29, %v6278_v31  ;;  %v7937_v29 = vld [vmem:[#allocation9 + $0x6e0] sm:$0xf0]  ;;  %v6656_v31 = vld [vmem:[#allocation9 + $0x188] sm:$0xf] }
 0x229   :  { %2986 = vmatpush.bf16.msra.mxu1 %v6333_v27  ;;  %2972 = vmatpush.bf16.msra.mxu3 %v6205_v53  ;;  %v6276_v27 = vld [vmem:[#allocation7 + $0x88] sm:$0xf]  ;;  %v6361_v53 = vor.u32 %v7690_v49, %v6358_v51  ;;  %v7272_v51 = vld [vmem:[#allocation9 + $0x658] sm:$0xf] }
 0x22d   :  { %3035 = vmatpush.bf16.msrb.mxu1 %v6453_v34  ;;  %v7696_v34 = vld [vmem:[#allocation7 + $0x154] sm:$0xf0] }
 0x22e   :  { %v6373_v36 = vor.u32 %v7696_v34, %v6372_v8 }
 0x231   :  { %3036 = vmatpush.bf16.msrb.mxu1 %v6437_v47 }
 0x235   :  { %3037 = vmatpush.bf16.msrb.mxu1 %v6421_v0  ;;  %v7660_v0 = vld [vmem:[#allocation7 + $0x34] sm:$0xf0] }
 0x286   :  { %v2411_v40 = vpop.f32.mrf.mxu3 }
 0x287   :  { %v2412_v59 = vadd.f32 %v7952_v46, %v2411_v40  ;;  %v7657_v40 = vld [vmem:[#allocation7 + $0x24] sm:$0xf] }
 0x288   :  { %v6225_v54 = vor.u32 %v7657_v40, %v6222_v41  ;;  %v7668_v40 = vld [vmem:[#allocation7 + $0x74] sm:$0xf0]  ;;  %v7666_v41 = vld [vmem:[#allocation7 + $0x6c] sm:$0xf] }
 0x289   :  { %v6265_v47 = vor.u32 %v7666_v41, %v6262_v44  ;;  %v7811_v44 = vld [vmem:[#allocation9 + $0x2f0] sm:$0xf0] }
 0x28a   :  { %2999 = vmatpush.bf16.msra.mxu2 %v6225_v54  ;;  %v6261_v54 = vor.u32 %v7668_v40, %v6260_v33  ;;  %v7930_v33 = vld [vmem:[#allocation9 + $0x6a8] sm:$0xf0] }
 0x28e   :  { %v2413_v14 = vpop.f32.mrf.mxu3  ;;  %3000 = vmatpush.bf16.msra.mxu2 %v6209_v37  ;;  %v6246_v37 = vld [vmem:[#allocation7 + $0x58] sm:$0xf0] }
 0x28f   :  { %v2414_v22 = vadd.f32 %v7952_v46, %v2413_v14  ;;  %v7710_v46 = vld [vmem:[#allocation7 + $0x1cc] sm:$0xf]  ;;  %v6406_v14 = vld [vmem:[#allocation7 + $0x198] sm:$0xf0] }
 0x290   :  { %v2425_v63 = vpop.f32.mrf.mxu1  ;;  %v6441_v52 = vor.u32 %v7710_v46, %v6438_v48  ;;  %v6409_v15 = vor.u32 %v7702_v12, %v6406_v14  ;;  %v7692_v46 = vld [vmem:[#allocation7 + $0x134] sm:$0xf0]  ;;  %v6214_v12 = vld [vmem:[#allocation7 + $0x18] sm:$0xf0] }
 0x291   :  { %v2426_v2 = vadd.f32 %v2425_v63, %v2412_v59  ;;  %v6325_v59 = vor.u32 %v7684_v42, %v6324_v57  ;;  %v6329_v63 = vor.u32 %v7682_v58, %v6326_v62  ;;  %v6357_v48 = vor.u32 %v7692_v46, %v6356_v45  ;;  %v6340_v42 = vld [vmem:[#allocation7 + $0x108] sm:$0xf]  ;;  %v7688_v58 = vld [vmem:[#allocation7 + $0x114] sm:$0xf0] }
 0x292   :  { %v6249_v62 = vor.u32 %v7662_v56, %v6246_v37  ;;  %v6341_v18 = vor.u32 %v7688_v58, %v6340_v42  ;;  %v7923_v56 = vld [vmem:[#allocation9 + $0x670] sm:$0xf0]  ;;  %v7804_v58 = vld [vmem:[#allocation9 + $0x2b8] sm:$0xf0] }
 0x293   :  { %v2430_v11 = vmax.f32 %v2426_v2, 0.0  ;;  %v6422_v2 = vld [vmem:[#allocation7 + $0x1b8] sm:$0xf0]  ;;  %3021 = vmatpush.bf16.msrb.mxu3 %v6325_v59  ;;  %v7686_v59 = vld [vmem:[#allocation7 + $0x10c] sm:$0xf]  ;;  %v7273_v42 = vor.u32 %v7923_v56, %v7272_v51 }
 0x294   :  { %v6425_v3 = vor.u32 %v7706_v1, %v6422_v2  ;;  %v6345_v1 = vor.u32 %v7686_v59, %v6342_v61  ;;  %v7658_v2 = vld [vmem:[#allocation7 + $0x2c] sm:$0xf]  ;;  %v7244_v59 = vld [vmem:[#allocation9 + $0x620] sm:$0xf]  ;;  %v6600_v61 = vld [vmem:[#allocation9 + $0x118] sm:$0xf] }
 0x295   :  { %2432 = vst [vmem:[%s8510_s14] sm:$0xff] %v2430_v11  ;;  %v6964_v56 = vld [vmem:[#allocation9 + $0x3f0] sm:$0xf] }
 0x297   :  { %3022 = vmatpush.bf16.msrb.mxu3 %v6309_v9  ;;  %v7656_v9 = vld [vmem:[#allocation7 + $0x14] sm:$0xf0] }
 0x298   :  { %v2427_v24 = vpop.f32.mrf.mxu1 }
 0x299   :  { %v2428_v25 = vadd.f32 %v2427_v24, %v2414_v22  ;;  %v6294_v22 = vld [vmem:[#allocation7 + $0xb8] sm:$0xf0]  ;;  %v7698_v24 = vld [vmem:[#allocation7 + $0x16c] sm:$0xf] }
 0x29a   :  { %v6297_v23 = vor.u32 %v7674_v19, %v6294_v22  ;;  %v6393_v26 = vor.u32 %v7698_v24, %v6390_v50  ;;  %v6880_v22 = vld [vmem:[#allocation9 + $0x348] sm:$0xf] }
 0x29b   :  { %v2431_v28 = vmax.f32 %v2428_v25, 0.0  ;;  %v6389_v25 = vor.u32 %v7700_v20, %v6388_v55  ;;  %3023 = vmatpush.bf16.msrb.mxu3 %v6293_v21 }
 0x29d   :  { %2433 = vst [vmem:[%s8510_s14 + $0x8] sm:$0xff] %v2431_v28  ;;  %v2434_v30 = vpack.c.bf16 %v2431_v28, %v2430_v11  ;;  %v6404_v11 = vld [vmem:[#allocation7 + $0x188] sm:$0xf]  ;;  %v7672_v28 = vld [vmem:[#allocation7 + $0x94] sm:$0xf0] }
 0x29e   :  { %v6405_v13 = vor.u32 %v7704_v43, %v6404_v11  ;;  %v6213_v43 = vor.u32 %v7656_v9, %v6212_v6  ;;  %v7797_v6 = vld [vmem:[#allocation9 + $0x280] sm:$0xf0] }
 0x29f   :  { %2545 = vmatmul.bf16.vlgmr.msrb.gmra.mxu2 %v2434_v30  ;;  %2559 = vmatmul.bf16.vlgmr.msrb.gmra.mxu0 %v2434_v30  ;;  %v6277_v30 = vor.u32 %v7672_v28, %v6276_v27  ;;  %v7818_v27 = vld [vmem:[#allocation9 + $0x328] sm:$0xf0]  ;;  %v7328_v28 = vld [vmem:[#allocation9 + $0x6c8] sm:$0xf] }
 0x2a0   :  { %3063 = vmatpush.bf16.msrb.mxu0 %v6457_v39  ;;  %3049 = vmatpush.bf16.msrb.mxu2 %v6329_v63  ;;  %v6377_v39 = vor.u32 %v7694_v35, %v6374_v38  ;;  %v6228_v63 = vld [vmem:[#allocation7 + $0x28] sm:$0xf]  ;;  %v7329_v8 = vor.u32 %v7937_v29, %v7328_v28  ;;  %v7300_v38 = vld [vmem:[#allocation9 + $0x690] sm:$0xf]  ;;  %v7776_v28 = vld [vmem:[#allocation9 + $0x1d8] sm:$0xf0] }
 0x2a1   :  { %3038 = vmatpush.bf16.msrb.mxu1 %v6405_v13  ;;  %3024 = vmatpush.bf16.msrb.mxu3 %v6277_v30  ;;  %v6229_v4 = vor.u32 %v7660_v0, %v6228_v63  ;;  %v6217_v13 = vor.u32 %v7654_v7, %v6214_v12  ;;  %v7104_v35 = vld [vmem:[#allocation9 + $0x508] sm:$0xf]  ;;  %v7301_v45 = vor.u32 %v7930_v33, %v7300_v38  ;;  %v7755_v0 = vld [vmem:[#allocation9 + $0x130] sm:$0xf0]  ;;  %v6572_v7 = vld [vmem:[#allocation9 + $0xe0] sm:$0xf] }
 0x2a2   :  { %v6601_v9 = vor.u32 %v7755_v0, %v6600_v61  ;;  %v7860_v12 = vld [vmem:[#allocation9 + $0x478] sm:$0xf0]  ;;  %v6658_v38 = vld [vmem:[#allocation9 + $0x1a4] sm:$0xf0]  ;;  %v6602_v61 = vld [vmem:[#allocation9 + $0x134] sm:$0xf0] }
 0x2a4   :  { %3064 = vmatpush.bf16.msrb.mxu0 %v6441_v52  ;;  %3050 = vmatpush.bf16.msrb.mxu2 %v6313_v10  ;;  %v6244_v52 = vld [vmem:[#allocation7 + $0x48] sm:$0xf]  ;;  %v2451_v10 = vld [vmem:[%s8504_s8] sm:$0x3] }
 0x2a5   :  { %3039 = vmatpush.bf16.msrb.mxu1 %v6389_v25  ;;  %3025 = vmatpush.bf16.msrb.mxu3 %v6261_v54  ;;  %v6245_v57 = vor.u32 %v7664_v60, %v6244_v52  ;;  %v2454_v14 = vperm.slane %v2451_v10, 1  ;;  %v2453_v19 = vperm.slane %v2451_v10, 0  ;;  %v6852_v25 = vld [vmem:[#allocation9 + $0x310] sm:$0xf]  ;;  %v6824_v54 = vld [vmem:[#allocation9 + $0x2d8] sm:$0xf] }
 0x2a6   :  { %v7874_v60 = vld [vmem:[#allocation9 + $0x4e8] sm:$0xf0]  ;;  %v6825_v37 = vor.u32 %v7811_v44, %v6824_v54  ;;  %v6992_v54 = vld [vmem:[#allocation9 + $0x428] sm:$0xf]  ;;  %v7853_v44 = vld [vmem:[#allocation9 + $0x440] sm:$0xf0] }
 0x2a8   :  { %3065 = vmatpush.bf16.msrb.mxu0 %v6425_v3  ;;  %3051 = vmatpush.bf16.msrb.mxu2 %v6297_v23  ;;  %v6230_v3 = vld [vmem:[#allocation7 + $0x38] sm:$0xf0]  ;;  %v7825_v23 = vld [vmem:[#allocation9 + $0x360] sm:$0xf0] }
 0x2a9   :  { %3040 = vmatpush.bf16.msrb.mxu1 %v6373_v36  ;;  %3026 = vmatpush.bf16.msrb.mxu3 %v6245_v57  ;;  %v6233_v5 = vor.u32 %v7658_v2, %v6230_v3  ;;  %v6881_v24 = vor.u32 %v7825_v23, %v6880_v22  ;;  %v7881_v36 = vld [vmem:[#allocation9 + $0x520] sm:$0xf0]  ;;  %v6796_v57 = vld [vmem:[#allocation9 + $0x2a0] sm:$0xf]  ;;  %v7867_v2 = vld [vmem:[#allocation9 + $0x4b0] sm:$0xf0] }
 0x2aa   :  { %v7105_v49 = vor.u32 %v7881_v36, %v7104_v35  ;;  %v6797_v3 = vor.u32 %v7804_v58, %v6796_v57  ;;  %v6712_v23 = vld [vmem:[#allocation9 + $0x1f8] sm:$0xf]  ;;  %v7766_v36 = vld [vmem:[#allocation9 + $0x18c] sm:$0xf] }
 0x2ab   :  { %v6661_v33 = vor.u32 %v7766_v36, %v6658_v38  ;;  %v7846_v57 = vld [vmem:[#allocation9 + $0x408] sm:$0xf0]  ;;  %v6742_v36 = vld [vmem:[#allocation9 + $0x24c] sm:$0xf0]  ;;  %v7871_v38 = vld [vmem:[#allocation9 + $0x4d4] sm:$0xf] }
 0x2ac   :  { %3066 = vmatpush.bf16.msrb.mxu0 %v6409_v15  ;;  %3052 = vmatpush.bf16.msrb.mxu2 %v6281_v32  ;;  %v7769_v32 = vld [vmem:[#allocation9 + $0x1a0] sm:$0xf0]  ;;  %v7902_v58 = vld [vmem:[#allocation9 + $0x5c8] sm:$0xf0] }
 0x2ad   :  { %3041 = vmatpush.bf16.msrb.mxu1 %v6357_v48  ;;  %3027 = vmatpush.bf16.msrb.mxu3 %v6229_v4  ;;  %v6657_v46 = vor.u32 %v7769_v32, %v6656_v31  ;;  %v7762_v48 = vld [vmem:[#allocation9 + $0x168] sm:$0xf0] }
 0x2b0   :  { %3067 = vmatpush.bf16.msrb.mxu0 %v6393_v26  ;;  %3053 = vmatpush.bf16.msrb.mxu2 %v6265_v47  ;;  %v6628_v47 = vld [vmem:[#allocation9 + $0x150] sm:$0xf] }
 0x2b1   :  { %3042 = vmatpush.bf16.msrb.mxu1 %v6341_v18  ;;  %3028 = vmatpush.bf16.msrb.mxu3 %v6213_v43  ;;  %v6629_v18 = vor.u32 %v7762_v48, %v6628_v47  ;;  %v7020_v43 = vld [vmem:[#allocation9 + $0x460] sm:$0xf]  ;;  %v7909_v47 = vld [vmem:[#allocation9 + $0x600] sm:$0xf0]  ;;  %v7759_v48 = vld [vmem:[#allocation9 + $0x154] sm:$0xf] }
 0x2b4   :  { %3068 = vmatpush.bf16.msrb.mxu0 %v6377_v39  ;;  %3054 = vmatpush.bf16.msrb.mxu2 %v6249_v62  ;;  %v6853_v39 = vor.u32 %v7818_v27, %v6852_v25  ;;  %v7916_v62 = vld [vmem:[#allocation9 + $0x638] sm:$0xf0]  ;;  %v7734_v25 = vld [vmem:[#allocation9 + $0x88] sm:$0xf0]  ;;  %v6684_v27 = vld [vmem:[#allocation9 + $0x1c0] sm:$0xf] }
 0x2b5   :  { %v7245_v4 = vor.u32 %v7916_v62, %v7244_v59  ;;  %v6685_v31 = vor.u32 %v7776_v28, %v6684_v27  ;;  %v6965_v59 = vor.u32 %v7846_v57, %v6964_v56  ;;  %v7106_v28 = vld [vmem:[#allocation9 + $0x524] sm:$0xf0]  ;;  %v7920_v56 = vld [vmem:[#allocation9 + $0x65c] sm:$0xf] }
 0x2b8   :  { %3069 = vmatpush.bf16.msrb.mxu0 %v6361_v53  ;;  %3055 = vmatpush.bf16.msrb.mxu2 %v6233_v5  ;;  %v7076_v53 = vld [vmem:[#allocation9 + $0x4d0] sm:$0xf]  ;;  %v6768_v5 = vld [vmem:[#allocation9 + $0x268] sm:$0xf] }
 0x2b9   :  { %v7077_v63 = vor.u32 %v7874_v60, %v7076_v53  ;;  %v7815_v53 = vld [vmem:[#allocation9 + $0x314] sm:$0xf]  ;;  %v6854_v60 = vld [vmem:[#allocation9 + $0x32c] sm:$0xf0] }
 0x2bc   :  { %3070 = vmatpush.bf16.msrb.mxu0 %v6345_v1  ;;  %3056 = vmatpush.bf16.msrb.mxu2 %v6217_v13  ;;  %v7048_v1 = vld [vmem:[#allocation9 + $0x498] sm:$0xf]  ;;  %v6769_v13 = vor.u32 %v7797_v6, %v6768_v5 }
 0x2bd   :  { %v7049_v10 = vor.u32 %v7867_v2, %v7048_v1  ;;  %v6826_v1 = vld [vmem:[#allocation9 + $0x2f4] sm:$0xf0] }
 0x2be   :  { %v7160_v5 = vld [vmem:[#allocation9 + $0x578] sm:$0xf] }
 0x31c   :  { %v2560_v11 = vpop.f32.mrf.mxu0 }
 0x31d   :  { %v2561_v16 = vadd.f32 %v2560_v11, %v2454_v14  ;;  %v7748_v11 = vld [vmem:[#allocation9 + $0xf8] sm:$0xf0] }
 0x31f   :  { %v2566_v55 = vmax.f32 %v2561_v16, 0.0  ;;  %v6573_v16 = vor.u32 %v7748_v11, %v6572_v7  ;;  %v6574_v11 = vld [vmem:[#allocation9 + $0xfc] sm:$0xf0] }
 0x322   :  { %v2546_v15 = vpop.f32.mrf.mxu2 }
 0x323   :  { %v2547_v50 = vadd.f32 %v2546_v15, %v2453_v19  ;;  %v7790_v15 = vld [vmem:[#allocation9 + $0x248] sm:$0xf0] }
 0x324   :  { %v2562_v17 = vpop.f32.mrf.mxu0 }
 0x325   :  { %v2563_v21 = vadd.f32 %v2562_v17, %v2454_v14  ;;  %v2565_v40 = vmax.f32 %v2547_v50, 0.0  ;;  %v6740_v14 = vld [vmem:[#allocation9 + $0x230] sm:$0xf]  ;;  %v7021_v17 = vor.u32 %v7860_v12, %v7020_v43  ;;  %v7801_v12 = vld [vmem:[#allocation9 + $0x2a4] sm:$0xf] }
 0x326   :  { %v6741_v22 = vor.u32 %v7790_v15, %v6740_v14  ;;  %v6908_v15 = vld [vmem:[#allocation9 + $0x380] sm:$0xf] }
 0x327   :  { %v2568_v20 = vmax.f32 %v2563_v21, 0.0  ;;  %v7741_v21 = vld [vmem:[#allocation9 + $0xc0] sm:$0xf0] }
 0x329   :  { %v8409_v26 = vpack.c.bf16 %v2568_v20, %v2566_v55  ;;  %v7783_v55 = vld [vmem:[#allocation9 + $0x210] sm:$0xf0] }
 0x32a   :  { %v2548_v30 = vpop.f32.mrf.mxu2  ;;  %v6713_v50 = vor.u32 %v7783_v55, %v6712_v23  ;;  %v6546_v23 = vld [vmem:[#allocation9 + $0xc4] sm:$0xf0] }
 0x32b   :  { %v2549_v34 = vadd.f32 %v2548_v30, %v2453_v19  ;;  %2987 = vmatmul.bf16.vlgmr.msra.gmra.mxu1 %v8409_v26  ;;  %3015 = vmatmul.bf16.vlgmr.msra.gmra.mxu0 %v8409_v26  ;;  %v6544_v19 = vld [vmem:[#allocation9 + $0xa8] sm:$0xf]  ;;  %v7727_v30 = vld [vmem:[#allocation9 + $0x50] sm:$0xf0] }
 0x32c   :  { %4527 = vmatpush.bf16.msra.mxu1 %v6881_v24  ;;  %4555 = vmatpush.bf16.msra.mxu0 %v7329_v8  ;;  %v6545_v20 = vor.u32 %v7741_v21, %v6544_v19  ;;  %v6516_v24 = vld [vmem:[#allocation9 + $0x70] sm:$0xf]  ;;  %v6460_v8 = vld [vmem:[#allocation9] sm:$0xf]  ;;  %v7888_v21 = vld [vmem:[#allocation9 + $0x558] sm:$0xf0] }
 0x32d   :  { %v2567_v41 = vmax.f32 %v2549_v34, 0.0  ;;  %v6517_v29 = vor.u32 %v7734_v25, %v6516_v24  ;;  %v7720_v34 = vld [vmem:[#allocation9 + $0x18] sm:$0xf0]  ;;  %v7794_v24 = vld [vmem:[#allocation9 + $0x26c] sm:$0xf] }
 0x32e   :  { %v6461_v35 = vor.u32 %v7720_v34, %v6460_v8  ;;  %v6770_v25 = vld [vmem:[#allocation9 + $0x284] sm:$0xf0]  ;;  %v6518_v8 = vld [vmem:[#allocation9 + $0x8c] sm:$0xf0]  ;;  %v7787_v34 = vld [vmem:[#allocation9 + $0x234] sm:$0xf] }
 0x32f   :  { %v2569_v52 = vpack.c.bf16 %v2567_v41, %v2565_v40  ;;  %v6882_v40 = vld [vmem:[#allocation9 + $0x364] sm:$0xf0]  ;;  %v6773_v27 = vor.u32 %v7794_v24, %v6770_v25  ;;  %v8418_v25 = vld [vmem:[%s8506_s10] sm:$0xf] }
 0x330   :  { %4528 = vmatpush.bf16.msra.mxu1 %v6853_v39  ;;  %4556 = vmatpush.bf16.msra.mxu0 %v7301_v45  ;;  %v7822_v39 = vld [vmem:[#allocation9 + $0x34c] sm:$0xf]  ;;  %v7216_v45 = vld [vmem:[#allocation9 + $0x5e8] sm:$0xf] }
 0x331   :  { %2973 = vmatmul.bf16.vlgmr.msra.gmra.mxu3 %v2569_v52  ;;  %3001 = vmatmul.bf16.vlgmr.msra.gmra.mxu2 %v2569_v52  ;;  %v6885_v41 = vor.u32 %v7822_v39, %v6882_v40  ;;  %v7217_v51 = vor.u32 %v7909_v47, %v7216_v45  ;;  %v7078_v39 = vld [vmem:[#allocation9 + $0x4ec] sm:$0xf0]  ;;  %v7724_v45 = vld [vmem:[#allocation9 + $0x3c] sm:$0xf] }
 0x332   :  { %4513 = vmatpush.bf16.msra.mxu3 %v6657_v46  ;;  %4541 = vmatpush.bf16.msra.mxu2 %v7105_v49  ;;  %v6993_v46 = vor.u32 %v7853_v44, %v6992_v54  ;;  %v6630_v49 = vld [vmem:[#allocation9 + $0x16c] sm:$0xf0]  ;;  %v7081_v40 = vor.u32 %v7871_v38, %v7078_v39  ;;  %v7780_v47 = vld [vmem:[#allocation9 + $0x1fc] sm:$0xf] }
 0x333   :  { %v7302_v54 = vld [vmem:[#allocation9 + $0x6ac] sm:$0xf0] }
 0x334   :  { %4529 = vmatpush.bf16.msra.mxu1 %v6825_v37  ;;  %4557 = vmatpush.bf16.msra.mxu0 %v7273_v42  ;;  %v6857_v37 = vor.u32 %v7815_v53, %v6854_v60  ;;  %v7188_v42 = vld [vmem:[#allocation9 + $0x5b0] sm:$0xf] }
 0x335   :  { %v7189_v62 = vor.u32 %v7902_v58, %v7188_v42  ;;  %v7717_v42 = vld [vmem:[#allocation9 + $0x4] sm:$0xf]  ;;  %v6462_v58 = vld [vmem:[#allocation9 + $0x1c] sm:$0xf0] }
 0x336   :  { %4514 = vmatpush.bf16.msra.mxu3 %v6629_v18  ;;  %4542 = vmatpush.bf16.msra.mxu2 %v7077_v63  ;;  %v7752_v18 = vld [vmem:[#allocation9 + $0x11c] sm:$0xf] }
 0x337   :  { %v7808_v63 = vld [vmem:[#allocation9 + $0x2dc] sm:$0xf]  ;;  %v6605_v0 = vor.u32 %v7752_v18, %v6602_v61  ;;  %v6686_v18 = vld [vmem:[#allocation9 + $0x1dc] sm:$0xf0]  ;;  %v7857_v61 = vld [vmem:[#allocation9 + $0x464] sm:$0xf] }
 0x338   :  { %4530 = vmatpush.bf16.msra.mxu1 %v6797_v3  ;;  %4558 = vmatpush.bf16.msra.mxu0 %v7245_v4  ;;  %v6829_v2 = vor.u32 %v7808_v63, %v6826_v1  ;;  %v6936_v3 = vld [vmem:[#allocation9 + $0x3b8] sm:$0xf]  ;;  %v7839_v4 = vld [vmem:[#allocation9 + $0x3d0] sm:$0xf0]  ;;  %v7913_v1 = vld [vmem:[#allocation9 + $0x624] sm:$0xf] }
 0x339   :  { %v6937_v6 = vor.u32 %v7839_v4, %v6936_v3  ;;  %v7246_v3 = vld [vmem:[#allocation9 + $0x63c] sm:$0xf0] }
 0x33a   :  { %4515 = vmatpush.bf16.msra.mxu3 %v6601_v9  ;;  %4543 = vmatpush.bf16.msra.mxu2 %v7049_v10  ;;  %v7895_v9 = vld [vmem:[#allocation9 + $0x590] sm:$0xf0]  ;;  %v7745_v10 = vld [vmem:[#allocation9 + $0xe4] sm:$0xf]  ;;  %v7249_v4 = vor.u32 %v7913_v1, %v7246_v3 }
 0x33b   :  { %3043 = vmatmul.bf16.vlgmr.msrb.gmra.mxu1 %v8409_v26  ;;  %3071 = vmatmul.bf16.vlgmr.msrb.gmra.mxu0 %v8409_v26  ;;  %v6488_v26 = vld [vmem:[#allocation9 + $0x38] sm:$0xf]  ;;  %v7161_v7 = vor.u32 %v7895_v9, %v7160_v5  ;;  %v6577_v43 = vor.u32 %v7745_v10, %v6574_v11  ;;  %v7850_v5 = vld [vmem:[#allocation9 + $0x42c] sm:$0xf]  ;;  %v7819_v1 = vld [vmem:[#allocation9 + $0x330] sm:$0xf0] }
 0x33c   :  { %4531 = vmatpush.bf16.msra.mxu1 %v6769_v13  ;;  %v6489_v32 = vor.u32 %v7727_v30, %v6488_v26  ;;  %4559 = vmatpush.bf16.msra.mxu0 %v7217_v51  ;;  %v6798_v13 = vld [vmem:[#allocation9 + $0x2bc] sm:$0xf0]  ;;  %v7330_v26 = vld [vmem:[#allocation9 + $0x6e4] sm:$0xf0]  ;;  %v7864_v51 = vld [vmem:[#allocation9 + $0x49c] sm:$0xf] }
 0x33d   :  { %v6801_v14 = vor.u32 %v7801_v12, %v6798_v13  ;;  %v7906_v9 = vld [vmem:[#allocation9 + $0x5ec] sm:$0xf]  ;;  %v6966_v12 = vld [vmem:[#allocation9 + $0x40c] sm:$0xf0]  ;;  %v7899_v13 = vld [vmem:[#allocation9 + $0x5b4] sm:$0xf] }
 0x33e   :  { %4516 = vmatpush.bf16.msra.mxu3 %v6573_v16  ;;  %4544 = vmatpush.bf16.msra.mxu2 %v7021_v17  ;;  %v7832_v16 = vld [vmem:[#allocation9 + $0x398] sm:$0xf0]  ;;  %v7132_v17 = vld [vmem:[#allocation9 + $0x540] sm:$0xf] }
 0x33f   :  { %v6909_v19 = vor.u32 %v7832_v16, %v6908_v15  ;;  %v7133_v55 = vor.u32 %v7888_v21, %v7132_v17  ;;  %v7190_v15 = vld [vmem:[#allocation9 + $0x5cc] sm:$0xf0]  ;;  %v7836_v17 = vld [vmem:[#allocation9 + $0x3bc] sm:$0xf] }
 0x340   :  { %4532 = vmatpush.bf16.msra.mxu1 %v6741_v22  ;;  %4560 = vmatpush.bf16.msra.mxu0 %v7189_v62  ;;  %v7738_v22 = vld [vmem:[#allocation9 + $0xac] sm:$0xf]  ;;  %v6465_v62 = vor.u32 %v7717_v42, %v6462_v58  ;;  %v7193_v16 = vor.u32 %v7899_v13, %v7190_v15  ;;  %v7892_v21 = vld [vmem:[#allocation9 + $0x57c] sm:$0xf]  ;;  %v6636_v58 = vld [vmem:[#allocation9 + $0x158] sm:$0xf] }
 0x341   :  { %3029 = vmatmul.bf16.vlgmr.msrb.gmra.mxu3 %v2569_v52  ;;  %3057 = vmatmul.bf16.vlgmr.msrb.gmra.mxu2 %v2569_v52  ;;  %v6633_v52 = vor.u32 %v7759_v48, %v6630_v49  ;;  %v6714_v49 = vld [vmem:[#allocation9 + $0x214] sm:$0xf0] }
 0x342   :  { %4517 = vmatpush.bf16.msra.mxu3 %v6545_v20  ;;  %4545 = vmatpush.bf16.msra.mxu2 %v6993_v46  ;;  %v6549_v20 = vor.u32 %v7738_v22, %v6546_v23  ;;  %v6490_v46 = vld [vmem:[#allocation9 + $0x54] sm:$0xf0]  ;;  %v6717_v53 = vor.u32 %v7780_v47, %v6714_v49  ;;  %v7770_v49 = vld [vmem:[#allocation9 + $0x1a8] sm:$0xf0] }
 0x343   :  { %v6493_v48 = vor.u32 %v7724_v45, %v6490_v46  ;;  %v6664_v46 = vld [vmem:[#allocation9 + $0x190] sm:$0xf] }
 0x344   :  { %4533 = vmatpush.bf16.msra.mxu1 %v6713_v50  ;;  %4561 = vmatpush.bf16.msra.mxu0 %v7161_v7  ;;  %v7878_v50 = vld [vmem:[#allocation9 + $0x50c] sm:$0xf]  ;;  %v7218_v7 = vld [vmem:[#allocation9 + $0x604] sm:$0xf0] }
 0x345   :  { %v7109_v30 = vor.u32 %v7878_v50, %v7106_v28  ;;  %v7221_v11 = vor.u32 %v7906_v9, %v7218_v7  ;;  %v7829_v50 = vld [vmem:[#allocation9 + $0x384] sm:$0xf]  ;;  %v6608_v7 = vld [vmem:[#allocation9 + $0x120] sm:$0xf] }
 0x346   :  { %4518 = vmatpush.bf16.msra.mxu3 %v6517_v29  ;;  %4546 = vmatpush.bf16.msra.mxu2 %v6965_v59  ;;  %v7934_v29 = vld [vmem:[#allocation9 + $0x6cc] sm:$0xf]  ;;  %v7773_v59 = vld [vmem:[#allocation9 + $0x1c4] sm:$0xf] }
 0x347   :  { %v6689_v63 = vor.u32 %v7773_v59, %v6686_v18  ;;  %v7885_v28 = vld [vmem:[#allocation9 + $0x544] sm:$0xf] }
 0x348   :  { %4534 = vmatpush.bf16.msra.mxu1 %v6685_v31  ;;  %4562 = vmatpush.bf16.msra.mxu0 %v7133_v55  ;;  %v7333_v31 = vor.u32 %v7934_v29, %v7330_v26  ;;  %v7134_v26 = vld [vmem:[#allocation9 + $0x55c] sm:$0xf0] }
 0x34a   :  { %4519 = vmatpush.bf16.msra.mxu3 %v6489_v32  ;;  %4547 = vmatpush.bf16.msra.mxu2 %v6937_v6  ;;  %v7731_v32 = vld [vmem:[#allocation9 + $0x74] sm:$0xf]  ;;  %v6994_v6 = vld [vmem:[#allocation9 + $0x444] sm:$0xf0] }
 0x34b   :  { %v6997_v10 = vor.u32 %v7850_v5, %v6994_v6  ;;  %v2640_v5 = vperm.slane %v8418_v25, 3 }
 0x34c   :  { %4583 = vmatpush.bf16.msrb.mxu1 %v6885_v41  ;;  %4611 = vmatpush.bf16.msrb.mxu0 %v7333_v31  ;;  %v7927_v41 = vld [vmem:[#allocation9 + $0x694] sm:$0xf] }
 0x34d   :  { %v7305_v44 = vor.u32 %v7927_v41, %v7302_v54 }
 0x34e   :  { %4520 = vmatpush.bf16.msra.mxu3 %v6461_v35  ;;  %4548 = vmatpush.bf16.msra.mxu2 %v6909_v19  ;;  %v6521_v35 = vor.u32 %v7731_v32, %v6518_v8  ;;  %v6938_v19 = vld [vmem:[#allocation9 + $0x3d4] sm:$0xf0]  ;;  %v7137_v32 = vor.u32 %v7885_v28, %v7134_v26  ;;  %v2637_v8 = vperm.slane %v8418_v25, 0  ;;  %v6552_v26 = vld [vmem:[#allocation9 + $0xb0] sm:$0xf] }
 0x34f   :  { %v6941_v55 = vor.u32 %v7836_v17, %v6938_v19  ;;  %v7749_v17 = vld [vmem:[#allocation9 + $0x100] sm:$0xf0]  ;;  %v6804_v19 = vld [vmem:[#allocation9 + $0x2a8] sm:$0xf] }
 0x350   :  { %4584 = vmatpush.bf16.msrb.mxu1 %v6857_v37  ;;  %4612 = vmatpush.bf16.msrb.mxu0 %v7305_v44  ;;  %v7274_v37 = vld [vmem:[#allocation9 + $0x674] sm:$0xf0] }
 0x351   :  { %v7277_v57 = vor.u32 %v7920_v56, %v7274_v37 }
 0x352   :  { %4569 = vmatpush.bf16.msrb.mxu3 %v6661_v33  ;;  %4597 = vmatpush.bf16.msrb.mxu2 %v7109_v30  ;;  %v6745_v33 = vor.u32 %v7787_v34, %v6742_v36  ;;  %v2638_v34 = vperm.slane %v8418_v25, 1 }
 0x354   :  { %4585 = vmatpush.bf16.msrb.mxu1 %v6829_v2  ;;  %4613 = vmatpush.bf16.msrb.mxu0 %v7277_v57  ;;  %v6665_v57 = vor.u32 %v7770_v49, %v6664_v46  ;;  %v7735_v49 = vld [vmem:[#allocation9 + $0x90] sm:$0xf0] }
 0x356   :  { %4570 = vmatpush.bf16.msrb.mxu3 %v6633_v52  ;;  %4598 = vmatpush.bf16.msrb.mxu2 %v7081_v40  ;;  %v7050_v52 = vld [vmem:[#allocation9 + $0x4b4] sm:$0xf0] }
 0x357   :  { %v7053_v60 = vor.u32 %v7864_v51, %v7050_v52  ;;  %v6888_v51 = vld [vmem:[#allocation9 + $0x350] sm:$0xf]  ;;  %v7826_v52 = vld [vmem:[#allocation9 + $0x368] sm:$0xf0] }
 0x358   :  { %4586 = vmatpush.bf16.msrb.mxu1 %v6801_v14  ;;  %4614 = vmatpush.bf16.msrb.mxu0 %v7249_v4  ;;  %v6889_v42 = vor.u32 %v7826_v52, %v6888_v51  ;;  %v2639_v4 = vperm.slane %v8418_v25, 2 }
 0x35a   :  { %4571 = vmatpush.bf16.msrb.mxu3 %v6605_v0  ;;  %4599 = vmatpush.bf16.msrb.mxu2 %v7053_v60  ;;  %v7022_v0 = vld [vmem:[#allocation9 + $0x47c] sm:$0xf0] }
 0x35b   :  { %v7025_v2 = vor.u32 %v7857_v61, %v7022_v0  ;;  %v6860_v0 = vld [vmem:[#allocation9 + $0x318] sm:$0xf] }
 0x35c   :  { %4587 = vmatpush.bf16.msrb.mxu1 %v6773_v27  ;;  %4615 = vmatpush.bf16.msrb.mxu0 %v7221_v11  ;;  %v6910_v27 = vld [vmem:[#allocation9 + $0x39c] sm:$0xf0]  ;;  %v6861_v9 = vor.u32 %v7819_v1, %v6860_v0 }
 0x35d   :  { %v6913_v29 = vor.u32 %v7829_v50, %v6910_v27  ;;  %v6832_v11 = vld [vmem:[#allocation9 + $0x2e0] sm:$0xf] }
 0x35e   :  { %4572 = vmatpush.bf16.msrb.mxu3 %v6577_v43  ;;  %4600 = vmatpush.bf16.msrb.mxu2 %v7025_v2  ;;  %v7843_v43 = vld [vmem:[#allocation9 + $0x3f4] sm:$0xf] }
 0x35f   :  { %v6969_v14 = vor.u32 %v7843_v43, %v6966_v12  ;;  %v7812_v43 = vld [vmem:[#allocation9 + $0x2f8] sm:$0xf0] }
 0x360   :  { %4588 = vmatpush.bf16.msrb.mxu1 %v6745_v33  ;;  %4616 = vmatpush.bf16.msrb.mxu0 %v7193_v16  ;;  %v6833_v15 = vor.u32 %v7812_v43, %v6832_v11  ;;  %v6580_v16 = vld [vmem:[#allocation9 + $0xe8] sm:$0xf]  ;;  %v7721_v43 = vld [vmem:[#allocation9 + $0x20] sm:$0xf0] }
 0x361   :  { %v6581_v28 = vor.u32 %v7749_v17, %v6580_v16  ;;  %v6468_v11 = vld [vmem:[#allocation9 + $0x8] sm:$0xf]  ;;  %v7861_v17 = vld [vmem:[#allocation9 + $0x480] sm:$0xf0] }
 0x362   :  { %4573 = vmatpush.bf16.msrb.mxu3 %v6549_v20  ;;  %4601 = vmatpush.bf16.msrb.mxu2 %v6997_v10  ;;  %v7162_v20 = vld [vmem:[#allocation9 + $0x594] sm:$0xf0]  ;;  %v7756_v10 = vld [vmem:[#allocation9 + $0x138] sm:$0xf0]  ;;  %v7028_v16 = vld [vmem:[#allocation9 + $0x468] sm:$0xf] }
 0x363   :  { %v7165_v24 = vor.u32 %v7892_v21, %v7162_v20  ;;  %v7805_v21 = vld [vmem:[#allocation9 + $0x2c0] sm:$0xf0] }
 0x364   :  { %4589 = vmatpush.bf16.msrb.mxu1 %v6717_v53 }
 0x365   :  { %4617 = vmatpush.bf16.msrb.mxu0 %v7165_v24 }
 0x366   :  { %4574 = vmatpush.bf16.msrb.mxu3 %v6521_v35  ;;  %4602 = vmatpush.bf16.msrb.mxu2 %v6969_v14  ;;  %v6609_v14 = vor.u32 %v7756_v10, %v6608_v7 }
 0x368   :  { %4590 = vmatpush.bf16.msrb.mxu1 %v6689_v63  ;;  %v7763_v63 = vld [vmem:[#allocation9 + $0x170] sm:$0xf0] }
 0x369   :  { %4618 = vmatpush.bf16.msrb.mxu0 %v7137_v32  ;;  %v6637_v6 = vor.u32 %v7763_v63, %v6636_v58  ;;  %v7742_v32 = vld [vmem:[#allocation9 + $0xc8] sm:$0xf0]  ;;  %v7728_v63 = vld [vmem:[#allocation9 + $0x58] sm:$0xf0] }
 0x36a   :  { %4575 = vmatpush.bf16.msrb.mxu3 %v6493_v48  ;;  %4603 = vmatpush.bf16.msrb.mxu2 %v6941_v55  ;;  %v6553_v46 = vor.u32 %v7742_v32, %v6552_v26  ;;  %v7910_v32 = vld [vmem:[#allocation9 + $0x608] sm:$0xf0] }
 0x36e   :  { %4576 = vmatpush.bf16.msrb.mxu3 %v6465_v62  ;;  %4604 = vmatpush.bf16.msrb.mxu2 %v6913_v29  ;;  %v6805_v29 = vor.u32 %v7805_v21, %v6804_v19  ;;  %v7252_v19 = vld [vmem:[#allocation9 + $0x628] sm:$0xf]  ;;  %v7917_v21 = vld [vmem:[#allocation9 + $0x640] sm:$0xf0] }
 0x3a8   :  { %v2988_v22 = vpop.f32.mrf.mxu1  ;;  %v3016_v23 = vpop.f32.mrf.mxu0 }
 0x3b0   :  { %v2990_v35 = vpop.f32.mrf.mxu1  ;;  %v3018_v36 = vpop.f32.mrf.mxu0 }
 0x3b4   :  { %v2974_v30 = vpop.f32.mrf.mxu3  ;;  %v3002_v31 = vpop.f32.mrf.mxu2 }
 0x3b5   :  { %v2975_v38 = vadd.f32 %v2974_v30, %v2637_v8  ;;  %v3003_v39 = vadd.f32 %v3002_v31, %v2638_v34 }
 0x3b7   :  { %v2989_v41 = vadd.f32 %v2988_v22, %v2975_v38  ;;  %v3017_v54 = vadd.f32 %v3016_v23, %v3003_v39  ;;  %v7336_v38 = vld [vmem:[#allocation9 + $0x6d0] sm:$0xf] }
 0x3b8   :  { %v3044_v59 = vpop.f32.mrf.mxu1  ;;  %v3072_v62 = vpop.f32.mrf.mxu0 }
 0x3b9   :  { %v3077_v53 = vmax.f32 %v2989_v41, 0.0  ;;  %v3078_v60 = vmax.f32 %v3017_v54, 0.0  ;;  %v7938_v54 = vld [vmem:[#allocation9 + $0x6e8] sm:$0xf0] }
 0x3ba   :  { %v7337_v52 = vor.u32 %v7938_v54, %v7336_v38 }
 0x3bc   :  { %v2976_v33 = vpop.f32.mrf.mxu3  ;;  %v3004_v40 = vpop.f32.mrf.mxu2 }
 0x3bd   :  { %v2977_v44 = vadd.f32 %v2976_v33, %v2637_v8  ;;  %v3005_v45 = vadd.f32 %v3004_v40, %v2638_v34  ;;  %v6776_v8 = vld [vmem:[#allocation9 + $0x270] sm:$0xf]  ;;  %v7798_v34 = vld [vmem:[#allocation9 + $0x288] sm:$0xf0] }
 0x3bf   :  { %v2991_v47 = vadd.f32 %v2990_v35, %v2977_v44  ;;  %v3019_v48 = vadd.f32 %v3018_v36, %v3005_v45  ;;  %v7112_v35 = vld [vmem:[#allocation9 + $0x510] sm:$0xf]  ;;  %v7882_v36 = vld [vmem:[#allocation9 + $0x528] sm:$0xf0] }
 0x3c0   :  { %v3046_v50 = vpop.f32.mrf.mxu1  ;;  %v3074_v27 = vpop.f32.mrf.mxu0  ;;  %v7113_v51 = vor.u32 %v7882_v36, %v7112_v35  ;;  %v7816_v35 = vld [vmem:[#allocation9 + $0x31c] sm:$0xf]  ;;  %v6862_v36 = vld [vmem:[#allocation9 + $0x334] sm:$0xf0] }
 0x3c1   :  { %v3081_v56 = vmax.f32 %v2991_v47, 0.0  ;;  %v3082_v37 = vmax.f32 %v3019_v48, 0.0  ;;  %v6777_v47 = vor.u32 %v7798_v34, %v6776_v8  ;;  %v6524_v48 = vld [vmem:[#allocation9 + $0x78] sm:$0xf]  ;;  %v7760_v8 = vld [vmem:[#allocation9 + $0x15c] sm:$0xf]  ;;  %v6865_v54 = vor.u32 %v7816_v35, %v6862_v36 }
 0x3c2   :  { %v6525_v58 = vor.u32 %v7735_v49, %v6524_v48  ;;  %v6638_v34 = vld [vmem:[#allocation9 + $0x174] sm:$0xf0]  ;;  %v7753_v48 = vld [vmem:[#allocation9 + $0x124] sm:$0xf]  ;;  %v6610_v49 = vld [vmem:[#allocation9 + $0x13c] sm:$0xf0] }
 0x3c3   :  { %v8422_v18 = vpack.c.bf16 %v3081_v56, %v3077_v53  ;;  %v8424_v61 = vpack.c.bf16 %v3082_v37, %v3078_v60  ;;  %v6748_v53 = vld [vmem:[#allocation9 + $0x238] sm:$0xf]  ;;  %v7791_v60 = vld [vmem:[#allocation9 + $0x250] sm:$0xf0] }
 0x3c4   :  { %v3030_v2 = vpop.f32.mrf.mxu3  ;;  %v3058_v3 = vpop.f32.mrf.mxu2  ;;  %v7084_v56 = vld [vmem:[#allocation9 + $0x4d8] sm:$0xf]  ;;  %v7875_v37 = vld [vmem:[#allocation9 + $0x4f0] sm:$0xf0] }
 0x3c5   :  { %4521 = vmatmul.bf16.vlgmr.msra.gmra.mxu3 %v8422_v18  ;;  %4535 = vmatmul.bf16.vlgmr.msra.gmra.mxu1 %v8424_v61  ;;  %v3031_v12 = vadd.f32 %v3030_v2, %v2639_v4  ;;  %v3059_v13 = vadd.f32 %v3058_v3, %v2640_v5  ;;  %v7085_v0 = vor.u32 %v7875_v37, %v7084_v56  ;;  %v6720_v2 = vld [vmem:[#allocation9 + $0x200] sm:$0xf]  ;;  %v7784_v3 = vld [vmem:[#allocation9 + $0x218] sm:$0xf0] }
 0x3c6   :  { %4625 = vmatpush.bf16.msra.mxu3 %v6665_v57  ;;  %4639 = vmatpush.bf16.msra.mxu1 %v6889_v42  ;;  %v7308_v57 = vld [vmem:[#allocation9 + $0x698] sm:$0xf]  ;;  %v7931_v42 = vld [vmem:[#allocation9 + $0x6b0] sm:$0xf0]  ;;  %v6721_v10 = vor.u32 %v7784_v3, %v6720_v2  ;;  %v6944_v56 = vld [vmem:[#allocation9 + $0x3c0] sm:$0xf] }
 0x3c7   :  { %v3045_v55 = vadd.f32 %v3044_v59, %v3031_v12  ;;  %v3073_v20 = vadd.f32 %v3072_v62, %v3059_v13  ;;  %v6749_v59 = vor.u32 %v7791_v60, %v6748_v53  ;;  %v6496_v62 = vld [vmem:[#allocation9 + $0x40] sm:$0xf]  ;;  %v7309_v1 = vor.u32 %v7931_v42, %v7308_v57  ;;  %v6692_v12 = vld [vmem:[#allocation9 + $0x1c8] sm:$0xf]  ;;  %v7840_v37 = vld [vmem:[#allocation9 + $0x3d8] sm:$0xf0] }
 0x3c8   :  { %v6497_v7 = vor.u32 %v7728_v63, %v6496_v62  ;;  %v6613_v57 = vor.u32 %v7753_v48, %v6610_v49  ;;  %v7746_v62 = vld [vmem:[#allocation9 + $0xec] sm:$0xf]  ;;  %v6582_v63 = vld [vmem:[#allocation9 + $0x104] sm:$0xf0]  ;;  %v6945_v2 = vor.u32 %v7840_v37, %v6944_v56 }
 0x3c9   :  { %v3079_v39 = vmax.f32 %v3045_v55, 0.0  ;;  %v3080_v33 = vmax.f32 %v3073_v20, 0.0  ;;  %v7823_v55 = vld [vmem:[#allocation9 + $0x354] sm:$0xf]  ;;  %v6890_v20 = vld [vmem:[#allocation9 + $0x36c] sm:$0xf0] }
 0x3ca   :  { %4626 = vmatpush.bf16.msra.mxu3 %v6637_v6  ;;  %4640 = vmatpush.bf16.msra.mxu1 %v6861_v9  ;;  %v7280_v6 = vld [vmem:[#allocation9 + $0x660] sm:$0xf]  ;;  %v7924_v9 = vld [vmem:[#allocation9 + $0x678] sm:$0xf0]  ;;  %v7718_v48 = vld [vmem:[#allocation9 + $0xc] sm:$0xf] }
 0x3cb   :  { %v6470_v49 = vld [vmem:[#allocation9 + $0x24] sm:$0xf0]  ;;  %v7858_v56 = vld [vmem:[#allocation9 + $0x46c] sm:$0xf] }
 0x3cc   :  { %v3032_v22 = vpop.f32.mrf.mxu3  ;;  %v3060_v23 = vpop.f32.mrf.mxu2  ;;  %v7030_v37 = vld [vmem:[#allocation9 + $0x484] sm:$0xf0] }
 0x3cd   :  { %v3033_v24 = vadd.f32 %v3032_v22, %v2639_v4  ;;  %v3061_v25 = vadd.f32 %v3060_v23, %v2640_v5  ;;  %v7056_v4 = vld [vmem:[#allocation9 + $0x4a0] sm:$0xf]  ;;  %v7868_v5 = vld [vmem:[#allocation9 + $0x4b8] sm:$0xf0]  ;;  %v7767_v22 = vld [vmem:[#allocation9 + $0x194] sm:$0xf] }
 0x3ce   :  { %4627 = vmatpush.bf16.msra.mxu3 %v6609_v14  ;;  %4641 = vmatpush.bf16.msra.mxu1 %v6833_v15  ;;  %v7057_v13 = vor.u32 %v7868_v5, %v7056_v4  ;;  %v7281_v14 = vor.u32 %v7924_v9, %v7280_v6  ;;  %v7777_v15 = vld [vmem:[#allocation9 + $0x1e0] sm:$0xf0]  ;;  %v6666_v23 = vld [vmem:[#allocation9 + $0x1ac] sm:$0xf0]  ;;  %v6916_v4 = vld [vmem:[#allocation9 + $0x388] sm:$0xf]  ;;  %v6585_v9 = vor.u32 %v7746_v62, %v6582_v63 }
 0x3cf   :  { %v3047_v30 = vadd.f32 %v3046_v50, %v3033_v24  ;;  %v3075_v31 = vadd.f32 %v3074_v27, %v3061_v25  ;;  %v6469_v24 = vor.u32 %v7721_v43, %v6468_v11  ;;  %v6693_v25 = vor.u32 %v7777_v15, %v6692_v12  ;;  %v7833_v5 = vld [vmem:[#allocation9 + $0x3a0] sm:$0xf0]  ;;  %v7140_v6 = vld [vmem:[#allocation9 + $0x548] sm:$0xf]  ;;  %v7739_v11 = vld [vmem:[#allocation9 + $0xb4] sm:$0xf] }
 0x3d0   :  { %v7029_v50 = vor.u32 %v7861_v17, %v7028_v16  ;;  %v7253_v27 = vor.u32 %v7917_v21, %v7252_v19  ;;  %v6669_v26 = vor.u32 %v7767_v22, %v6666_v23  ;;  %v6554_v43 = vld [vmem:[#allocation9 + $0xcc] sm:$0xf0]  ;;  %v7795_v12 = vld [vmem:[#allocation9 + $0x274] sm:$0xf]  ;;  %v6917_v19 = vor.u32 %v7833_v5, %v6916_v4  ;;  %v6896_v62 = vld [vmem:[#allocation9 + $0x358] sm:$0xf] }
 0x3d1   :  { %v3083_v40 = vmax.f32 %v3047_v30, 0.0  ;;  %v3084_v41 = vmax.f32 %v3075_v31, 0.0  ;;  %v6893_v30 = vor.u32 %v7823_v55, %v6890_v20  ;;  %v7224_v31 = vld [vmem:[#allocation9 + $0x5f0] sm:$0xf]  ;;  %v7935_v16 = vld [vmem:[#allocation9 + $0x6d4] sm:$0xf]  ;;  %v6557_v22 = vor.u32 %v7739_v11, %v6554_v43 }
 0x3d2   :  { %4628 = vmatpush.bf16.msra.mxu3 %v6581_v28  ;;  %4642 = vmatpush.bf16.msra.mxu1 %v6805_v29  ;;  %v7000_v28 = vld [vmem:[#allocation9 + $0x430] sm:$0xf]  ;;  %v7854_v29 = vld [vmem:[#allocation9 + $0x448] sm:$0xf0]  ;;  %v7732_v55 = vld [vmem:[#allocation9 + $0x7c] sm:$0xf] }
 0x3d3   :  { %v8430_v44 = vpack.c.bf16 %v3083_v40, %v3079_v39  ;;  %v8432_v45 = vpack.c.bf16 %v3084_v41, %v3080_v33  ;;  %v7001_v38 = vor.u32 %v7854_v29, %v7000_v28  ;;  %v7225_v39 = vor.u32 %v7910_v32, %v7224_v31  ;;  %v6972_v33 = vld [vmem:[#allocation9 + $0x3f8] sm:$0xf]  ;;  %v7847_v40 = vld [vmem:[#allocation9 + $0x410] sm:$0xf0]  ;;  %v7114_v15 = vld [vmem:[#allocation9 + $0x52c] sm:$0xf0] }
 0x3d4   :  { %v6641_v41 = vor.u32 %v7760_v8, %v6638_v34  ;;  %v6973_v53 = vor.u32 %v7847_v40, %v6972_v33  ;;  %v7338_v17 = vld [vmem:[#allocation9 + $0x6ec] sm:$0xf0]  ;;  %v6526_v20 = vld [vmem:[#allocation9 + $0x94] sm:$0xf0]  ;;  %v7872_v28 = vld [vmem:[#allocation9 + $0x4dc] sm:$0xf] }
 0x3d5   :  { %4549 = vmatmul.bf16.vlgmr.msra.gmra.mxu2 %v8430_v44  ;;  %4563 = vmatmul.bf16.vlgmr.msra.gmra.mxu0 %v8432_v45  ;;  %v7086_v29 = vld [vmem:[#allocation9 + $0x4f4] sm:$0xf0]  ;;  %v6529_v31 = vor.u32 %v7732_v55, %v6526_v20  ;;  %v7725_v8 = vld [vmem:[#allocation9 + $0x44] sm:$0xf]  ;;  %v6498_v34 = vld [vmem:[#allocation9 + $0x5c] sm:$0xf0] }
 0x3d6   :  { %4577 = vmatmul.bf16.vlgmr.msrb.gmra.mxu3 %v8422_v18  ;;  %4591 = vmatmul.bf16.vlgmr.msrb.gmra.mxu1 %v8424_v61  ;;  %v7089_v35 = vor.u32 %v7872_v28, %v7086_v29  ;;  %v7865_v33 = vld [vmem:[#allocation9 + $0x4a4] sm:$0xf]  ;;  %v7058_v40 = vld [vmem:[#allocation9 + $0x4bc] sm:$0xf0]  ;;  %v7827_v63 = vld [vmem:[#allocation9 + $0x370] sm:$0xf0] }
 0x3d7   :  { %4629 = vmatpush.bf16.msra.mxu3 %v6553_v46  ;;  %4643 = vmatpush.bf16.msra.mxu1 %v6777_v47  ;;  %v7196_v46 = vld [vmem:[#allocation9 + $0x5b8] sm:$0xf]  ;;  %v7903_v47 = vld [vmem:[#allocation9 + $0x5d0] sm:$0xf0]  ;;  %v7002_v5 = vld [vmem:[#allocation9 + $0x44c] sm:$0xf0] }
 0x3d8   :  { %4653 = vmatpush.bf16.msra.mxu2 %v7113_v51  ;;  %4667 = vmatpush.bf16.msra.mxu0 %v7337_v52  ;;  %v7809_v51 = vld [vmem:[#allocation9 + $0x2e4] sm:$0xf]  ;;  %v6834_v52 = vld [vmem:[#allocation9 + $0x2fc] sm:$0xf0]  ;;  %v7197_v60 = vor.u32 %v7903_v47, %v7196_v46  ;;  %v6501_v46 = vor.u32 %v7725_v8, %v6498_v34  ;;  %v7851_v4 = vld [vmem:[#allocation9 + $0x434] sm:$0xf] }
 0x3d9   :  { %v6837_v42 = vor.u32 %v7809_v51, %v6834_v52  ;;  %v7774_v51 = vld [vmem:[#allocation9 + $0x1cc] sm:$0xf]  ;;  %v7061_v52 = vor.u32 %v7865_v33, %v7058_v40  ;;  %v6644_v11 = vld [vmem:[#allocation9 + $0x160] sm:$0xf]  ;;  %v7764_v43 = vld [vmem:[#allocation9 + $0x178] sm:$0xf0] }
 0x3da   :  { %v6616_v55 = vld [vmem:[#allocation9 + $0x128] sm:$0xf]  ;;  %v7757_v20 = vld [vmem:[#allocation9 + $0x140] sm:$0xf0]  ;;  %v6946_v29 = vld [vmem:[#allocation9 + $0x3dc] sm:$0xf0] }
 0x3db   :  { %4630 = vmatpush.bf16.msra.mxu3 %v6525_v58  ;;  %4644 = vmatpush.bf16.msra.mxu1 %v6749_v59  ;;  %v7168_v58 = vld [vmem:[#allocation9 + $0x580] sm:$0xf]  ;;  %v7896_v59 = vld [vmem:[#allocation9 + $0x598] sm:$0xf0]  ;;  %v7837_v28 = vld [vmem:[#allocation9 + $0x3c4] sm:$0xf] }
 0x3dc   :  { %4654 = vmatpush.bf16.msra.mxu2 %v7085_v0  ;;  %4668 = vmatpush.bf16.msra.mxu0 %v7309_v1  ;;  %v7802_v0 = vld [vmem:[#allocation9 + $0x2ac] sm:$0xf]  ;;  %v6806_v1 = vld [vmem:[#allocation9 + $0x2c4] sm:$0xf0]  ;;  %v7169_v3 = vor.u32 %v7896_v59, %v7168_v58  ;;  %v6672_v58 = vld [vmem:[#allocation9 + $0x198] sm:$0xf] }
 0x3dd   :  { %v7771_v59 = vld [vmem:[#allocation9 + $0x1b0] sm:$0xf0]  ;;  %v6588_v8 = vld [vmem:[#allocation9 + $0xf0] sm:$0xf]  ;;  %v7750_v34 = vld [vmem:[#allocation9 + $0x108] sm:$0xf0] }
 0x3de   :  { %v7830_v33 = vld [vmem:[#allocation9 + $0x38c] sm:$0xf]  ;;  %v6918_v40 = vld [vmem:[#allocation9 + $0x3a4] sm:$0xf0] }
 0x3df   :  { %4631 = vmatpush.bf16.msra.mxu3 %v6497_v7  ;;  %4645 = vmatpush.bf16.msra.mxu1 %v6721_v10  ;;  %v6809_v7 = vor.u32 %v7802_v0, %v6806_v1  ;;  %v7889_v10 = vld [vmem:[#allocation9 + $0x560] sm:$0xf0]  ;;  %v6473_v0 = vor.u32 %v7718_v48, %v6470_v49  ;;  %v6560_v48 = vld [vmem:[#allocation9 + $0xb8] sm:$0xf]  ;;  %v7743_v49 = vld [vmem:[#allocation9 + $0xd0] sm:$0xf0] }
 0x3e0   :  { %4655 = vmatpush.bf16.msra.mxu2 %v7057_v13  ;;  %4669 = vmatpush.bf16.msra.mxu0 %v7281_v14  ;;  %v6778_v13 = vld [vmem:[#allocation9 + $0x28c] sm:$0xf0]  ;;  %v7879_v14 = vld [vmem:[#allocation9 + $0x514] sm:$0xf]  ;;  %v7141_v21 = vor.u32 %v7889_v10, %v7140_v6  ;;  %v6673_v6 = vor.u32 %v7771_v59, %v6672_v58  ;;  %v6561_v58 = vor.u32 %v7743_v49, %v6560_v48  ;;  %v7761_v48 = vld [vmem:[#allocation9 + $0x164] sm:$0xf] }
 0x3e1   :  { %v6781_v23 = vor.u32 %v7795_v12, %v6778_v13  ;;  %v7226_v10 = vld [vmem:[#allocation9 + $0x60c] sm:$0xf0]  ;;  %v6868_v12 = vld [vmem:[#allocation9 + $0x320] sm:$0xf]  ;;  %v7820_v13 = vld [vmem:[#allocation9 + $0x338] sm:$0xf0] }
 0x3e2   :  { %v6646_v49 = vld [vmem:[#allocation9 + $0x17c] sm:$0xf0] }
 0x3e3   :  { %4632 = vmatpush.bf16.msra.mxu3 %v6469_v24  ;;  %4646 = vmatpush.bf16.msra.mxu1 %v6693_v25  ;;  %v7117_v24 = vor.u32 %v7879_v14, %v7114_v15  ;;  %v7341_v25 = vor.u32 %v7935_v16, %v7338_v17  ;;  %v7005_v14 = vor.u32 %v7851_v4, %v7002_v5  ;;  %v7844_v16 = vld [vmem:[#allocation9 + $0x3fc] sm:$0xf]  ;;  %v6974_v17 = vld [vmem:[#allocation9 + $0x414] sm:$0xf0]  ;;  %v7092_v4 = vld [vmem:[#allocation9 + $0x4e0] sm:$0xf] }
 0x3e4   :  { %4656 = vmatpush.bf16.msra.mxu2 %v7029_v50  ;;  %4670 = vmatpush.bf16.msra.mxu0 %v7253_v27  ;;  %v7788_v50 = vld [vmem:[#allocation9 + $0x23c] sm:$0xf]  ;;  %v6750_v27 = vld [vmem:[#allocation9 + $0x254] sm:$0xf0] }
 0x3e5   :  { %4605 = vmatmul.bf16.vlgmr.msrb.gmra.mxu2 %v8430_v44  ;;  %4619 = vmatmul.bf16.vlgmr.msrb.gmra.mxu0 %v8432_v45  ;;  %v6753_v32 = vor.u32 %v7788_v50, %v6750_v27  ;;  %v6977_v50 = vor.u32 %v7844_v16, %v6974_v17  ;;  %v7876_v5 = vld [vmem:[#allocation9 + $0x4f8] sm:$0xf0]  ;;  %v7064_v16 = vld [vmem:[#allocation9 + $0x4a8] sm:$0xf]  ;;  %v7869_v17 = vld [vmem:[#allocation9 + $0x4c0] sm:$0xf0] }
 0x3e6   :  { %4633 = vmatmul.bf16.vlgmr.msra.gmra.mxu3 %v8422_v18  ;;  %4647 = vmatmul.bf16.vlgmr.msra.gmra.mxu1 %v8424_v61 }
 0x3e7   :  { %4681 = vmatpush.bf16.msrb.mxu3 %v6669_v26  ;;  %4695 = vmatpush.bf16.msrb.mxu1 %v6893_v30  ;;  %v7928_v26 = vld [vmem:[#allocation9 + $0x69c] sm:$0xf]  ;;  %v7310_v30 = vld [vmem:[#allocation9 + $0x6b4] sm:$0xf0] }
 0x3e8   :  { %4657 = vmatpush.bf16.msra.mxu2 %v7001_v38  ;;  %4671 = vmatpush.bf16.msra.mxu0 %v7225_v39  ;;  %v7313_v36 = vor.u32 %v7928_v26, %v7310_v30  ;;  %v7781_v38 = vld [vmem:[#allocation9 + $0x204] sm:$0xf]  ;;  %v6722_v39 = vld [vmem:[#allocation9 + $0x21c] sm:$0xf0]  ;;  %v6617_v26 = vor.u32 %v7757_v20, %v6616_v55  ;;  %v6476_v55 = vld [vmem:[#allocation9 + $0x10] sm:$0xf] }
 0x3e9   :  { %v6725_v47 = vor.u32 %v7781_v38, %v6722_v39  ;;  %v6949_v38 = vor.u32 %v7837_v28, %v6946_v29  ;;  %v7722_v20 = vld [vmem:[#allocation9 + $0x28] sm:$0xf0]  ;;  %v7036_v28 = vld [vmem:[#allocation9 + $0x470] sm:$0xf] }
 0x3ea   :  { %v7862_v29 = vld [vmem:[#allocation9 + $0x488] sm:$0xf0] }
 0x3eb   :  { %4682 = vmatpush.bf16.msrb.mxu3 %v6641_v41  ;;  %4696 = vmatpush.bf16.msrb.mxu1 %v6865_v54  ;;  %v7921_v41 = vld [vmem:[#allocation9 + $0x664] sm:$0xf]  ;;  %v7282_v54 = vld [vmem:[#allocation9 + $0x67c] sm:$0xf0] }
 0x3ec   :  { %4658 = vmatpush.bf16.msra.mxu2 %v6973_v53  ;;  %4672 = vmatpush.bf16.msra.mxu0 %v7197_v60  ;;  %v7285_v53 = vor.u32 %v7921_v41, %v7282_v54  ;;  %v6694_v60 = vld [vmem:[#allocation9 + $0x1e4] sm:$0xf0]  ;;  %v7886_v41 = vld [vmem:[#allocation9 + $0x54c] sm:$0xf]  ;;  %v6589_v54 = vor.u32 %v7750_v34, %v6588_v8  ;;  %v7824_v8 = vld [vmem:[#allocation9 + $0x35c] sm:$0xf] }
 0x3ed   :  { %v6697_v1 = vor.u32 %v7774_v51, %v6694_v60  ;;  %v6784_v51 = vld [vmem:[#allocation9 + $0x278] sm:$0xf]  ;;  %v7883_v60 = vld [vmem:[#allocation9 + $0x530] sm:$0xf0] }
 0x3ee   :  { %v6898_v34 = vld [vmem:[#allocation9 + $0x374] sm:$0xf0] }
 0x3ef   :  { %4683 = vmatpush.bf16.msrb.mxu3 %v6613_v57  ;;  %4697 = vmatpush.bf16.msrb.mxu1 %v6837_v42  ;;  %v7914_v57 = vld [vmem:[#allocation9 + $0x62c] sm:$0xf]  ;;  %v7254_v42 = vld [vmem:[#allocation9 + $0x644] sm:$0xf0] }
 0x3f0   :  { %4659 = vmatpush.bf16.msra.mxu2 %v6945_v2  ;;  %4673 = vmatpush.bf16.msra.mxu0 %v7169_v3  ;;  %v7033_v2 = vor.u32 %v7858_v56, %v7030_v37  ;;  %v7257_v3 = vor.u32 %v7914_v57, %v7254_v42  ;;  %v7344_v56 = vld [vmem:[#allocation9 + $0x6d8] sm:$0xf]  ;;  %v7939_v37 = vld [vmem:[#allocation9 + $0x6f0] sm:$0xf0]  ;;  %v6921_v57 = vor.u32 %v7830_v33, %v6918_v40 }
 0x3f1   :  { %v7008_v33 = vld [vmem:[#allocation9 + $0x438] sm:$0xf]  ;;  %v7855_v40 = vld [vmem:[#allocation9 + $0x450] sm:$0xf0] }
 0x3f3   :  { %4684 = vmatpush.bf16.msrb.mxu3 %v6585_v9  ;;  %4698 = vmatpush.bf16.msrb.mxu1 %v6809_v7  ;;  %v6897_v9 = vor.u32 %v7827_v63, %v6896_v62  ;;  %v7907_v7 = vld [vmem:[#allocation9 + $0x5f4] sm:$0xf]  ;;  %v6532_v62 = vld [vmem:[#allocation9 + $0x80] sm:$0xf]  ;;  %v7736_v63 = vld [vmem:[#allocation9 + $0x98] sm:$0xf0] }
 0x3f4   :  { %4660 = vmatpush.bf16.msra.mxu2 %v6917_v19  ;;  %4674 = vmatpush.bf16.msra.mxu0 %v7141_v21  ;;  %v7229_v15 = vor.u32 %v7907_v7, %v7226_v10  ;;  %v6645_v19 = vor.u32 %v7764_v43, %v6644_v11  ;;  %v6869_v21 = vor.u32 %v7820_v13, %v6868_v12  ;;  %v6504_v11 = vld [vmem:[#allocation9 + $0x48] sm:$0xf]  ;;  %v7729_v43 = vld [vmem:[#allocation9 + $0x60] sm:$0xf0] }
 0x3f5   :  { %v6533_v7 = vor.u32 %v7736_v63, %v6532_v62  ;;  %v7093_v12 = vor.u32 %v7876_v5, %v7092_v4  ;;  %v7754_v62 = vld [vmem:[#allocation9 + $0x12c] sm:$0xf]  ;;  %v6618_v63 = vld [vmem:[#allocation9 + $0x144] sm:$0xf0]  ;;  %v7841_v5 = vld [vmem:[#allocation9 + $0x3e0] sm:$0xf0] }
 0x3f6   :  { %v6952_v4 = vld [vmem:[#allocation9 + $0x3c8] sm:$0xf] }
 0x3f7   :  { %4685 = vmatpush.bf16.msrb.mxu3 %v6557_v22  ;;  %4699 = vmatpush.bf16.msrb.mxu1 %v6781_v23  ;;  %v7900_v22 = vld [vmem:[#allocation9 + $0x5bc] sm:$0xf]  ;;  %v7198_v23 = vld [vmem:[#allocation9 + $0x5d4] sm:$0xf0] }
 0x3f8   :  { %4709 = vmatpush.bf16.msrb.mxu2 %v7117_v24  ;;  %4723 = vmatpush.bf16.msrb.mxu0 %v7341_v25  ;;  %v6840_v24 = vld [vmem:[#allocation9 + $0x2e8] sm:$0xf]  ;;  %v7813_v25 = vld [vmem:[#allocation9 + $0x300] sm:$0xf0]  ;;  %v7201_v27 = vor.u32 %v7900_v22, %v7198_v23  ;;  %v6505_v22 = vor.u32 %v7729_v43, %v6504_v11  ;;  %v7747_v11 = vld [vmem:[#allocation9 + $0xf4] sm:$0xf] }
 0x3f9   :  { %4661 = vmatmul.bf16.vlgmr.msra.gmra.mxu2 %v8430_v44  ;;  %4675 = vmatmul.bf16.vlgmr.msra.gmra.mxu0 %v8432_v45  ;;  %v6841_v30 = vor.u32 %v7813_v25, %v6840_v24  ;;  %v6700_v24 = vld [vmem:[#allocation9 + $0x1d0] sm:$0xf]  ;;  %v7065_v25 = vor.u32 %v7869_v17, %v7064_v16  ;;  %v7834_v17 = vld [vmem:[#allocation9 + $0x3a8] sm:$0xf0] }
 0x3fa   :  { %v6590_v43 = vld [vmem:[#allocation9 + $0x10c] sm:$0xf0] }
 0x3fb   :  { %4686 = vmatpush.bf16.msrb.mxu3 %v6529_v31  ;;  %4700 = vmatpush.bf16.msrb.mxu1 %v6753_v32  ;;  %v7893_v31 = vld [vmem:[#allocation9 + $0x584] sm:$0xf]  ;;  %v7170_v32 = vld [vmem:[#allocation9 + $0x59c] sm:$0xf0]  ;;  %v6924_v16 = vld [vmem:[#allocation9 + $0x390] sm:$0xf] }
 0x3fc   :  { %4710 = vmatpush.bf16.msrb.mxu2 %v7089_v35  ;;  %4724 = vmatpush.bf16.msrb.mxu0 %v7313_v36  ;;  %v6812_v35 = vld [vmem:[#allocation9 + $0x2b0] sm:$0xf]  ;;  %v7806_v36 = vld [vmem:[#allocation9 + $0x2c8] sm:$0xf0]  ;;  %v7173_v39 = vor.u32 %v7893_v31, %v7170_v32  ;;  %v7768_v31 = vld [vmem:[#allocation9 + $0x19c] sm:$0xf] }
 0x3fd   :  { %v6674_v32 = vld [vmem:[#allocation9 + $0x1b4] sm:$0xf0] }
 0x3ff   :  { %4687 = vmatpush.bf16.msrb.mxu3 %v6501_v46  ;;  %4701 = vmatpush.bf16.msrb.mxu1 %v6725_v47  ;;  %v6813_v46 = vor.u32 %v7806_v36, %v6812_v35  ;;  %v7142_v47 = vld [vmem:[#allocation9 + $0x564] sm:$0xf0]  ;;  %v6477_v35 = vor.u32 %v7722_v20, %v6476_v55  ;;  %v7740_v55 = vld [vmem:[#allocation9 + $0xbc] sm:$0xf]  ;;  %v6562_v20 = vld [vmem:[#allocation9 + $0xd4] sm:$0xf0] }
 0x400   :  { %4711 = vmatpush.bf16.msrb.mxu2 %v7061_v52  ;;  %4725 = vmatpush.bf16.msrb.mxu0 %v7285_v53  ;;  %v7799_v52 = vld [vmem:[#allocation9 + $0x290] sm:$0xf0]  ;;  %v7120_v53 = vld [vmem:[#allocation9 + $0x518] sm:$0xf]  ;;  %v7145_v42 = vor.u32 %v7886_v41, %v7142_v47  ;;  %v6677_v41 = vor.u32 %v7768_v31, %v6674_v32  ;;  %v6565_v31 = vor.u32 %v7740_v55, %v6562_v20  ;;  %v6652_v55 = vld [vmem:[#allocation9 + $0x168] sm:$0xf] }
 0x401   :  { %v6785_v59 = vor.u32 %v7799_v52, %v6784_v51  ;;  %v7911_v47 = vld [vmem:[#allocation9 + $0x610] sm:$0xf0]  ;;  %v7817_v51 = vld [vmem:[#allocation9 + $0x324] sm:$0xf]  ;;  %v6870_v52 = vld [vmem:[#allocation9 + $0x33c] sm:$0xf0] }
 0x402   :  { %v7765_v20 = vld [vmem:[#allocation9 + $0x180] sm:$0xf0] }
 0x403   :  { %4688 = vmatpush.bf16.msrb.mxu3 %v6473_v0  ;;  %4702 = vmatpush.bf16.msrb.mxu1 %v6697_v1  ;;  %v7121_v0 = vor.u32 %v7883_v60, %v7120_v53  ;;  %v7345_v1 = vor.u32 %v7939_v37, %v7344_v56  ;;  %v7009_v53 = vor.u32 %v7855_v40, %v7008_v33  ;;  %v6980_v56 = vld [vmem:[#allocation9 + $0x400] sm:$0xf]  ;;  %v7848_v37 = vld [vmem:[#allocation9 + $0x418] sm:$0xf0]  ;;  %v7873_v33 = vld [vmem:[#allocation9 + $0x4e4] sm:$0xf] }
 0x404   :  { %4712 = vmatpush.bf16.msrb.mxu2 %v7033_v2  ;;  %4726 = vmatpush.bf16.msrb.mxu0 %v7257_v3  ;;  %v6756_v2 = vld [vmem:[#allocation9 + $0x240] sm:$0xf]  ;;  %v7792_v3 = vld [vmem:[#allocation9 + $0x258] sm:$0xf0] }
 0x405   :  { %v6757_v10 = vor.u32 %v7792_v3, %v6756_v2  ;;  %v6981_v2 = vor.u32 %v7848_v37, %v6980_v56  ;;  %v7094_v40 = vld [vmem:[#allocation9 + $0x4fc] sm:$0xf0]  ;;  %v7866_v56 = vld [vmem:[#allocation9 + $0x4ac] sm:$0xf]  ;;  %v7066_v37 = vld [vmem:[#allocation9 + $0x4c4] sm:$0xf0] }
 0x406   :  { %4689 = vmatmul.bf16.vlgmr.msrb.gmra.mxu3 %v8422_v18  ;;  %4703 = vmatmul.bf16.vlgmr.msrb.gmra.mxu1 %v8424_v61 }
 0x407   :  { %4737 = vmatpush.bf16.msra.mxu3 %v6673_v6  ;;  %4751 = vmatpush.bf16.msra.mxu1 %v6897_v9  ;;  %v7316_v6 = vld [vmem:[#allocation9 + $0x6a0] sm:$0xf]  ;;  %v7932_v9 = vld [vmem:[#allocation9 + $0x6b8] sm:$0xf0] }
 0x408   :  { %4713 = vmatpush.bf16.msrb.mxu2 %v7005_v14  ;;  %4727 = vmatpush.bf16.msrb.mxu0 %v7229_v15  ;;  %v7317_v13 = vor.u32 %v7932_v9, %v7316_v6  ;;  %v6728_v14 = vld [vmem:[#allocation9 + $0x208] sm:$0xf]  ;;  %v7785_v15 = vld [vmem:[#allocation9 + $0x220] sm:$0xf0]  ;;  %v6621_v6 = vor.u32 %v7754_v62, %v6618_v63  ;;  %v7719_v62 = vld [vmem:[#allocation9 + $0x14] sm:$0xf] }
 0x409   :  { %v6729_v23 = vor.u32 %v7785_v15, %v6728_v14  ;;  %v6953_v14 = vor.u32 %v7841_v5, %v6952_v4  ;;  %v6478_v63 = vld [vmem:[#allocation9 + $0x2c] sm:$0xf0]  ;;  %v7859_v4 = vld [vmem:[#allocation9 + $0x474] sm:$0xf] }
 0x40a   :  { %v7038_v5 = vld [vmem:[#allocation9 + $0x48c] sm:$0xf0] }
 0x40b   :  { %4738 = vmatpush.bf16.msra.mxu3 %v6645_v19  ;;  %4752 = vmatpush.bf16.msra.mxu1 %v6869_v21  ;;  %v7288_v19 = vld [vmem:[#allocation9 + $0x668] sm:$0xf]  ;;  %v7925_v21 = vld [vmem:[#allocation9 + $0x680] sm:$0xf0] }
 0x40c   :  { %4714 = vmatpush.bf16.msrb.mxu2 %v6977_v50  ;;  %4728 = vmatpush.bf16.msrb.mxu0 %v7201_v27  ;;  %v7289_v50 = vor.u32 %v7925_v21, %v7288_v19  ;;  %v7778_v27 = vld [vmem:[#allocation9 + $0x1e8] sm:$0xf0]  ;;  %v7148_v19 = vld [vmem:[#allocation9 + $0x550] sm:$0xf]  ;;  %v6593_v21 = vor.u32 %v7747_v11, %v6590_v43  ;;  %v6904_v11 = vld [vmem:[#allocation9 + $0x360] sm:$0xf] }
 0x40d   :  { %v6701_v36 = vor.u32 %v7778_v27, %v6700_v24  ;;  %v7796_v24 = vld [vmem:[#allocation9 + $0x27c] sm:$0xf]  ;;  %v7122_v27 = vld [vmem:[#allocation9 + $0x534] sm:$0xf0] }
 0x40e   :  { %v7828_v43 = vld [vmem:[#allocation9 + $0x378] sm:$0xf0] }
 0x40f   :  { %4739 = vmatpush.bf16.msra.mxu3 %v6617_v26  ;;  %4753 = vmatpush.bf16.msra.mxu1 %v6841_v30  ;;  %v7260_v26 = vld [vmem:[#allocation9 + $0x630] sm:$0xf]  ;;  %v7918_v30 = vld [vmem:[#allocation9 + $0x648] sm:$0xf0] }
 0x410   :  { %4715 = vmatpush.bf16.msrb.mxu2 %v6949_v38  ;;  %4729 = vmatpush.bf16.msrb.mxu0 %v7173_v39  ;;  %v7037_v38 = vor.u32 %v7862_v29, %v7036_v28  ;;  %v7261_v39 = vor.u32 %v7918_v30, %v7260_v26  ;;  %v7936_v28 = vld [vmem:[#allocation9 + $0x6dc] sm:$0xf]  ;;  %v7346_v29 = vld [vmem:[#allocation9 + $0x6f4] sm:$0xf0]  ;;  %v6925_v26 = vor.u32 %v7834_v17, %v6924_v16 }
 0x411   :  { %v7852_v16 = vld [vmem:[#allocation9 + $0x43c] sm:$0xf]  ;;  %v7010_v17 = vld [vmem:[#allocation9 + $0x454] sm:$0xf0] }
 0x413   :  { %4740 = vmatpush.bf16.msra.mxu3 %v6589_v54  ;;  %4754 = vmatpush.bf16.msra.mxu1 %v6813_v46  ;;  %v6901_v54 = vor.u32 %v7824_v8, %v6898_v34  ;;  %v7232_v46 = vld [vmem:[#allocation9 + $0x5f8] sm:$0xf]  ;;  %v7733_v8 = vld [vmem:[#allocation9 + $0x84] sm:$0xf]  ;;  %v6534_v34 = vld [vmem:[#allocation9 + $0x9c] sm:$0xf0] }
 0x414   :  { %4716 = vmatpush.bf16.msrb.mxu2 %v6921_v57  ;;  %4730 = vmatpush.bf16.msrb.mxu0 %v7145_v42  ;;  %v7233_v60 = vor.u32 %v7911_v47, %v7232_v46  ;;  %v6649_v57 = vor.u32 %v7761_v48, %v6646_v49  ;;  %v6873_v42 = vor.u32 %v7817_v51, %v6870_v52  ;;  %v7726_v48 = vld [vmem:[#allocation9 + $0x4c] sm:$0xf]  ;;  %v6506_v49 = vld [vmem:[#allocation9 + $0x64] sm:$0xf0] }
 0x415   :  { %v6537_v46 = vor.u32 %v7733_v8, %v6534_v34  ;;  %v7097_v51 = vor.u32 %v7873_v33, %v7094_v40  ;;  %v6624_v8 = vld [vmem:[#allocation9 + $0x130] sm:$0xf]  ;;  %v7758_v34 = vld [vmem:[#allocation9 + $0x148] sm:$0xf0]  ;;  %v6954_v40 = vld [vmem:[#allocation9 + $0x3e4] sm:$0xf0] }
 0x416   :  { %v7838_v33 = vld [vmem:[#allocation9 + $0x3cc] sm:$0xf] }
 0x417   :  { %4741 = vmatpush.bf16.msra.mxu3 %v6561_v58  ;;  %4755 = vmatpush.bf16.msra.mxu1 %v6785_v59  ;;  %v7204_v58 = vld [vmem:[#allocation9 + $0x5c0] sm:$0xf]  ;;  %v7904_v59 = vld [vmem:[#allocation9 + $0x5d8] sm:$0xf0] }
 0x418   :  { %4765 = vmatpush.bf16.msra.mxu2 %v7121_v0  ;;  %4779 = vmatpush.bf16.msra.mxu0 %v7345_v1  ;;  %v7810_v0 = vld [vmem:[#allocation9 + $0x2ec] sm:$0xf]  ;;  %v6842_v1 = vld [vmem:[#allocation9 + $0x304] sm:$0xf0]  ;;  %v7205_v3 = vor.u32 %v7904_v59, %v7204_v58  ;;  %v6509_v58 = vor.u32 %v7726_v48, %v6506_v49  ;;  %v6596_v48 = vld [vmem:[#allocation9 + $0xf8] sm:$0xf] }
 0x419   :  { %4717 = vmatmul.bf16.vlgmr.msrb.gmra.mxu2 %v8430_v44  ;;  %4731 = vmatmul.bf16.vlgmr.msrb.gmra.mxu0 %v8432_v45  ;;  %v6845_v9 = vor.u32 %v7810_v0, %v6842_v1  ;;  %v7775_v0 = vld [vmem:[#allocation9 + $0x1d4] sm:$0xf]  ;;  %v7069_v1 = vor.u32 %v7866_v56, %v7066_v37  ;;  %v6926_v37 = vld [vmem:[#allocation9 + $0x3ac] sm:$0xf0] }
 0x41a   :  { %v7751_v49 = vld [vmem:[#allocation9 + $0x110] sm:$0xf0] }
 0x41b   :  { %4742 = vmatpush.bf16.msra.mxu3 %v6533_v7  ;;  %4756 = vmatpush.bf16.msra.mxu1 %v6757_v10  ;;  %v7176_v7 = vld [vmem:[#allocation9 + $0x588] sm:$0xf]  ;;  %v7897_v10 = vld [vmem:[#allocation9 + $0x5a0] sm:$0xf0]  ;;  %v7831_v56 = vld [vmem:[#allocation9 + $0x394] sm:$0xf] }
 0x41c   :  { %4766 = vmatpush.bf16.msra.mxu2 %v7093_v12  ;;  %4780 = vmatpush.bf16.msra.mxu0 %v7317_v13  ;;  %v7803_v12 = vld [vmem:[#allocation9 + $0x2b4] sm:$0xf]  ;;  %v6814_v13 = vld [vmem:[#allocation9 + $0x2cc] sm:$0xf0]  ;;  %v7177_v15 = vor.u32 %v7897_v10, %v7176_v7  ;;  %v6680_v7 = vld [vmem:[#allocation9 + $0x1a0] sm:$0xf] }
 0x41d   :  { %v7772_v10 = vld [vmem:[#allocation9 + $0x1b8] sm:$0xf0] }
 0x41f   :  { %4743 = vmatpush.bf16.msra.mxu3 %v6505_v22  ;;  %4757 = vmatpush.bf16.msra.mxu1 %v6729_v23  ;;  %v6817_v22 = vor.u32 %v7803_v12, %v6814_v13  ;;  %v7890_v23 = vld [vmem:[#allocation9 + $0x568] sm:$0xf0]  ;;  %v6481_v12 = vor.u32 %v7719_v62, %v6478_v63  ;;  %v6568_v62 = vld [vmem:[#allocation9 + $0xc0] sm:$0xf]  ;;  %v7744_v63 = vld [vmem:[#allocation9 + $0xd8] sm:$0xf0] }
 0x420   :  { %4767 = vmatpush.bf16.msra.mxu2 %v7065_v25  ;;  %4781 = vmatpush.bf16.msra.mxu0 %v7289_v50  ;;  %v6786_v25 = vld [vmem:[#allocation9 + $0x294] sm:$0xf0]  ;;  %v7880_v50 = vld [vmem:[#allocation9 + $0x51c] sm:$0xf]  ;;  %v7149_v30 = vor.u32 %v7890_v23, %v7148_v19  ;;  %v6681_v19 = vor.u32 %v7772_v10, %v6680_v7  ;;  %v6569_v10 = vor.u32 %v7744_v63, %v6568_v62  ;;  %v7240_v62 = vld [vmem:[#allocation9 + $0x600] sm:$0xf] }
 0x421   :  { %v6789_v32 = vor.u32 %v7796_v24, %v6786_v25  ;;  %v7234_v23 = vld [vmem:[#allocation9 + $0x614] sm:$0xf0]  ;;  %v6876_v24 = vld [vmem:[#allocation9 + $0x328] sm:$0xf]  ;;  %v7821_v25 = vld [vmem:[#allocation9 + $0x340] sm:$0xf0] }
 0x422   :  { %v7912_v63 = vld [vmem:[#allocation9 + $0x618] sm:$0xf0] }
 0x423   :  { %4744 = vmatpush.bf16.msra.mxu3 %v6477_v35  ;;  %4758 = vmatpush.bf16.msra.mxu1 %v6701_v36  ;;  %v7125_v35 = vor.u32 %v7880_v50, %v7122_v27  ;;  %v7349_v36 = vor.u32 %v7936_v28, %v7346_v29  ;;  %v7013_v50 = vor.u32 %v7852_v16, %v7010_v17  ;;  %v7845_v28 = vld [vmem:[#allocation9 + $0x404] sm:$0xf]  ;;  %v6982_v29 = vld [vmem:[#allocation9 + $0x41c] sm:$0xf0]  ;;  %v7100_v17 = vld [vmem:[#allocation9 + $0x4e8] sm:$0xf] }
 0x424   :  { %4768 = vmatpush.bf16.msra.mxu2 %v7037_v38  ;;  %4782 = vmatpush.bf16.msra.mxu0 %v7261_v39  ;;  %v7789_v38 = vld [vmem:[#allocation9 + $0x244] sm:$0xf]  ;;  %v6758_v39 = vld [vmem:[#allocation9 + $0x25c] sm:$0xf0] }
 0x425   :  { %v6761_v47 = vor.u32 %v7789_v38, %v6758_v39  ;;  %v6985_v38 = vor.u32 %v7845_v28, %v6982_v29  ;;  %v7793_v16 = vld [vmem:[#allocation9 + $0x260] sm:$0xf0]  ;;  %v6736_v28 = vld [vmem:[#allocation9 + $0x210] sm:$0xf]  ;;  %v7786_v29 = vld [vmem:[#allocation9 + $0x228] sm:$0xf0] }
 0x426   :  { %4745 = vmatmul.bf16.vlgmr.msra.gmra.mxu3 %v8422_v18  ;;  %4759 = vmatmul.bf16.vlgmr.msra.gmra.mxu1 %v8424_v61 }
 0x427   :  { %4793 = vmatpush.bf16.msrb.mxu3 %v6677_v41  ;;  %4807 = vmatpush.bf16.msrb.mxu1 %v6901_v54  ;;  %v7929_v41 = vld [vmem:[#allocation9 + $0x6a4] sm:$0xf]  ;;  %v7318_v54 = vld [vmem:[#allocation9 + $0x6bc] sm:$0xf0] }
 0x428   :  { %4769 = vmatpush.bf16.msra.mxu2 %v7009_v53  ;;  %4783 = vmatpush.bf16.msra.mxu0 %v7233_v60  ;;  %v7321_v52 = vor.u32 %v7929_v41, %v7318_v54  ;;  %v7782_v53 = vld [vmem:[#allocation9 + $0x20c] sm:$0xf]  ;;  %v6730_v60 = vld [vmem:[#allocation9 + $0x224] sm:$0xf0]  ;;  %v6625_v41 = vor.u32 %v7758_v34, %v6624_v8 }
 0x429   :  { %v6733_v59 = vor.u32 %v7782_v53, %v6730_v60  ;;  %v6957_v53 = vor.u32 %v7838_v33, %v6954_v40  ;;  %v7926_v8 = vld [vmem:[#allocation9 + $0x688] sm:$0xf0] }
 0x42b   :  { %4794 = vmatpush.bf16.msrb.mxu3 %v6649_v57  ;;  %4808 = vmatpush.bf16.msrb.mxu1 %v6873_v42  ;;  %v7922_v57 = vld [vmem:[#allocation9 + $0x66c] sm:$0xf]  ;;  %v7290_v42 = vld [vmem:[#allocation9 + $0x684] sm:$0xf0] }
 0x42c   :  { %4770 = vmatpush.bf16.msra.mxu2 %v6981_v2  ;;  %4784 = vmatpush.bf16.msra.mxu0 %v7205_v3  ;;  %v7293_v2 = vor.u32 %v7922_v57, %v7290_v42  ;;  %v6702_v3 = vld [vmem:[#allocation9 + $0x1ec] sm:$0xf0]  ;;  %v7887_v57 = vld [vmem:[#allocation9 + $0x554] sm:$0xf]  ;;  %v6597_v42 = vor.u32 %v7751_v49, %v6596_v48 }
 0x42d   :  { %v6705_v13 = vor.u32 %v7775_v0, %v6702_v3  ;;  %v6792_v0 = vld [vmem:[#allocation9 + $0x280] sm:$0xf]  ;;  %v7884_v3 = vld [vmem:[#allocation9 + $0x538] sm:$0xf0]  ;;  %v7863_v49 = vld [vmem:[#allocation9 + $0x490] sm:$0xf0] }
 0x42f   :  { %4795 = vmatpush.bf16.msrb.mxu3 %v6621_v6  ;;  %4809 = vmatpush.bf16.msrb.mxu1 %v6845_v9  ;;  %v7915_v6 = vld [vmem:[#allocation9 + $0x634] sm:$0xf]  ;;  %v7262_v9 = vld [vmem:[#allocation9 + $0x64c] sm:$0xf0] }
 0x430   :  { %4771 = vmatpush.bf16.msra.mxu2 %v6953_v14  ;;  %4785 = vmatpush.bf16.msra.mxu0 %v7177_v15  ;;  %v7041_v14 = vor.u32 %v7859_v4, %v7038_v5  ;;  %v7265_v15 = vor.u32 %v7915_v6, %v7262_v9  ;;  %v7352_v4 = vld [vmem:[#allocation9 + $0x6e0] sm:$0xf]  ;;  %v7940_v5 = vld [vmem:[#allocation9 + $0x6f8] sm:$0xf0]  ;;  %v6929_v9 = vor.u32 %v7831_v56, %v6926_v37 }
 0x433   :  { %4796 = vmatpush.bf16.msrb.mxu3 %v6593_v21  ;;  %4810 = vmatpush.bf16.msrb.mxu1 %v6817_v22  ;;  %v6905_v21 = vor.u32 %v7828_v43, %v6904_v11  ;;  %v7908_v22 = vld [vmem:[#allocation9 + $0x5fc] sm:$0xf]  ;;  %v6540_v43 = vld [vmem:[#allocation9 + $0x88] sm:$0xf] }
 0x434   :  { %4772 = vmatpush.bf16.msra.mxu2 %v6925_v26  ;;  %4786 = vmatpush.bf16.msra.mxu0 %v7149_v30  ;;  %v7237_v27 = vor.u32 %v7908_v22, %v7234_v23  ;;  %v6653_v26 = vor.u32 %v7765_v20, %v6652_v55  ;;  %v6877_v30 = vor.u32 %v7821_v25, %v6876_v24  ;;  %v7933_v22 = vld [vmem:[#allocation9 + $0x6c0] sm:$0xf0]  ;;  %v6512_v24 = vld [vmem:[#allocation9 + $0x50] sm:$0xf]  ;;  %v7730_v25 = vld [vmem:[#allocation9 + $0x68] sm:$0xf0] }
 0x435   :  { %v8457_v23 = vld [vmem:[%s8508_s12] sm:$0xff] }
 0x436   :  { %v3347_v34 = vperm.slane %v8457_v23, 0 }
 0x437   :  { %4797 = vmatpush.bf16.msrb.mxu3 %v6565_v31  ;;  %4811 = vmatpush.bf16.msrb.mxu1 %v6789_v32  ;;  %v7901_v31 = vld [vmem:[#allocation9 + $0x5c4] sm:$0xf]  ;;  %v7206_v32 = vld [vmem:[#allocation9 + $0x5dc] sm:$0xf0] }
 0x438   :  { %4821 = vmatpush.bf16.msrb.mxu2 %v7125_v35  ;;  %4835 = vmatpush.bf16.msrb.mxu0 %v7349_v36  ;;  %v6848_v35 = vld [vmem:[#allocation9 + $0x2f0] sm:$0xf]  ;;  %v7814_v36 = vld [vmem:[#allocation9 + $0x308] sm:$0xf0]  ;;  %v7209_v39 = vor.u32 %v7901_v31, %v7206_v32 }
 0x439   :  { %4773 = vmatmul.bf16.vlgmr.msra.gmra.mxu2 %v8430_v44  ;;  %4787 = vmatmul.bf16.vlgmr.msra.gmra.mxu0 %v8432_v45  ;;  %v6849_v54 = vor.u32 %v7814_v36, %v6848_v35  ;;  %v7870_v31 = vld [vmem:[#allocation9 + $0x4c8] sm:$0xf0]  ;;  %v7296_v32 = vld [vmem:[#allocation9 + $0x670] sm:$0xf]  ;;  %v6513_v35 = vor.u32 %v7730_v25, %v6512_v24  ;;  %v6737_v36 = vor.u32 %v7786_v29, %v6736_v28  ;;  %v6932_v24 = vld [vmem:[#allocation9 + $0x398] sm:$0xf] }
 0x43a   :  { %v7156_v28 = vld [vmem:[#allocation9 + $0x558] sm:$0xf]  ;;  %v7891_v29 = vld [vmem:[#allocation9 + $0x570] sm:$0xf0] }
 0x43b   :  { %4798 = vmatpush.bf16.msrb.mxu3 %v6537_v46  ;;  %4812 = vmatpush.bf16.msrb.mxu1 %v6761_v47  ;;  %v7894_v46 = vld [vmem:[#allocation9 + $0x58c] sm:$0xf]  ;;  %v7178_v47 = vld [vmem:[#allocation9 + $0x5a4] sm:$0xf0] }
 0x43c   :  { %4822 = vmatpush.bf16.msrb.mxu2 %v7097_v51  ;;  %4836 = vmatpush.bf16.msrb.mxu0 %v7321_v52  ;;  %v6820_v51 = vld [vmem:[#allocation9 + $0x2b8] sm:$0xf]  ;;  %v7807_v52 = vld [vmem:[#allocation9 + $0x2d0] sm:$0xf0]  ;;  %v7181_v60 = vor.u32 %v7894_v46, %v7178_v47 }
 0x43d   :  { %v7779_v46 = vld [vmem:[#allocation9 + $0x1f0] sm:$0xf0]  ;;  %v7044_v47 = vld [vmem:[#allocation9 + $0x478] sm:$0xf] }
 0x43e   :  { %v7045_v37 = vor.u32 %v7863_v49, %v7044_v47 }
 0x43f   :  { %4799 = vmatpush.bf16.msrb.mxu3 %v6509_v58  ;;  %4813 = vmatpush.bf16.msrb.mxu1 %v6733_v59  ;;  %v6821_v58 = vor.u32 %v7807_v52, %v6820_v51  ;;  %v7150_v59 = vld [vmem:[#allocation9 + $0x56c] sm:$0xf0]  ;;  %v7268_v51 = vld [vmem:[#allocation9 + $0x638] sm:$0xf]  ;;  %v7919_v52 = vld [vmem:[#allocation9 + $0x650] sm:$0xf0] }
 0x440   :  { %4823 = vmatpush.bf16.msrb.mxu2 %v7069_v1  ;;  %4837 = vmatpush.bf16.msrb.mxu0 %v7293_v2  ;;  %v7800_v1 = vld [vmem:[#allocation9 + $0x298] sm:$0xf0]  ;;  %v7128_v2 = vld [vmem:[#allocation9 + $0x520] sm:$0xf]  ;;  %v7153_v7 = vor.u32 %v7887_v57, %v7150_v59  ;;  %v7269_v57 = vor.u32 %v7919_v52, %v7268_v51 }
 0x441   :  { %v6793_v11 = vor.u32 %v7800_v1, %v6792_v0  ;;  %v7856_v59 = vld [vmem:[#allocation9 + $0x458] sm:$0xf0] }
 0x443   :  { %4800 = vmatpush.bf16.msrb.mxu3 %v6481_v12  ;;  %4814 = vmatpush.bf16.msrb.mxu1 %v6705_v13  ;;  %v7737_v12 = vld [vmem:[#allocation9 + $0xa0] sm:$0xf0]  ;;  %v7129_v13 = vor.u32 %v7884_v3, %v7128_v2  ;;  %v7241_v3 = vor.u32 %v7912_v63, %v7240_v62 }
 0x444   :  { %4824 = vmatpush.bf16.msrb.mxu2 %v7041_v14  ;;  %4838 = vmatpush.bf16.msrb.mxu0 %v7265_v15  ;;  %v7353_v14 = vor.u32 %v7940_v5, %v7352_v4  ;;  %v6764_v15 = vld [vmem:[#allocation9 + $0x248] sm:$0xf]  ;;  %v6541_v55 = vor.u32 %v7737_v12, %v6540_v43  ;;  %v7849_v5 = vld [vmem:[#allocation9 + $0x420] sm:$0xf0]  ;;  %v3348_v12 = vperm.slane %v8457_v23, 1 }
 0x445   :  { %v6765_v20 = vor.u32 %v7793_v16, %v6764_v15  ;;  %v6988_v4 = vld [vmem:[#allocation9 + $0x408] sm:$0xf]  ;;  %v6960_v16 = vld [vmem:[#allocation9 + $0x3d0] sm:$0xf] }
 0x446   :  { %4801 = vmatmul.bf16.vlgmr.msrb.gmra.mxu3 %v8422_v18  ;;  %4815 = vmatmul.bf16.vlgmr.msrb.gmra.mxu1 %v8424_v61 }
 0x447   :  { %4849 = vmatpush.bf16.msra.mxu3 %v6681_v19  ;;  %4863 = vmatpush.bf16.msra.mxu1 %v6905_v21  ;;  %v7877_v19 = vld [vmem:[#allocation9 + $0x500] sm:$0xf0]  ;;  %v7324_v21 = vld [vmem:[#allocation9 + $0x6a8] sm:$0xf] }
 0x448   :  { %4825 = vmatpush.bf16.msrb.mxu2 %v7013_v50  ;;  %4839 = vmatpush.bf16.msrb.mxu0 %v7237_v27  ;;  %v4522_v6 = vpop.f32.mrf.mxu3  ;;  %v7101_v50 = vor.u32 %v7877_v19, %v7100_v17  ;;  %v7325_v27 = vor.u32 %v7933_v22, %v7324_v21  ;;  %v7842_v17 = vld [vmem:[#allocation9 + $0x3e8] sm:$0xf0]  ;;  %v7184_v19 = vld [vmem:[#allocation9 + $0x590] sm:$0xf] }
 0x449   :  { %v4523_v56 = vadd.f32 %v4522_v6, %v3347_v34  ;;  %v7212_v6 = vld [vmem:[#allocation9 + $0x5c8] sm:$0xf]  ;;  %v7898_v21 = vld [vmem:[#allocation9 + $0x5a8] sm:$0xf0] }
 0x44b   :  { %4850 = vmatpush.bf16.msra.mxu3 %v6653_v26  ;;  %4864 = vmatpush.bf16.msra.mxu1 %v6877_v30  ;;  %v7072_v26 = vld [vmem:[#allocation9 + $0x4b0] sm:$0xf]  ;;  %v4536_v30 = vpop.f32.mrf.mxu1 }
 0x44c   :  { %4826 = vmatpush.bf16.msrb.mxu2 %v6985_v38  ;;  %4840 = vmatpush.bf16.msrb.mxu0 %v7209_v39  ;;  %v6484_v38 = vld [vmem:[#allocation9 + $0x18] sm:$0xf]  ;;  %v7723_v39 = vld [vmem:[#allocation9 + $0x30] sm:$0xf0]  ;;  %v7073_v40 = vor.u32 %v7870_v31, %v7072_v26  ;;  %v4537_v1 = vadd.f32 %v4536_v30, %v4523_v56 }
 0x44f   :  { %4851 = vmatpush.bf16.msra.mxu3 %v6625_v41  ;;  %4865 = vmatpush.bf16.msra.mxu1 %v6849_v54  ;;  %v7297_v41 = vor.u32 %v7926_v8, %v7296_v32  ;;  %v6708_v54 = vld [vmem:[#allocation9 + $0x1d8] sm:$0xf]  ;;  %v7157_v32 = vor.u32 %v7891_v29, %v7156_v28 }
 0x450   :  { %4827 = vmatpush.bf16.msrb.mxu2 %v6957_v53  ;;  %4841 = vmatpush.bf16.msrb.mxu0 %v7181_v60  ;;  %v4524_v33 = vpop.f32.mrf.mxu3  ;;  %v6485_v53 = vor.u32 %v7723_v39, %v6484_v38  ;;  %v6709_v60 = vor.u32 %v7779_v46, %v6708_v54 }
 0x452   :  { %v4564_v48 = vpop.f32.mrf.mxu0 }
 0x453   :  { %4852 = vmatpush.bf16.msra.mxu3 %v6597_v42  ;;  %4866 = vmatpush.bf16.msra.mxu1 %v6821_v58  ;;  %v7016_v58 = vld [vmem:[#allocation9 + $0x440] sm:$0xf]  ;;  %v4538_v0 = vpop.f32.mrf.mxu1 }
 0x454   :  { %4828 = vmatpush.bf16.msrb.mxu2 %v6929_v9  ;;  %4842 = vmatpush.bf16.msrb.mxu0 %v7153_v7  ;;  %v7017_v2 = vor.u32 %v7856_v59, %v7016_v58  ;;  %v7905_v9 = vld [vmem:[#allocation9 + $0x5e0] sm:$0xf0] }
 0x457   :  { %4853 = vmatpush.bf16.msra.mxu3 %v6569_v10  ;;  %4867 = vmatpush.bf16.msra.mxu1 %v6793_v11  ;;  %v4525_v11 = vadd.f32 %v4524_v33, %v3347_v34 }
 0x458   :  { %4877 = vmatpush.bf16.msra.mxu2 %v7129_v13  ;;  %4891 = vmatpush.bf16.msra.mxu0 %v7353_v14  ;;  %v4550_v42 = vpop.f32.mrf.mxu2  ;;  %v6989_v13 = vor.u32 %v7849_v5, %v6988_v4  ;;  %v7213_v14 = vor.u32 %v7905_v9, %v7212_v6 }
 0x459   :  { %4829 = vmatmul.bf16.vlgmr.msrb.gmra.mxu2 %v8430_v44  ;;  %4843 = vmatmul.bf16.vlgmr.msrb.gmra.mxu0 %v8432_v45  ;;  %v4551_v7 = vadd.f32 %v4550_v42, %v4537_v1  ;;  %v4578_v10 = vpop.f32.mrf.mxu3  ;;  %v3349_v1 = vperm.slane %v8457_v23, 2 }
 0x45a   :  { %v4566_v43 = vpop.f32.mrf.mxu0 }
 0x45b   :  { %4854 = vmatpush.bf16.msra.mxu3 %v6541_v55  ;;  %4868 = vmatpush.bf16.msra.mxu1 %v6765_v20  ;;  %v4565_v22 = vadd.f32 %v4564_v48, %v4551_v7  ;;  %v4539_v55 = vadd.f32 %v4538_v0, %v4525_v11  ;;  %v4579_v20 = vadd.f32 %v4578_v10, %v3348_v12  ;;  %v4592_v25 = vpop.f32.mrf.mxu1 }
 0x45c   :  { %4878 = vmatpush.bf16.msra.mxu2 %v7101_v50  ;;  %4892 = vmatpush.bf16.msra.mxu0 %v7325_v27  ;;  %v7835_v27 = vld [vmem:[#allocation9 + $0x3b0] sm:$0xf0] }
 0x45d   :  { %v4905_v26 = vsub.f32 0.0, %v4565_v22  ;;  %v6933_v31 = vor.u32 %v7835_v27, %v6932_v24  ;;  %v4593_v8 = vadd.f32 %v4592_v25, %v4579_v20 }
 0x45f   :  { %4855 = vmatpush.bf16.msra.mxu3 %v6513_v35  ;;  %4869 = vmatpush.bf16.msra.mxu1 %v6737_v36  ;;  %v4919_v38 = vmul.f32 1.442695, %v4905_v26 }
 0x460   :  { %4879 = vmatpush.bf16.msra.mxu2 %v7073_v40  ;;  %4893 = vmatpush.bf16.msra.mxu0 %v7297_v41  ;;  %v4552_v15 = vpop.f32.mrf.mxu2 }
 0x461   :  { %v4553_v50 = vadd.f32 %v4552_v15, %v4539_v55  ;;  %v4580_v30 = vpop.f32.mrf.mxu3  ;;  %7953 = vpow2.f32 %v4919_v38 }
 0x462   :  { %v4620_v35 = vpop.f32.mrf.mxu0  ;;  %v4581_v33 = vadd.f32 %v4580_v30, %v3348_v12 }
 0x463   :  { %4856 = vmatpush.bf16.msra.mxu3 %v6485_v53  ;;  %4870 = vmatpush.bf16.msra.mxu1 %v6709_v60  ;;  %v4567_v34 = vadd.f32 %v4566_v43, %v4553_v50  ;;  %v4594_v46 = vpop.f32.mrf.mxu1 }
 0x464   :  { %4880 = vmatpush.bf16.msra.mxu2 %v7045_v37  ;;  %4894 = vmatpush.bf16.msra.mxu0 %v7269_v57  ;;  %v4595_v48 = vadd.f32 %v4594_v46, %v4581_v33 }
 0x465   :  { %v4912_v41 = vsub.f32 0.0, %v4567_v34 }
 0x466   :  { %4857 = vmatmul.bf16.vlgmr.msra.gmra.mxu3 %v8422_v18  ;;  %4871 = vmatmul.bf16.vlgmr.msra.gmra.mxu1 %v8424_v61  ;;  %v6961_v18 = vor.u32 %v7842_v17, %v6960_v16  ;;  %v7185_v61 = vor.u32 %v7898_v21, %v7184_v19  ;;  %v3350_v21 = vperm.slane %v8457_v23, 3 }
 0x467   :  { %v4933_v49 = vmul.f32 1.442695, %v4912_v41  ;;  %v7954_v60 = vpop.eup %7953 }
 0x468   :  { %4881 = vmatpush.bf16.msra.mxu2 %v7017_v2  ;;  %4895 = vmatpush.bf16.msra.mxu0 %v7241_v3  ;;  %v4606_v36 = vpop.f32.mrf.mxu2  ;;  %v4947_v57 = vadd.f32 1.0, %v7954_v60 }
 0x469   :  { %v4607_v39 = vadd.f32 %v4606_v36, %v4593_v8 }
 0x46a   :  { %v4622_v53 = vpop.f32.mrf.mxu0 }
 0x46b   :  { %v4621_v40 = vadd.f32 %v4620_v35, %v4607_v39  ;;  %v4648_v4 = vpop.f32.mrf.mxu1 }
 0x46c   :  { %4882 = vmatpush.bf16.msra.mxu2 %v6989_v13  ;;  %4896 = vmatpush.bf16.msra.mxu0 %v7213_v14 }
 0x46d   :  { %v4906_v54 = vsub.f32 0.0, %v4621_v40 }
 0x46f   :  { %v4921_v47 = vmul.f32 1.442695, %v4906_v54 }
 0x470   :  { %4883 = vmatpush.bf16.msra.mxu2 %v6961_v18  ;;  %4897 = vmatpush.bf16.msra.mxu0 %v7185_v61  ;;  %v4608_v51 = vpop.f32.mrf.mxu2 }
 0x471   :  { %v4609_v52 = vadd.f32 %v4608_v51, %v4595_v48  ;;  %7955 = vpow2.f32 %v4921_v47 }
 0x472   :  { %7957 = vpow2.f32 %v4933_v49 }
 0x473   :  { %v4623_v56 = vadd.f32 %v4622_v53, %v4609_v52  ;;  %v4650_v15 = vpop.f32.mrf.mxu1 }
 0x474   :  { %4884 = vmatpush.bf16.msra.mxu2 %v6933_v31  ;;  %4898 = vmatpush.bf16.msra.mxu0 %v7157_v32 }
 0x475   :  { %v4913_v37 = vsub.f32 0.0, %v4623_v56 }
 0x476   :  { %v4676_v7 = vpop.f32.mrf.mxu0 }
 0x477   :  { %4885 = vmatmul.bf16.vlgmr.msra.gmra.mxu2 %v8430_v44  ;;  %4899 = vmatmul.bf16.vlgmr.msra.gmra.mxu0 %v8432_v45  ;;  %v4935_v42 = vmul.f32 1.442695, %v4913_v37  ;;  %v7956_v58 = vpop.eup %7955  ;;  %v4634_v44 = vpop.f32.mrf.mxu3 }
 0x478   :  { %v4948_v59 = vadd.f32 1.0, %v7956_v58  ;;  %v7958_v62 = vpop.eup %7957  ;;  %v4635_v6 = vadd.f32 %v4634_v44, %v3349_v1 }
 0x479   :  { %7959 = vpow2.f32 %v4935_v42  ;;  %v4954_v45 = vadd.f32 1.0, %v7958_v62 }
 0x47a   :  { %7961 = vrcp.f32 %v4947_v57  ;;  %v4649_v12 = vadd.f32 %v4648_v4, %v4635_v6 }
 0x47b   :  { %7963 = vrcp.f32 %v4948_v59 }
 0x47c   :  { %7965 = vrcp.f32 %v4954_v45  ;;  %v4662_v10 = vpop.f32.mrf.mxu2 }
 0x47d   :  { %v4663_v14 = vadd.f32 %v4662_v10, %v4649_v12  ;;  %v3352_v12 = vperm.slane %v8457_v23, 5 }
 0x47e   :  { %v4678_v22 = vpop.f32.mrf.mxu0 }
 0x47f   :  { %v7960_v63 = vpop.eup %7959  ;;  %v4636_v9 = vpop.f32.mrf.mxu3  ;;  %v4677_v19 = vadd.f32 %v4676_v7, %v4663_v14 }
 0x480   :  { %v7962_v0 = vpop.eup %7961  ;;  %v4955_v2 = vadd.f32 1.0, %v7960_v63  ;;  %v4637_v17 = vadd.f32 %v4636_v9, %v3349_v1 }
 0x481   :  { %v7964_v3 = vpop.eup %7963  ;;  %v4907_v18 = vsub.f32 0.0, %v4677_v19 }
 0x482   :  { %v4975_v5 = vpack.c.bf16 %v7964_v3, %v7962_v0  ;;  %7967 = vrcp.f32 %v4955_v2  ;;  %v7966_v11 = vpop.eup %7965  ;;  %v4651_v20 = vadd.f32 %v4650_v15, %v4637_v17  ;;  %v3351_v0 = vperm.slane %v8457_v23, 4 }
 0x483   :  { %v4704_v24 = vpop.f32.mrf.mxu1  ;;  %v4923_v50 = vmul.f32 1.442695, %v4907_v18 }
 0x484   :  { %4983 = vst [vmem:[%s8509_s13] sm:$0xff] %v4975_v5  ;;  %v4664_v55 = vpop.f32.mrf.mxu2 }
 0x485   :  { %v4665_v25 = vadd.f32 %v4664_v55, %v4651_v20  ;;  %7969 = vpow2.f32 %v4923_v50 }
 0x487   :  { %v4679_v29 = vadd.f32 %v4678_v22, %v4665_v25 }
 0x488   :  { %v7968_v43 = vpop.eup %7967 }
 0x489   :  { %v4979_v13 = vpack.c.bf16 %v7968_v43, %v7966_v11  ;;  %v4690_v16 = vpop.f32.mrf.mxu3  ;;  %v4914_v34 = vsub.f32 0.0, %v4679_v29 }
 0x48a   :  { %v4691_v61 = vadd.f32 %v4690_v16, %v3350_v21 }
 0x48b   :  { %4987 = vst [vmem:[%s8509_s13 + $0x1c] sm:$0xff] %v4979_v13  ;;  %v4706_v36 = vpop.f32.mrf.mxu1  ;;  %v4937_v33 = vmul.f32 1.442695, %v4914_v34  ;;  %v7970_v41 = vpop.eup %7969 }
 0x48c   :  { %v4705_v28 = vadd.f32 %v4704_v24, %v4691_v61  ;;  %v4949_v48 = vadd.f32 1.0, %v7970_v41 }
 0x491   :  { %v4692_v27 = vpop.f32.mrf.mxu3 }
 0x492   :  { %v4693_v32 = vadd.f32 %v4692_v27, %v3350_v21 }
 0x494   :  { %v4707_v39 = vadd.f32 %v4706_v36, %v4693_v32 }
 0x496   :  { %v4732_v26 = vpop.f32.mrf.mxu0 }
 0x49c   :  { %v4718_v30 = vpop.f32.mrf.mxu2 }
 0x49d   :  { %v4719_v31 = vadd.f32 %v4718_v30, %v4705_v28 }
 0x49e   :  { %v4734_v46 = vpop.f32.mrf.mxu0 }
 0x49f   :  { %v4733_v8 = vadd.f32 %v4732_v26, %v4719_v31 }
 0x4a1   :  { %v4908_v35 = vsub.f32 0.0, %v4733_v8 }
 0x4a3   :  { %v4925_v38 = vmul.f32 1.442695, %v4908_v35  ;;  %v4760_v1 = vpop.f32.mrf.mxu1 }
 0x4a4   :  { %v4720_v40 = vpop.f32.mrf.mxu2 }
 0x4a5   :  { %7971 = vpow2.f32 %v4925_v38  ;;  %v4721_v54 = vadd.f32 %v4720_v40, %v4707_v39 }
 0x4a6   :  { %7973 = vpow2.f32 %v4937_v33 }
 0x4a7   :  { %v4735_v47 = vadd.f32 %v4734_v46, %v4721_v54  ;;  %7975 = vrcp.f32 %v4949_v48 }
 0x4a9   :  { %v4915_v49 = vsub.f32 0.0, %v4735_v47  ;;  %v4746_v44 = vpop.f32.mrf.mxu3 }
 0x4aa   :  { %v4747_v2 = vadd.f32 %v4746_v44, %v3351_v0 }
 0x4ab   :  { %v7972_v51 = vpop.eup %7971  ;;  %v4939_v52 = vmul.f32 1.442695, %v4915_v49  ;;  %v4762_v7 = vpop.f32.mrf.mxu1  ;;  %v3353_v49 = vperm.slane %v8457_v23, 6 }
 0x4ac   :  { %v4950_v53 = vadd.f32 1.0, %v7972_v51  ;;  %v7974_v60 = vpop.eup %7973  ;;  %v4761_v6 = vadd.f32 %v4760_v1, %v4747_v2 }
 0x4ad   :  { %7977 = vpow2.f32 %v4939_v52  ;;  %v4956_v56 = vadd.f32 1.0, %v7974_v60  ;;  %v7976_v37 = vpop.eup %7975 }
 0x4ae   :  { %7979 = vrcp.f32 %v4950_v53 }
 0x4af   :  { %7981 = vrcp.f32 %v4956_v56 }
 0x4b1   :  { %v4748_v3 = vpop.f32.mrf.mxu3 }
 0x4b2   :  { %v4749_v11 = vadd.f32 %v4748_v3, %v3351_v0 }
 0x4b3   :  { %v7978_v57 = vpop.eup %7977 }
 0x4b4   :  { %v7980_v42 = vpop.eup %7979  ;;  %v4957_v58 = vadd.f32 1.0, %v7978_v57  ;;  %v4763_v15 = vadd.f32 %v4762_v7, %v4749_v11 }
 0x4b5   :  { %v4976_v59 = vpack.c.bf16 %v7980_v42, %v7976_v37  ;;  %v7982_v62 = vpop.eup %7981 }
 0x4b6   :  { %7983 = vrcp.f32 %v4957_v58  ;;  %v4788_v4 = vpop.f32.mrf.mxu0 }
 0x4b7   :  { %4984 = vst [vmem:[%s8509_s13 + $0x8] sm:$0xff] %v4976_v59 }
 0x4bc   :  { %v7984_v45 = vpop.eup %7983  ;;  %v4774_v5 = vpop.f32.mrf.mxu2 }
 0x4bd   :  { %v4980_v63 = vpack.c.bf16 %v7984_v45, %v7982_v62  ;;  %v4775_v9 = vadd.f32 %v4774_v5, %v4761_v6 }
 0x4be   :  { %v4790_v13 = vpop.f32.mrf.mxu0 }
 0x4bf   :  { %4988 = vst [vmem:[%s8509_s13 + $0x24] sm:$0xff] %v4980_v63  ;;  %v4789_v43 = vadd.f32 %v4788_v4, %v4775_v9 }
 0x4c1   :  { %v4909_v16 = vsub.f32 0.0, %v4789_v43 }
 0x4c3   :  { %v4816_v19 = vpop.f32.mrf.mxu1  ;;  %v4927_v22 = vmul.f32 1.442695, %v4909_v16 }
 0x4c4   :  { %v4776_v14 = vpop.f32.mrf.mxu2 }
 0x4c5   :  { %v4777_v21 = vadd.f32 %v4776_v14, %v4763_v15  ;;  %7985 = vpow2.f32 %v4927_v22 }
 0x4c7   :  { %v4791_v18 = vadd.f32 %v4790_v13, %v4777_v21 }
 0x4c9   :  { %v4802_v10 = vpop.f32.mrf.mxu3  ;;  %v4916_v28 = vsub.f32 0.0, %v4791_v18 }
 0x4ca   :  { %v4803_v17 = vadd.f32 %v4802_v10, %v3352_v12 }
 0x4cb   :  { %v4818_v26 = vpop.f32.mrf.mxu1  ;;  %v4941_v32 = vmul.f32 1.442695, %v4916_v28  ;;  %v7986_v34 = vpop.eup %7985 }
 0x4cc   :  { %v4817_v20 = vadd.f32 %v4816_v19, %v4803_v17  ;;  %v4951_v39 = vadd.f32 1.0, %v7986_v34 }
 0x4d1   :  { %v4804_v55 = vpop.f32.mrf.mxu3 }
 0x4d2   :  { %v4805_v50 = vadd.f32 %v4804_v55, %v3352_v12 }
 0x4d4   :  { %v4819_v31 = vadd.f32 %v4818_v26, %v4805_v50 }
 0x4d6   :  { %v4844_v61 = vpop.f32.mrf.mxu0 }
 0x4dc   :  { %v4830_v24 = vpop.f32.mrf.mxu2 }
 0x4dd   :  { %v4831_v25 = vadd.f32 %v4830_v24, %v4817_v20 }
 0x4de   :  { %v4846_v36 = vpop.f32.mrf.mxu0 }
 0x4df   :  { %v4845_v27 = vadd.f32 %v4844_v61, %v4831_v25 }
 0x4e1   :  { %v4910_v29 = vsub.f32 0.0, %v4845_v27 }
 0x4e3   :  { %v4929_v30 = vmul.f32 1.442695, %v4910_v29  ;;  %v4872_v57 = vpop.f32.mrf.mxu1 }
 0x4e4   :  { %v4832_v8 = vpop.f32.mrf.mxu2 }
 0x4e5   :  { %7987 = vpow2.f32 %v4929_v30  ;;  %v4833_v35 = vadd.f32 %v4832_v8, %v4819_v31 }
 0x4e6   :  { %7989 = vpow2.f32 %v4941_v32 }
 0x4e7   :  { %v4847_v38 = vadd.f32 %v4846_v36, %v4833_v35  ;;  %7991 = vrcp.f32 %v4951_v39 }
 0x4e9   :  { %v4917_v33 = vsub.f32 0.0, %v4847_v38  ;;  %v4858_v47 = vpop.f32.mrf.mxu3 }
 0x4ea   :  { %v4859_v37 = vadd.f32 %v4858_v47, %v3353_v49 }
 0x4eb   :  { %v7988_v40 = vpop.eup %7987  ;;  %v4943_v41 = vmul.f32 1.442695, %v4917_v33  ;;  %v4874_v3 = vpop.f32.mrf.mxu1 }
 0x4ec   :  { %v4952_v54 = vadd.f32 1.0, %v7988_v40  ;;  %v7990_v46 = vpop.eup %7989  ;;  %v4873_v58 = vadd.f32 %v4872_v57, %v4859_v37 }
 0x4ed   :  { %7993 = vpow2.f32 %v4943_v41  ;;  %v4958_v48 = vadd.f32 1.0, %v7990_v46  ;;  %v7992_v51 = vpop.eup %7991 }
 0x4ee   :  { %7995 = vrcp.f32 %v4952_v54 }
 0x4ef   :  { %7997 = vrcp.f32 %v4958_v48 }
 0x4f1   :  { %v4860_v42 = vpop.f32.mrf.mxu3 }
 0x4f2   :  { %v4861_v0 = vadd.f32 %v4860_v42, %v3353_v49 }
 0x4f3   :  { %v7994_v52 = vpop.eup %7993 }
 0x4f4   :  { %v7996_v53 = vpop.eup %7995  ;;  %v4959_v60 = vadd.f32 1.0, %v7994_v52  ;;  %v4900_v59 = vpop.f32.mrf.mxu0  ;;  %v4875_v5 = vadd.f32 %v4874_v3, %v4861_v0 }
 0x4f5   :  { %v4977_v56 = vpack.c.bf16 %v7996_v53, %v7992_v51  ;;  %v7998_v44 = vpop.eup %7997 }
 0x4f6   :  { %7999 = vrcp.f32 %v4959_v60 }
 0x4f7   :  { %4985 = vst [vmem:[%s8509_s13 + $0x10] sm:$0xff] %v4977_v56 }
 0x4fa   :  { %v4886_v62 = vpop.f32.mrf.mxu2 }
 0x4fb   :  { %v4887_v45 = vadd.f32 %v4886_v62, %v4873_v58 }
 0x4fc   :  { %v8000_v23 = vpop.eup %7999  ;;  %v4902_v7 = vpop.f32.mrf.mxu0 }
 0x4fd   :  { %v4981_v63 = vpack.c.bf16 %v8000_v23, %v7998_v44  ;;  %v4901_v1 = vadd.f32 %v4900_v59, %v4887_v45 }
 0x4ff   :  { %4989 = vst [vmem:[%s8509_s13 + $0x2c] sm:$0xff] %v4981_v63  ;;  %v4911_v2 = vsub.f32 0.0, %v4901_v1 }
 0x501   :  { %v4931_v4 = vmul.f32 1.442695, %v4911_v2 }
 0x502   :  { %v4888_v6 = vpop.f32.mrf.mxu2 }
 0x503   :  { %8001 = vpow2.f32 %v4931_v4  ;;  %v4889_v9 = vadd.f32 %v4888_v6, %v4875_v5 }
 0x505   :  { %v4903_v10 = vadd.f32 %v4902_v7, %v4889_v9 }
 0x507   :  { %v4918_v11 = vsub.f32 0.0, %v4903_v10 }
 0x509   :  { %v8002_v43 = vpop.eup %8001  ;;  %v4945_v12 = vmul.f32 1.442695, %v4918_v11 }
 0x50a   :  { %v4953_v13 = vadd.f32 1.0, %v8002_v43 }
 0x50b   :  { %8003 = vpow2.f32 %v4945_v12 }
 0x50c   :  { %8005 = vrcp.f32 %v4953_v13 }
 0x511   :  { %v8004_v14 = vpop.eup %8003 }
 0x512   :  { %v8006_v15 = vpop.eup %8005  ;;  %v4960_v16 = vadd.f32 1.0, %v8004_v14 }
 0x513   :  { %v4978_v17 = vpack.c.bf16 %v8006_v15, %v8006_v15 }
 0x514   :  { %8007 = vrcp.f32 %v4960_v16 }
 0x515   :  { %4986 = vst [vmem:[%s8509_s13 + $0x18] sm:$0xf] %v4978_v17 }
 0x51a   :  { %v8008_v19 = vpop.eup %8007 }
 0x51b   :  { %v4982_v21 = vpack.c.bf16 %v8008_v19, %v8008_v19 }
 0x51d   :  { %4990 = vst [vmem:[%s8509_s13 + $0x34] sm:$0xf] %v4982_v21 }
 0x51e   :  { %4999 = vsyncpa [#allocation3], 1 }
 0x51f   :  { %5000 = vsyncpa [#allocation5], 1 }
 0x520   :  { %5001 = vsyncpa [#allocation8], 1 }

</bundles_post_ra>
